<compile_context>
chip_gen: v7x
topology: tpu7x:2x2x1
jax: 0.10.0
libtpu: 0.0.40
codegen_flags: <defaults>
</compile_context>

<pallas_src>
import functools

import jax
import jax.numpy as jnp
from jax.experimental import pallas as pl
from jax.experimental.pallas import tpu as pltpu


# --------------------------------------------------------------------------- #
# Kernel
# --------------------------------------------------------------------------- #
def _perceiver_attn_kernel(x_ref, lat_ref, gm_ref, bm_ref, gl_ref, bl_ref,
                           wq_ref, wkv_ref, wo_ref, o_ref, *,
                           heads, dim_head, tb, n1, n2, dim, kv_fused,
                           approx_recip):
    """One grid step: full attention for `tb` flattened (b, t) slices."""
    eps = 1e-5                       # torch nn.LayerNorm default
    f32 = jnp.float32
    inner = heads * dim_head
    pdt = wq_ref.dtype               # matmul dtype (bf16 in production, f32 in the demo)

    def layernorm(ref, rows, g_ref, b_ref):
        # Statistics always in f32; normalized output emitted directly in the
        # matmul dtype so the f32 copy does not stay live.
        v = ref[...].reshape(rows, dim).astype(f32)
        mu = jnp.mean(v, axis=-1, keepdims=True)
        var = jnp.mean((v - mu) ** 2, axis=-1, keepdims=True)
        out = ((v - mu) * jax.lax.rsqrt(var + eps)
               * g_ref[...].astype(f32) + b_ref[...].astype(f32))
        return out.astype(pdt)

    xn = layernorm(x_ref, tb * n1, gm_ref, bm_ref)       # (tb*n1, D)
    ln = layernorm(lat_ref, tb * n2, gl_ref, bl_ref)     # (tb*n2, D)

    # Projections on the MXU in the weight dtype (f32 accumulation internally).
    # The dim_head**-0.5 attention scale is already folded into wq.
    q = jnp.dot(ln, wq_ref[...], preferred_element_type=pdt)        # (tb*n2, inner)

    if kv_fused:
        # inner % 128 == 0: single fused kv matmul per input, lane-aligned split.
        kv_med = jnp.dot(xn, wkv_ref[...], preferred_element_type=pdt)
        kv_lat = jnp.dot(ln, wkv_ref[...], preferred_element_type=pdt)
        k_med, v_med = kv_med[:, :inner], kv_med[:, inner:]
        k_lat, v_lat = kv_lat[:, :inner], kv_lat[:, inner:]
    else:
        # Pre-split (stacked) k/v weights: no non-aligned lane slicing anywhere.
        wk = wkv_ref[0]
        wv = wkv_ref[1]
        k_med = jnp.dot(xn, wk, preferred_element_type=pdt)         # (tb*n1, inner)
        v_med = jnp.dot(xn, wv, preferred_element_type=pdt)
        k_lat = jnp.dot(ln, wk, preferred_element_type=pdt)         # (tb*n2, inner)
        v_lat = jnp.dot(ln, wv, preferred_element_type=pdt)

    q3 = q.reshape(tb, n2, inner)
    km3 = k_med.reshape(tb, n1, inner)
    vm3 = v_med.reshape(tb, n1, inner)
    kl3 = k_lat.reshape(tb, n2, inner)
    vl3 = v_lat.reshape(tb, n2, inner)

    # Per-head attention, batched over the tb (b,t) slices.  The softmax over
    # the concatenated [media, latents] key set uses a shared row max and a
    # shared denominator over the two blocks (identical to the reference).
    # Each head's output projection (w_out slice) is folded straight into a
    # single f32 accumulator -> no per-head scratch, no masked lane stores.
    acc = jnp.zeros((tb * n2, dim), f32)
    # heads is small & static -> unrolled.
    # TODO(synk): for very large head counts (>=16) restructure as a
    # lax.fori_loop over a (tb, n2, heads, dim_head) view to bound live ranges.
    for h in range(heads):
        sl = slice(h * dim_head, (h + 1) * dim_head)
        qh = q3[:, :, sl]                                            # (tb, n2, dh)
        sim_m = jnp.einsum('bid,bjd->bij', qh, km3[:, :, sl],
                           preferred_element_type=f32)               # (tb, n2, n1)
        sim_l = jnp.einsum('bid,bjd->bij', qh, kl3[:, :, sl],
                           preferred_element_type=f32)               # (tb, n2, n2)
        row_max = jnp.maximum(jnp.max(sim_m, axis=-1, keepdims=True),
                              jnp.max(sim_l, axis=-1, keepdims=True))
        e_m = jnp.exp(sim_m - row_max)
        e_l = jnp.exp(sim_l - row_max)
        denom = (jnp.sum(e_m, axis=-1, keepdims=True)
                 + jnp.sum(e_l, axis=-1, keepdims=True))             # (tb, n2, 1)
        # Probabilities go back through the MXU in the matmul dtype.
        num = (jnp.einsum('bij,bjd->bid', e_m.astype(pdt), vm3[:, :, sl],
                          preferred_element_type=f32)
               + jnp.einsum('bij,bjd->bid', e_l.astype(pdt), vl3[:, :, sl],
                            preferred_element_type=f32))             # (tb, n2, dh)
        if approx_recip:
            inv = pl.reciprocal(denom, approx=True)   # EUP slot; ~bf16 accuracy
        else:
            inv = 1.0 / denom                         # exact (default)
        head_out = (num * inv).reshape(tb * n2, dim_head)
        acc = acc + jnp.dot(head_out.astype(pdt), wo_ref[sl, :],
                            preferred_element_type=f32)              # (tb*n2, D)

    o_ref[...] = acc.reshape(tb, n2, dim).astype(o_ref.dtype)


# --------------------------------------------------------------------------- #
# Tiling / VMEM heuristics
# --------------------------------------------------------------------------- #
def _vmem_limits():
    """Per-generation (scoped vmem limit, working budget) in bytes."""
    try:
        cap = pltpu.get_tpu_info().vmem_capacity_bytes   # 128 MiB v5e/v6e, 64 MiB v7x
    except Exception:
        cap = 64 << 20                                   # conservative fallback
    limit = min(int(cap * 3 // 4), 112 << 20)            # ~96 MiB v5e/v6e, ~48 MiB v7x
    budget = int(limit * 0.8)                            # headroom for compiler temps
    return limit, budget


def _choose_block_bt(bt, n1, n2, dim, inner, act_bytes, w_bytes, budget_bytes):
    """How many flattened (b,t) slices to process per grid step."""
    # Resident params (wq + wkv + wo + LN), conservatively assumed double-buffered.
    fixed = 2 * (4 * dim * inner + 4 * dim) * w_bytes
    avail = max(budget_bytes - fixed, budget_bytes // 4)

    # Per (b,t) slice: pipelined tiles + in-kernel intermediates.
    per = 0
    per += 2 * (n1 + 2 * n2) * dim * act_bytes       # double-buffered x / latents / out tiles
    per += (n1 + n2) * dim * (4 + w_bytes)           # f32 LN working set + normalized copy
    per += (2 * n1 + 3 * n2) * inner * w_bytes       # q, k/v (media + latents)
    per += 3 * n2 * (n1 + n2) * 4                    # sim / exp / prob temporaries (live head)
    per += 2 * n2 * dim * 4                          # f32 output accumulator + store temp
    per = max(per, 1)

    fit = max(1, avail // per)
    target_tb = max(1, pl.cdiv(1024, max(n1, n2)))   # target ~512-1024 matmul rows
    tb = int(max(1, min(bt, fit, target_tb, 256)))
    # Keep >= 2 grid steps so the "parallel" axis can shard across v7x's two
    # TensorCores (negligible cost on single-core v5e/v6e).
    if bt >= 2:
        tb = min(tb, max(1, bt // 2))
    return tb


def _largest_divisor_leq(n, cap):
    for d in range(min(cap, n), 0, -1):
        if n % d == 0:
            return d
    return 1


# --------------------------------------------------------------------------- #
# Wrapper
# --------------------------------------------------------------------------- #
def perceiver_attention(x, latents, params, *, heads, dim_head,
                        block_bt=None, matmul_dtype=None,
                        approx_recip=False, single_buffer_params=True):
    """Forward pass of PerceiverAttention (mmpretrain Flamingo) via Pallas.

    matmul_dtype: optionally cast the weights (and therefore all MXU work) to
      e.g. jnp.bfloat16 for a 2-4x MXU speedup; None keeps the param dtype so
      f32 parity checks stay exact.
    approx_recip: use the approximate EUP reciprocal for the softmax
      normalization (inference-quality; ~bf16 accuracy).
    """
    b, T, n1, D = x.shape
    n2 = latents.shape[2]
    inner = heads * dim_head
    BT = b * T

    x2 = x.reshape(BT, n1, D)
    l2 = latents.reshape(BT, n2, D)

    # ---- one-time weight transforms (wrapper-side, not per grid step) ----
    w_q, w_kv, w_out = params["w_q"], params["w_kv"], params["w_out"]
    if matmul_dtype is not None:
        w_q, w_kv, w_out = (w_q.astype(matmul_dtype), w_kv.astype(matmul_dtype),
                            w_out.astype(matmul_dtype))
    # Fold the attention scale into w_q (saves per-head VALU multiplies).
    w_q = w_q * jnp.asarray(dim_head ** -0.5, w_q.dtype)

    kv_fused = (inner % 128 == 0)
    if kv_fused:
        wkv = w_kv                                             # (D, 2*inner)
        wkv_shape, wkv_index = (D, 2 * inner), (lambda i: (0, 0))
    else:
        # Pre-split so the kernel never lane-slices at a non-128 boundary.
        wkv = jnp.stack([w_kv[:, :inner], w_kv[:, inner:]])    # (2, D, inner)
        wkv_shape, wkv_index = (2, D, inner), (lambda i: (0, 0, 0))

    gm = params["gamma_media"].reshape(1, D)
    bm = params["beta_media"].reshape(1, D)
    gl = params["gamma_latents"].reshape(1, D)
    bl = params["beta_latents"].reshape(1, D)

    vmem_limit, vmem_budget = _vmem_limits()
    act_bytes = jnp.dtype(x2.dtype).itemsize
    w_bytes = jnp.dtype(w_q.dtype).itemsize

    if block_bt is None:
        tb = _choose_block_bt(BT, n1, n2, D, inner, act_bytes, w_bytes, vmem_budget)
        # Prefer a divisor of BT so no padded HBM copy of the activations is made.
        d = _largest_divisor_leq(BT, tb)
        if 2 * d >= tb:
            tb = d
    else:
        tb = int(block_bt)

    pad = (-BT) % tb
    if pad:  # only when an explicit non-dividing block_bt is requested
        x2 = jnp.pad(x2, ((0, pad), (0, 0), (0, 0)))
        l2 = jnp.pad(l2, ((0, pad), (0, 0), (0, 0)))
    bt_pad = BT + pad
    grid = (bt_pad // tb,)

    kernel = functools.partial(
        _perceiver_attn_kernel, heads=heads, dim_head=dim_head, tb=tb,
        n1=n1, n2=n2, dim=D, kv_fused=kv_fused, approx_recip=approx_recip)

    def run(use_single_buffer):
        def const_spec(shape, index_map):
            # Constant-index params don't need double buffering; Buffered(1)
            # halves their resident VMEM (biggest win on v7x's 64 MiB).
            if use_single_buffer:
                return pl.BlockSpec(shape, index_map, pipeline_mode=pl.Buffered(1))
            return pl.BlockSpec(shape, index_map)

        c2 = lambda i: (0, 0)  # noqa: E731
        return pl.pallas_call(
            kernel,
            out_shape=jax.ShapeDtypeStruct((bt_pad, n2, D), latents.dtype),
            grid_spec=pltpu.PrefetchScalarGridSpec(
                num_scalar_prefetch=0,
                grid=grid,
                in_specs=[
                    pl.BlockSpec((tb, n1, D), lambda i: (i, 0, 0)),
                    pl.BlockSpec((tb, n2, D), lambda i: (i, 0, 0)),
                    const_spec((1, D), c2),
                    const_spec((1, D), c2),
                    const_spec((1, D), c2),
                    const_spec((1, D), c2),
                    const_spec((D, inner), c2),
                    const_spec(wkv_shape, wkv_index),
                    const_spec((inner, D), c2),
                ],
                out_specs=pl.BlockSpec((tb, n2, D), lambda i: (i, 0, 0)),
            ),
            compiler_params=pltpu.CompilerParams(
                dimension_semantics=("parallel",),
                vmem_limit_bytes=vmem_limit),
        )(x2, l2, gm, bm, gl, bl, w_q, wkv, w_out)

    if single_buffer_params:
        try:
            out = run(True)
        except Exception:
            # pipeline_mode=pl.Buffered(1) support varies across jax versions;
            # fall back to default (double-buffered) resident params.
            out = run(False)
    else:
        out = run(False)

    return out[:BT].reshape(b, T, n2, D)


# --------------------------------------------------------------------------- #
# Pure-JAX reference (mirrors the PyTorch forward exactly)
# --------------------------------------------------------------------------- #
def reference_perceiver_attention(x, latents, params, *, heads, dim_head):
    eps = 1e-5

    def layernorm(v, g, b):
        mu = jnp.mean(v, axis=-1, keepdims=True)
        var = jnp.mean((v - mu) ** 2, axis=-1, keepdims=True)
        return (v - mu) / jnp.sqrt(var + eps) * g + b

    xn = layernorm(x, params["gamma_media"], params["beta_media"])
    ln = layernorm(latents, params["gamma_latents"], params["beta_latents"])
    q = jnp.einsum("btnd,de->btne", ln, params["w_q"])
    kv_in = jnp.concatenate([xn, ln], axis=-2)
    kv = jnp.einsum("btnd,de->btne", kv_in, params["w_kv"])
    inner = heads * dim_head
    k, v = kv[..., :inner], kv[..., inner:]

    def split_heads(t):
        bb, TT, n, _ = t.shape
        return t.reshape(bb, TT, n, heads, dim_head).transpose(0, 3, 1, 2, 4)

    q, k, v = split_heads(q), split_heads(k), split_heads(v)
    q = q * (dim_head ** -0.5)
    sim = jnp.einsum("bhtid,bhtjd->bhtij", q, k)
    sim = sim - jnp.max(sim, axis=-1, keepdims=True)
    attn = jax.nn.softmax(sim, axis=-1)
    out = jnp.einsum("bhtij,bhtjd->bhtid", attn, v)
    bb, hh, TT, nn, dd = out.shape
    out = out.transpose(0, 2, 3, 1, 4).reshape(bb, TT, nn, hh * dd)
    return jnp.einsum("btne,ed->btnd", out, params["w_out"])


# --------------------------------------------------------------------------- #
# Demo / correctness check
# --------------------------------------------------------------------------- #
if __name__ == "__main__":
    b, T, n1, n2 = 2, 3, 16, 8
    D, heads, dim_head = 32, 4, 8
    inner = heads * dim_head

    key = jax.random.PRNGKey(0)
    ks = jax.random.split(key, 9)
    x = jax.random.normal(ks[0], (b, T, n1, D), jnp.float32)
    latents = jax.random.normal(ks[1], (b, T, n2, D), jnp.float32)

    params = {
        "gamma_media": 1.0 + 0.1 * jax.random.normal(ks[2], (D,), jnp.float32),
        "beta_media": 0.1 * jax.random.normal(ks[3], (D,), jnp.float32),
        "gamma_latents": 1.0 + 0.1 * jax.random.normal(ks[4], (D,), jnp.float32),
        "beta_latents": 0.1 * jax.random.normal(ks[5], (D,), jnp.float32),
        # nn.Linear weights stored as (in_features, out_features) -> x @ W.
        "w_q": jax.random.normal(ks[6], (D, inner), jnp.float32) * (D ** -0.5),
        "w_kv": jax.random.normal(ks[7], (D, 2 * inner), jnp.float32) * (D ** -0.5),
        "w_out": jax.random.normal(ks[8], (inner, D), jnp.float32) * (inner ** -0.5),
    }

    ref = reference_perceiver_attention(x, latents, params, heads=heads,
                                        dim_head=dim_head)

    # Run 1: automatic tile size (picks a divisor of b*T -> 2-step grid, no pad).
    out = perceiver_attention(x, latents, params, heads=heads, dim_head=dim_head)
    out = jax.block_until_ready(out)
    assert out.shape == (b, T, n2, D)
    # Tolerance covers TPU default f32-matmul precision (bf16 MXU passes) on
    # both the kernel and the reference; exact-arithmetic agreement is ~1e-6.
    assert jnp.allclose(out, ref, rtol=1e-2, atol=1e-2), \
        "mismatch vs reference (auto tiles)"

    # Run 2: explicit non-dividing block -> exercises the padded-tail path.
    out2 = perceiver_attention(x, latents, params, heads=heads,
                               dim_head=dim_head, block_bt=4)
    out2 = jax.block_until_ready(out2)
    assert jnp.allclose(out2, ref, rtol=1e-2, atol=1e-2), \
        "mismatch vs reference (padded tail)"

    print("KERNEL_OK")
</pallas_src>

<mosaic_0001>
module attributes {stable_mosaic.version = 11 : i64} {
  func.func @_perceiver_attn_kernel(%arg0: i32, %arg1: memref<3x16x32xf32, #tpu.memory_space<vmem>>, %arg2: memref<3x8x32xf32, #tpu.memory_space<vmem>>, %arg3: memref<1x32xf32, #tpu.memory_space<vmem>>, %arg4: memref<1x32xf32, #tpu.memory_space<vmem>>, %arg5: memref<1x32xf32, #tpu.memory_space<vmem>>, %arg6: memref<1x32xf32, #tpu.memory_space<vmem>>, %arg7: memref<32x32xf32, #tpu.memory_space<vmem>>, %arg8: memref<2x32x32xf32, #tpu.memory_space<vmem>>, %arg9: memref<32x32xf32, #tpu.memory_space<vmem>>, %arg10: memref<3x8x32xf32, #tpu.memory_space<vmem>>) attributes {dimension_semantics = [#tpu.dimension_semantics<parallel>], iteration_bounds = array<i64: 2>, scalar_prefetch = 0 : i64, scratch_operands = 0 : i64, tpu.core_type = #tpu.core_type<tc>, window_params = [{transform_indices = @transform_0, window_bounds = array<i64: 3, 16, 32>}, {transform_indices = @transform_1, window_bounds = array<i64: 3, 8, 32>}, {pipeline_mode = #tpu.pipeline_mode<synchronous>, transform_indices = @transform_2, window_bounds = array<i64: 1, 32>}, {pipeline_mode = #tpu.pipeline_mode<synchronous>, transform_indices = @transform_3, window_bounds = array<i64: 1, 32>}, {pipeline_mode = #tpu.pipeline_mode<synchronous>, transform_indices = @transform_4, window_bounds = array<i64: 1, 32>}, {pipeline_mode = #tpu.pipeline_mode<synchronous>, transform_indices = @transform_5, window_bounds = array<i64: 1, 32>}, {pipeline_mode = #tpu.pipeline_mode<synchronous>, transform_indices = @transform_6, window_bounds = array<i64: 32, 32>}, {pipeline_mode = #tpu.pipeline_mode<synchronous>, transform_indices = @transform_7, window_bounds = array<i64: 2, 32, 32>}, {pipeline_mode = #tpu.pipeline_mode<synchronous>, transform_indices = @transform_8, window_bounds = array<i64: 32, 32>}, {transform_indices = @transform_9, window_bounds = array<i64: 3, 8, 32>}]} {
    %c0 = arith.constant 0 : index
    %c0_0 = arith.constant 0 : index
    %c0_1 = arith.constant 0 : index
    %0 = vector.load %arg1[%c0, %c0_0, %c0_1] : memref<3x16x32xf32, #tpu.memory_space<vmem>>, vector<3x16x32xf32>
    %1 = vector.shape_cast %0 : vector<3x16x32xf32> to vector<48x32xf32>
    %cst = arith.constant dense<0.000000e+00> : vector<48xf32>
    %2 = vector.multi_reduction <add>, %1, %cst [1] : vector<48x32xf32> to vector<48xf32>
    %3 = vector.shape_cast %2 : vector<48xf32> to vector<48x1xf32>
    %cst_2 = arith.constant 3.200000e+01 : f32
    %4 = vector.broadcast %cst_2 : f32 to vector<48x1xf32>
    %5 = arith.divf %3, %4 : vector<48x1xf32>
    %6 = vector.broadcast %5 : vector<48x1xf32> to vector<48x32xf32>
    %7 = arith.subf %1, %6 : vector<48x32xf32>
    %8 = arith.mulf %7, %7 : vector<48x32xf32>
    %cst_3 = arith.constant dense<0.000000e+00> : vector<48xf32>
    %9 = vector.multi_reduction <add>, %8, %cst_3 [1] : vector<48x32xf32> to vector<48xf32>
    %10 = vector.shape_cast %9 : vector<48xf32> to vector<48x1xf32>
    %cst_4 = arith.constant 3.200000e+01 : f32
    %11 = vector.broadcast %cst_4 : f32 to vector<48x1xf32>
    %12 = arith.divf %10, %11 : vector<48x1xf32>
    %13 = vector.broadcast %5 : vector<48x1xf32> to vector<48x32xf32>
    %14 = arith.subf %1, %13 : vector<48x32xf32>
    %cst_5 = arith.constant 9.99999974E-6 : f32
    %15 = vector.broadcast %cst_5 : f32 to vector<48x1xf32>
    %16 = arith.addf %12, %15 : vector<48x1xf32>
    %17 = math.rsqrt %16 : vector<48x1xf32>
    %18 = vector.broadcast %17 : vector<48x1xf32> to vector<48x32xf32>
    %19 = arith.mulf %14, %18 : vector<48x32xf32>
    %c0_6 = arith.constant 0 : index
    %c0_7 = arith.constant 0 : index
    %20 = vector.load %arg3[%c0_6, %c0_7] : memref<1x32xf32, #tpu.memory_space<vmem>>, vector<1x32xf32>
    %21 = vector.broadcast %20 : vector<1x32xf32> to vector<48x32xf32>
    %22 = arith.mulf %19, %21 : vector<48x32xf32>
    %c0_8 = arith.constant 0 : index
    %c0_9 = arith.constant 0 : index
    %23 = vector.load %arg4[%c0_8, %c0_9] : memref<1x32xf32, #tpu.memory_space<vmem>>, vector<1x32xf32>
    %24 = vector.broadcast %23 : vector<1x32xf32> to vector<48x32xf32>
    %25 = arith.addf %22, %24 : vector<48x32xf32>
    %c0_10 = arith.constant 0 : index
    %c0_11 = arith.constant 0 : index
    %c0_12 = arith.constant 0 : index
    %26 = vector.load %arg2[%c0_10, %c0_11, %c0_12] : memref<3x8x32xf32, #tpu.memory_space<vmem>>, vector<3x8x32xf32>
    %27 = vector.shape_cast %26 : vector<3x8x32xf32> to vector<24x32xf32>
    %cst_13 = arith.constant dense<0.000000e+00> : vector<24xf32>
    %28 = vector.multi_reduction <add>, %27, %cst_13 [1] : vector<24x32xf32> to vector<24xf32>
    %29 = vector.shape_cast %28 : vector<24xf32> to vector<24x1xf32>
    %cst_14 = arith.constant 3.200000e+01 : f32
    %30 = vector.broadcast %cst_14 : f32 to vector<24x1xf32>
    %31 = arith.divf %29, %30 : vector<24x1xf32>
    %32 = vector.broadcast %31 : vector<24x1xf32> to vector<24x32xf32>
    %33 = arith.subf %27, %32 : vector<24x32xf32>
    %34 = arith.mulf %33, %33 : vector<24x32xf32>
    %cst_15 = arith.constant dense<0.000000e+00> : vector<24xf32>
    %35 = vector.multi_reduction <add>, %34, %cst_15 [1] : vector<24x32xf32> to vector<24xf32>
    %36 = vector.shape_cast %35 : vector<24xf32> to vector<24x1xf32>
    %cst_16 = arith.constant 3.200000e+01 : f32
    %37 = vector.broadcast %cst_16 : f32 to vector<24x1xf32>
    %38 = arith.divf %36, %37 : vector<24x1xf32>
    %39 = vector.broadcast %31 : vector<24x1xf32> to vector<24x32xf32>
    %40 = arith.subf %27, %39 : vector<24x32xf32>
    %cst_17 = arith.constant 9.99999974E-6 : f32
    %41 = vector.broadcast %cst_17 : f32 to vector<24x1xf32>
    %42 = arith.addf %38, %41 : vector<24x1xf32>
    %43 = math.rsqrt %42 : vector<24x1xf32>
    %44 = vector.broadcast %43 : vector<24x1xf32> to vector<24x32xf32>
    %45 = arith.mulf %40, %44 : vector<24x32xf32>
    %c0_18 = arith.constant 0 : index
    %c0_19 = arith.constant 0 : index
    %46 = vector.load %arg5[%c0_18, %c0_19] : memref<1x32xf32, #tpu.memory_space<vmem>>, vector<1x32xf32>
    %47 = vector.broadcast %46 : vector<1x32xf32> to vector<24x32xf32>
    %48 = arith.mulf %45, %47 : vector<24x32xf32>
    %c0_20 = arith.constant 0 : index
    %c0_21 = arith.constant 0 : index
    %49 = vector.load %arg6[%c0_20, %c0_21] : memref<1x32xf32, #tpu.memory_space<vmem>>, vector<1x32xf32>
    %50 = vector.broadcast %49 : vector<1x32xf32> to vector<24x32xf32>
    %51 = arith.addf %48, %50 : vector<24x32xf32>
    %c0_22 = arith.constant 0 : index
    %c0_23 = arith.constant 0 : index
    %52 = vector.load %arg7[%c0_22, %c0_23] : memref<32x32xf32, #tpu.memory_space<vmem>>, vector<32x32xf32>
    %cst_24 = arith.constant dense<0.000000e+00> : vector<24x32xf32>
    %53 = tpu.matmul %51, %52, %cst_24 {dimension_numbers = #tpu.dot_dimension_numbers<[1], [0], [0], [1], [0, 0, 1, 1], [], []>} : vector<24x32xf32>, vector<32x32xf32>, vector<24x32xf32> -> vector<24x32xf32>
    %c0_25 = arith.constant 0 : index
    %c0_26 = arith.constant 0 : index
    %c0_27 = arith.constant 0 : index
    %54 = vector.load %arg8[%c0_25, %c0_26, %c0_27] : memref<2x32x32xf32, #tpu.memory_space<vmem>>, vector<1x32x32xf32>
    %55 = vector.shape_cast %54 : vector<1x32x32xf32> to vector<32x32xf32>
    %c1 = arith.constant 1 : index
    %c0_28 = arith.constant 0 : index
    %c0_29 = arith.constant 0 : index
    %56 = vector.load %arg8[%c1, %c0_28, %c0_29] : memref<2x32x32xf32, #tpu.memory_space<vmem>>, vector<1x32x32xf32>
    %57 = vector.shape_cast %56 : vector<1x32x32xf32> to vector<32x32xf32>
    %cst_30 = arith.constant dense<0.000000e+00> : vector<48x32xf32>
    %58 = tpu.matmul %25, %55, %cst_30 {dimension_numbers = #tpu.dot_dimension_numbers<[1], [0], [0], [1], [0, 0, 1, 1], [], []>} : vector<48x32xf32>, vector<32x32xf32>, vector<48x32xf32> -> vector<48x32xf32>
    %cst_31 = arith.constant dense<0.000000e+00> : vector<48x32xf32>
    %59 = tpu.matmul %25, %57, %cst_31 {dimension_numbers = #tpu.dot_dimension_numbers<[1], [0], [0], [1], [0, 0, 1, 1], [], []>} : vector<48x32xf32>, vector<32x32xf32>, vector<48x32xf32> -> vector<48x32xf32>
    %cst_32 = arith.constant dense<0.000000e+00> : vector<24x32xf32>
    %60 = tpu.matmul %51, %55, %cst_32 {dimension_numbers = #tpu.dot_dimension_numbers<[1], [0], [0], [1], [0, 0, 1, 1], [], []>} : vector<24x32xf32>, vector<32x32xf32>, vector<24x32xf32> -> vector<24x32xf32>
    %cst_33 = arith.constant dense<0.000000e+00> : vector<24x32xf32>
    %61 = tpu.matmul %51, %57, %cst_33 {dimension_numbers = #tpu.dot_dimension_numbers<[1], [0], [0], [1], [0, 0, 1, 1], [], []>} : vector<24x32xf32>, vector<32x32xf32>, vector<24x32xf32> -> vector<24x32xf32>
    %62 = vector.shape_cast %53 : vector<24x32xf32> to vector<3x8x32xf32>
    %63 = vector.shape_cast %58 : vector<48x32xf32> to vector<3x16x32xf32>
    %64 = vector.shape_cast %59 : vector<48x32xf32> to vector<3x16x32xf32>
    %65 = vector.shape_cast %60 : vector<24x32xf32> to vector<3x8x32xf32>
    %66 = vector.shape_cast %61 : vector<24x32xf32> to vector<3x8x32xf32>
    %cst_34 = arith.constant 0.000000e+00 : f32
    %67 = vector.broadcast %cst_34 : f32 to vector<24x32xf32>
    %68 = vector.extract_strided_slice %62 {offsets = [0, 0, 0], sizes = [3, 8, 8], strides = [1, 1, 1]} : vector<3x8x32xf32> to vector<3x8x8xf32>
    %69 = vector.extract_strided_slice %63 {offsets = [0, 0, 0], sizes = [3, 16, 8], strides = [1, 1, 1]} : vector<3x16x32xf32> to vector<3x16x8xf32>
    "tpu.trace_start"() <{level = 10 : i32, message = "bid,bjd->bij"}> : () -> ()
    %cst_35 = arith.constant dense<0.000000e+00> : vector<3x8x16xf32>
    %70 = tpu.matmul %68, %69, %cst_35 {dimension_numbers = #tpu.dot_dimension_numbers<[2], [2], [1], [1], [0, 0, 0, 1, 1, 1], [0], [0]>} : vector<3x8x8xf32>, vector<3x16x8xf32>, vector<3x8x16xf32> -> vector<3x8x16xf32>
    "tpu.trace_stop"() : () -> ()
    %71 = vector.extract_strided_slice %65 {offsets = [0, 0, 0], sizes = [3, 8, 8], strides = [1, 1, 1]} : vector<3x8x32xf32> to vector<3x8x8xf32>
    "tpu.trace_start"() <{level = 10 : i32, message = "bid,bjd->bij"}> : () -> ()
    %cst_36 = arith.constant dense<0.000000e+00> : vector<3x8x8xf32>
    %72 = tpu.matmul %68, %71, %cst_36 {dimension_numbers = #tpu.dot_dimension_numbers<[2], [2], [1], [1], [0, 0, 0, 1, 1, 1], [0], [0]>} : vector<3x8x8xf32>, vector<3x8x8xf32>, vector<3x8x8xf32> -> vector<3x8x8xf32>
    "tpu.trace_stop"() : () -> ()
    %cst_37 = arith.constant dense<0xFF800000> : vector<3x8xf32>
    %73 = vector.multi_reduction <maximumf>, %70, %cst_37 [2] : vector<3x8x16xf32> to vector<3x8xf32>
    %74 = vector.shape_cast %73 : vector<3x8xf32> to vector<3x8x1xf32>
    %cst_38 = arith.constant dense<0xFF800000> : vector<3x8xf32>
    %75 = vector.multi_reduction <maximumf>, %72, %cst_38 [2] : vector<3x8x8xf32> to vector<3x8xf32>
    %76 = vector.shape_cast %75 : vector<3x8xf32> to vector<3x8x1xf32>
    %77 = arith.maximumf %74, %76 : vector<3x8x1xf32>
    %78 = vector.broadcast %77 : vector<3x8x1xf32> to vector<3x8x16xf32>
    %79 = arith.subf %70, %78 : vector<3x8x16xf32>
    %80 = math.exp %79 : vector<3x8x16xf32>
    %81 = vector.broadcast %77 : vector<3x8x1xf32> to vector<3x8x8xf32>
    %82 = arith.subf %72, %81 : vector<3x8x8xf32>
    %83 = math.exp %82 : vector<3x8x8xf32>
    %cst_39 = arith.constant dense<0.000000e+00> : vector<3x8xf32>
    %84 = vector.multi_reduction <add>, %80, %cst_39 [2] : vector<3x8x16xf32> to vector<3x8xf32>
    %85 = vector.shape_cast %84 : vector<3x8xf32> to vector<3x8x1xf32>
    %cst_40 = arith.constant dense<0.000000e+00> : vector<3x8xf32>
    %86 = vector.multi_reduction <add>, %83, %cst_40 [2] : vector<3x8x8xf32> to vector<3x8xf32>
    %87 = vector.shape_cast %86 : vector<3x8xf32> to vector<3x8x1xf32>
    %88 = arith.addf %85, %87 : vector<3x8x1xf32>
    %89 = vector.extract_strided_slice %64 {offsets = [0, 0, 0], sizes = [3, 16, 8], strides = [1, 1, 1]} : vector<3x16x32xf32> to vector<3x16x8xf32>
    "tpu.trace_start"() <{level = 10 : i32, message = "bij,bjd->bid"}> : () -> ()
    %cst_41 = arith.constant dense<0.000000e+00> : vector<3x8x8xf32>
    %90 = tpu.matmul %80, %89, %cst_41 {dimension_numbers = #tpu.dot_dimension_numbers<[2], [1], [1], [2], [0, 0, 0, 1, 1, 2], [0], [0]>} : vector<3x8x16xf32>, vector<3x16x8xf32>, vector<3x8x8xf32> -> vector<3x8x8xf32>
    "tpu.trace_stop"() : () -> ()
    %91 = vector.extract_strided_slice %66 {offsets = [0, 0, 0], sizes = [3, 8, 8], strides = [1, 1, 1]} : vector<3x8x32xf32> to vector<3x8x8xf32>
    "tpu.trace_start"() <{level = 10 : i32, message = "bij,bjd->bid"}> : () -> ()
    %cst_42 = arith.constant dense<0.000000e+00> : vector<3x8x8xf32>
    %92 = tpu.matmul %83, %91, %cst_42 {dimension_numbers = #tpu.dot_dimension_numbers<[2], [1], [1], [2], [0, 0, 0, 1, 1, 2], [0], [0]>} : vector<3x8x8xf32>, vector<3x8x8xf32>, vector<3x8x8xf32> -> vector<3x8x8xf32>
    "tpu.trace_stop"() : () -> ()
    %93 = arith.addf %90, %92 : vector<3x8x8xf32>
    %cst_43 = arith.constant 1.000000e+00 : f32
    %94 = vector.broadcast %cst_43 : f32 to vector<3x8x1xf32>
    %95 = arith.divf %94, %88 : vector<3x8x1xf32>
    %96 = vector.broadcast %95 : vector<3x8x1xf32> to vector<3x8x8xf32>
    %97 = arith.mulf %93, %96 : vector<3x8x8xf32>
    %98 = vector.shape_cast %97 : vector<3x8x8xf32> to vector<24x8xf32>
    %c0_44 = arith.constant 0 : index
    %c0_45 = arith.constant 0 : index
    %99 = vector.load %arg9[%c0_44, %c0_45] : memref<32x32xf32, #tpu.memory_space<vmem>>, vector<8x32xf32>
    %cst_46 = arith.constant dense<0.000000e+00> : vector<24x32xf32>
    %100 = tpu.matmul %98, %99, %cst_46 {dimension_numbers = #tpu.dot_dimension_numbers<[1], [0], [0], [1], [0, 0, 1, 1], [], []>} : vector<24x8xf32>, vector<8x32xf32>, vector<24x32xf32> -> vector<24x32xf32>
    %101 = arith.addf %67, %100 : vector<24x32xf32>
    %102 = vector.extract_strided_slice %62 {offsets = [0, 0, 8], sizes = [3, 8, 8], strides = [1, 1, 1]} : vector<3x8x32xf32> to vector<3x8x8xf32>
    %103 = vector.extract_strided_slice %63 {offsets = [0, 0, 8], sizes = [3, 16, 8], strides = [1, 1, 1]} : vector<3x16x32xf32> to vector<3x16x8xf32>
    "tpu.trace_start"() <{level = 10 : i32, message = "bid,bjd->bij"}> : () -> ()
    %cst_47 = arith.constant dense<0.000000e+00> : vector<3x8x16xf32>
    %104 = tpu.matmul %102, %103, %cst_47 {dimension_numbers = #tpu.dot_dimension_numbers<[2], [2], [1], [1], [0, 0, 0, 1, 1, 1], [0], [0]>} : vector<3x8x8xf32>, vector<3x16x8xf32>, vector<3x8x16xf32> -> vector<3x8x16xf32>
    "tpu.trace_stop"() : () -> ()
    %105 = vector.extract_strided_slice %65 {offsets = [0, 0, 8], sizes = [3, 8, 8], strides = [1, 1, 1]} : vector<3x8x32xf32> to vector<3x8x8xf32>
    "tpu.trace_start"() <{level = 10 : i32, message = "bid,bjd->bij"}> : () -> ()
    %cst_48 = arith.constant dense<0.000000e+00> : vector<3x8x8xf32>
    %106 = tpu.matmul %102, %105, %cst_48 {dimension_numbers = #tpu.dot_dimension_numbers<[2], [2], [1], [1], [0, 0, 0, 1, 1, 1], [0], [0]>} : vector<3x8x8xf32>, vector<3x8x8xf32>, vector<3x8x8xf32> -> vector<3x8x8xf32>
    "tpu.trace_stop"() : () -> ()
    %cst_49 = arith.constant dense<0xFF800000> : vector<3x8xf32>
    %107 = vector.multi_reduction <maximumf>, %104, %cst_49 [2] : vector<3x8x16xf32> to vector<3x8xf32>
    %108 = vector.shape_cast %107 : vector<3x8xf32> to vector<3x8x1xf32>
    %cst_50 = arith.constant dense<0xFF800000> : vector<3x8xf32>
    %109 = vector.multi_reduction <maximumf>, %106, %cst_50 [2] : vector<3x8x8xf32> to vector<3x8xf32>
    %110 = vector.shape_cast %109 : vector<3x8xf32> to vector<3x8x1xf32>
    %111 = arith.maximumf %108, %110 : vector<3x8x1xf32>
    %112 = vector.broadcast %111 : vector<3x8x1xf32> to vector<3x8x16xf32>
    %113 = arith.subf %104, %112 : vector<3x8x16xf32>
    %114 = math.exp %113 : vector<3x8x16xf32>
    %115 = vector.broadcast %111 : vector<3x8x1xf32> to vector<3x8x8xf32>
    %116 = arith.subf %106, %115 : vector<3x8x8xf32>
    %117 = math.exp %116 : vector<3x8x8xf32>
    %cst_51 = arith.constant dense<0.000000e+00> : vector<3x8xf32>
    %118 = vector.multi_reduction <add>, %114, %cst_51 [2] : vector<3x8x16xf32> to vector<3x8xf32>
    %119 = vector.shape_cast %118 : vector<3x8xf32> to vector<3x8x1xf32>
    %cst_52 = arith.constant dense<0.000000e+00> : vector<3x8xf32>
    %120 = vector.multi_reduction <add>, %117, %cst_52 [2] : vector<3x8x8xf32> to vector<3x8xf32>
    %121 = vector.shape_cast %120 : vector<3x8xf32> to vector<3x8x1xf32>
    %122 = arith.addf %119, %121 : vector<3x8x1xf32>
    %123 = vector.extract_strided_slice %64 {offsets = [0, 0, 8], sizes = [3, 16, 8], strides = [1, 1, 1]} : vector<3x16x32xf32> to vector<3x16x8xf32>
    "tpu.trace_start"() <{level = 10 : i32, message = "bij,bjd->bid"}> : () -> ()
    %cst_53 = arith.constant dense<0.000000e+00> : vector<3x8x8xf32>
    %124 = tpu.matmul %114, %123, %cst_53 {dimension_numbers = #tpu.dot_dimension_numbers<[2], [1], [1], [2], [0, 0, 0, 1, 1, 2], [0], [0]>} : vector<3x8x16xf32>, vector<3x16x8xf32>, vector<3x8x8xf32> -> vector<3x8x8xf32>
    "tpu.trace_stop"() : () -> ()
    %125 = vector.extract_strided_slice %66 {offsets = [0, 0, 8], sizes = [3, 8, 8], strides = [1, 1, 1]} : vector<3x8x32xf32> to vector<3x8x8xf32>
    "tpu.trace_start"() <{level = 10 : i32, message = "bij,bjd->bid"}> : () -> ()
    %cst_54 = arith.constant dense<0.000000e+00> : vector<3x8x8xf32>
    %126 = tpu.matmul %117, %125, %cst_54 {dimension_numbers = #tpu.dot_dimension_numbers<[2], [1], [1], [2], [0, 0, 0, 1, 1, 2], [0], [0]>} : vector<3x8x8xf32>, vector<3x8x8xf32>, vector<3x8x8xf32> -> vector<3x8x8xf32>
    "tpu.trace_stop"() : () -> ()
    %127 = arith.addf %124, %126 : vector<3x8x8xf32>
    %cst_55 = arith.constant 1.000000e+00 : f32
    %128 = vector.broadcast %cst_55 : f32 to vector<3x8x1xf32>
    %129 = arith.divf %128, %122 : vector<3x8x1xf32>
    %130 = vector.broadcast %129 : vector<3x8x1xf32> to vector<3x8x8xf32>
    %131 = arith.mulf %127, %130 : vector<3x8x8xf32>
    %132 = vector.shape_cast %131 : vector<3x8x8xf32> to vector<24x8xf32>
    %c8 = arith.constant 8 : index
    %c0_56 = arith.constant 0 : index
    %133 = vector.load %arg9[%c8, %c0_56] : memref<32x32xf32, #tpu.memory_space<vmem>>, vector<8x32xf32>
    %cst_57 = arith.constant dense<0.000000e+00> : vector<24x32xf32>
    %134 = tpu.matmul %132, %133, %cst_57 {dimension_numbers = #tpu.dot_dimension_numbers<[1], [0], [0], [1], [0, 0, 1, 1], [], []>} : vector<24x8xf32>, vector<8x32xf32>, vector<24x32xf32> -> vector<24x32xf32>
    %135 = arith.addf %101, %134 : vector<24x32xf32>
    %136 = vector.extract_strided_slice %62 {offsets = [0, 0, 16], sizes = [3, 8, 8], strides = [1, 1, 1]} : vector<3x8x32xf32> to vector<3x8x8xf32>
    %137 = vector.extract_strided_slice %63 {offsets = [0, 0, 16], sizes = [3, 16, 8], strides = [1, 1, 1]} : vector<3x16x32xf32> to vector<3x16x8xf32>
    "tpu.trace_start"() <{level = 10 : i32, message = "bid,bjd->bij"}> : () -> ()
    %cst_58 = arith.constant dense<0.000000e+00> : vector<3x8x16xf32>
    %138 = tpu.matmul %136, %137, %cst_58 {dimension_numbers = #tpu.dot_dimension_numbers<[2], [2], [1], [1], [0, 0, 0, 1, 1, 1], [0], [0]>} : vector<3x8x8xf32>, vector<3x16x8xf32>, vector<3x8x16xf32> -> vector<3x8x16xf32>
    "tpu.trace_stop"() : () -> ()
    %139 = vector.extract_strided_slice %65 {offsets = [0, 0, 16], sizes = [3, 8, 8], strides = [1, 1, 1]} : vector<3x8x32xf32> to vector<3x8x8xf32>
    "tpu.trace_start"() <{level = 10 : i32, message = "bid,bjd->bij"}> : () -> ()
    %cst_59 = arith.constant dense<0.000000e+00> : vector<3x8x8xf32>
    %140 = tpu.matmul %136, %139, %cst_59 {dimension_numbers = #tpu.dot_dimension_numbers<[2], [2], [1], [1], [0, 0, 0, 1, 1, 1], [0], [0]>} : vector<3x8x8xf32>, vector<3x8x8xf32>, vector<3x8x8xf32> -> vector<3x8x8xf32>
    "tpu.trace_stop"() : () -> ()
    %cst_60 = arith.constant dense<0xFF800000> : vector<3x8xf32>
    %141 = vector.multi_reduction <maximumf>, %138, %cst_60 [2] : vector<3x8x16xf32> to vector<3x8xf32>
    %142 = vector.shape_cast %141 : vector<3x8xf32> to vector<3x8x1xf32>
    %cst_61 = arith.constant dense<0xFF800000> : vector<3x8xf32>
    %143 = vector.multi_reduction <maximumf>, %140, %cst_61 [2] : vector<3x8x8xf32> to vector<3x8xf32>
    %144 = vector.shape_cast %143 : vector<3x8xf32> to vector<3x8x1xf32>
    %145 = arith.maximumf %142, %144 : vector<3x8x1xf32>
    %146 = vector.broadcast %145 : vector<3x8x1xf32> to vector<3x8x16xf32>
    %147 = arith.subf %138, %146 : vector<3x8x16xf32>
    %148 = math.exp %147 : vector<3x8x16xf32>
    %149 = vector.broadcast %145 : vector<3x8x1xf32> to vector<3x8x8xf32>
    %150 = arith.subf %140, %149 : vector<3x8x8xf32>
    %151 = math.exp %150 : vector<3x8x8xf32>
    %cst_62 = arith.constant dense<0.000000e+00> : vector<3x8xf32>
    %152 = vector.multi_reduction <add>, %148, %cst_62 [2] : vector<3x8x16xf32> to vector<3x8xf32>
    %153 = vector.shape_cast %152 : vector<3x8xf32> to vector<3x8x1xf32>
    %cst_63 = arith.constant dense<0.000000e+00> : vector<3x8xf32>
    %154 = vector.multi_reduction <add>, %151, %cst_63 [2] : vector<3x8x8xf32> to vector<3x8xf32>
    %155 = vector.shape_cast %154 : vector<3x8xf32> to vector<3x8x1xf32>
    %156 = arith.addf %153, %155 : vector<3x8x1xf32>
    %157 = vector.extract_strided_slice %64 {offsets = [0, 0, 16], sizes = [3, 16, 8], strides = [1, 1, 1]} : vector<3x16x32xf32> to vector<3x16x8xf32>
    "tpu.trace_start"() <{level = 10 : i32, message = "bij,bjd->bid"}> : () -> ()
    %cst_64 = arith.constant dense<0.000000e+00> : vector<3x8x8xf32>
    %158 = tpu.matmul %148, %157, %cst_64 {dimension_numbers = #tpu.dot_dimension_numbers<[2], [1], [1], [2], [0, 0, 0, 1, 1, 2], [0], [0]>} : vector<3x8x16xf32>, vector<3x16x8xf32>, vector<3x8x8xf32> -> vector<3x8x8xf32>
    "tpu.trace_stop"() : () -> ()
    %159 = vector.extract_strided_slice %66 {offsets = [0, 0, 16], sizes = [3, 8, 8], strides = [1, 1, 1]} : vector<3x8x32xf32> to vector<3x8x8xf32>
    "tpu.trace_start"() <{level = 10 : i32, message = "bij,bjd->bid"}> : () -> ()
    %cst_65 = arith.constant dense<0.000000e+00> : vector<3x8x8xf32>
    %160 = tpu.matmul %151, %159, %cst_65 {dimension_numbers = #tpu.dot_dimension_numbers<[2], [1], [1], [2], [0, 0, 0, 1, 1, 2], [0], [0]>} : vector<3x8x8xf32>, vector<3x8x8xf32>, vector<3x8x8xf32> -> vector<3x8x8xf32>
    "tpu.trace_stop"() : () -> ()
    %161 = arith.addf %158, %160 : vector<3x8x8xf32>
    %cst_66 = arith.constant 1.000000e+00 : f32
    %162 = vector.broadcast %cst_66 : f32 to vector<3x8x1xf32>
    %163 = arith.divf %162, %156 : vector<3x8x1xf32>
    %164 = vector.broadcast %163 : vector<3x8x1xf32> to vector<3x8x8xf32>
    %165 = arith.mulf %161, %164 : vector<3x8x8xf32>
    %166 = vector.shape_cast %165 : vector<3x8x8xf32> to vector<24x8xf32>
    %c16 = arith.constant 16 : index
    %c0_67 = arith.constant 0 : index
    %167 = vector.load %arg9[%c16, %c0_67] : memref<32x32xf32, #tpu.memory_space<vmem>>, vector<8x32xf32>
    %cst_68 = arith.constant dense<0.000000e+00> : vector<24x32xf32>
    %168 = tpu.matmul %166, %167, %cst_68 {dimension_numbers = #tpu.dot_dimension_numbers<[1], [0], [0], [1], [0, 0, 1, 1], [], []>} : vector<24x8xf32>, vector<8x32xf32>, vector<24x32xf32> -> vector<24x32xf32>
    %169 = arith.addf %135, %168 : vector<24x32xf32>
    %170 = vector.extract_strided_slice %62 {offsets = [0, 0, 24], sizes = [3, 8, 8], strides = [1, 1, 1]} : vector<3x8x32xf32> to vector<3x8x8xf32>
    %171 = vector.extract_strided_slice %63 {offsets = [0, 0, 24], sizes = [3, 16, 8], strides = [1, 1, 1]} : vector<3x16x32xf32> to vector<3x16x8xf32>
    "tpu.trace_start"() <{level = 10 : i32, message = "bid,bjd->bij"}> : () -> ()
    %cst_69 = arith.constant dense<0.000000e+00> : vector<3x8x16xf32>
    %172 = tpu.matmul %170, %171, %cst_69 {dimension_numbers = #tpu.dot_dimension_numbers<[2], [2], [1], [1], [0, 0, 0, 1, 1, 1], [0], [0]>} : vector<3x8x8xf32>, vector<3x16x8xf32>, vector<3x8x16xf32> -> vector<3x8x16xf32>
    "tpu.trace_stop"() : () -> ()
    %173 = vector.extract_strided_slice %65 {offsets = [0, 0, 24], sizes = [3, 8, 8], strides = [1, 1, 1]} : vector<3x8x32xf32> to vector<3x8x8xf32>
    "tpu.trace_start"() <{level = 10 : i32, message = "bid,bjd->bij"}> : () -> ()
    %cst_70 = arith.constant dense<0.000000e+00> : vector<3x8x8xf32>
    %174 = tpu.matmul %170, %173, %cst_70 {dimension_numbers = #tpu.dot_dimension_numbers<[2], [2], [1], [1], [0, 0, 0, 1, 1, 1], [0], [0]>} : vector<3x8x8xf32>, vector<3x8x8xf32>, vector<3x8x8xf32> -> vector<3x8x8xf32>
    "tpu.trace_stop"() : () -> ()
    %cst_71 = arith.constant dense<0xFF800000> : vector<3x8xf32>
    %175 = vector.multi_reduction <maximumf>, %172, %cst_71 [2] : vector<3x8x16xf32> to vector<3x8xf32>
    %176 = vector.shape_cast %175 : vector<3x8xf32> to vector<3x8x1xf32>
    %cst_72 = arith.constant dense<0xFF800000> : vector<3x8xf32>
    %177 = vector.multi_reduction <maximumf>, %174, %cst_72 [2] : vector<3x8x8xf32> to vector<3x8xf32>
    %178 = vector.shape_cast %177 : vector<3x8xf32> to vector<3x8x1xf32>
    %179 = arith.maximumf %176, %178 : vector<3x8x1xf32>
    %180 = vector.broadcast %179 : vector<3x8x1xf32> to vector<3x8x16xf32>
    %181 = arith.subf %172, %180 : vector<3x8x16xf32>
    %182 = math.exp %181 : vector<3x8x16xf32>
    %183 = vector.broadcast %179 : vector<3x8x1xf32> to vector<3x8x8xf32>
    %184 = arith.subf %174, %183 : vector<3x8x8xf32>
    %185 = math.exp %184 : vector<3x8x8xf32>
    %cst_73 = arith.constant dense<0.000000e+00> : vector<3x8xf32>
    %186 = vector.multi_reduction <add>, %182, %cst_73 [2] : vector<3x8x16xf32> to vector<3x8xf32>
    %187 = vector.shape_cast %186 : vector<3x8xf32> to vector<3x8x1xf32>
    %cst_74 = arith.constant dense<0.000000e+00> : vector<3x8xf32>
    %188 = vector.multi_reduction <add>, %185, %cst_74 [2] : vector<3x8x8xf32> to vector<3x8xf32>
    %189 = vector.shape_cast %188 : vector<3x8xf32> to vector<3x8x1xf32>
    %190 = arith.addf %187, %189 : vector<3x8x1xf32>
    %191 = vector.extract_strided_slice %64 {offsets = [0, 0, 24], sizes = [3, 16, 8], strides = [1, 1, 1]} : vector<3x16x32xf32> to vector<3x16x8xf32>
    "tpu.trace_start"() <{level = 10 : i32, message = "bij,bjd->bid"}> : () -> ()
    %cst_75 = arith.constant dense<0.000000e+00> : vector<3x8x8xf32>
    %192 = tpu.matmul %182, %191, %cst_75 {dimension_numbers = #tpu.dot_dimension_numbers<[2], [1], [1], [2], [0, 0, 0, 1, 1, 2], [0], [0]>} : vector<3x8x16xf32>, vector<3x16x8xf32>, vector<3x8x8xf32> -> vector<3x8x8xf32>
    "tpu.trace_stop"() : () -> ()
    %193 = vector.extract_strided_slice %66 {offsets = [0, 0, 24], sizes = [3, 8, 8], strides = [1, 1, 1]} : vector<3x8x32xf32> to vector<3x8x8xf32>
    "tpu.trace_start"() <{level = 10 : i32, message = "bij,bjd->bid"}> : () -> ()
    %cst_76 = arith.constant dense<0.000000e+00> : vector<3x8x8xf32>
    %194 = tpu.matmul %185, %193, %cst_76 {dimension_numbers = #tpu.dot_dimension_numbers<[2], [1], [1], [2], [0, 0, 0, 1, 1, 2], [0], [0]>} : vector<3x8x8xf32>, vector<3x8x8xf32>, vector<3x8x8xf32> -> vector<3x8x8xf32>
    "tpu.trace_stop"() : () -> ()
    %195 = arith.addf %192, %194 : vector<3x8x8xf32>
    %cst_77 = arith.constant 1.000000e+00 : f32
    %196 = vector.broadcast %cst_77 : f32 to vector<3x8x1xf32>
    %197 = arith.divf %196, %190 : vector<3x8x1xf32>
    %198 = vector.broadcast %197 : vector<3x8x1xf32> to vector<3x8x8xf32>
    %199 = arith.mulf %195, %198 : vector<3x8x8xf32>
    %200 = vector.shape_cast %199 : vector<3x8x8xf32> to vector<24x8xf32>
    %c24 = arith.constant 24 : index
    %c0_78 = arith.constant 0 : index
    %201 = vector.load %arg9[%c24, %c0_78] : memref<32x32xf32, #tpu.memory_space<vmem>>, vector<8x32xf32>
    %cst_79 = arith.constant dense<0.000000e+00> : vector<24x32xf32>
    %202 = tpu.matmul %200, %201, %cst_79 {dimension_numbers = #tpu.dot_dimension_numbers<[1], [0], [0], [1], [0, 0, 1, 1], [], []>} : vector<24x8xf32>, vector<8x32xf32>, vector<24x32xf32> -> vector<24x32xf32>
    %203 = arith.addf %169, %202 : vector<24x32xf32>
    %204 = vector.shape_cast %203 : vector<24x32xf32> to vector<3x8x32xf32>
    %c0_80 = arith.constant 0 : index
    %c0_81 = arith.constant 0 : index
    %c0_82 = arith.constant 0 : index
    %205 = vector.load %arg10[%c0_80, %c0_81, %c0_82] : memref<3x8x32xf32, #tpu.memory_space<vmem>>, vector<3x8x32xf32>
    tpu.vector_store %arg10[%c0_80, %c0_81, %c0_82], %204 {strides = array<i32>} : memref<3x8x32xf32, #tpu.memory_space<vmem>>, vector<3x8x32xf32>,
    return
  }
  func.func @transform_0(%arg0: i32) -> (i32, i32, i32) {
    %c0_i32 = arith.constant 0 : i32
    %c0_i32_0 = arith.constant 0 : i32
    %c0_i32_1 = arith.constant 0 : i32
    return %arg0, %c0_i32, %c0_i32_0 : i32, i32, i32
  }
  func.func @transform_1(%arg0: i32) -> (i32, i32, i32) {
    %c0_i32 = arith.constant 0 : i32
    %c0_i32_0 = arith.constant 0 : i32
    %c0_i32_1 = arith.constant 0 : i32
    return %arg0, %c0_i32, %c0_i32_0 : i32, i32, i32
  }
  func.func @transform_2(%arg0: i32) -> (i32, i32) {
    %c0_i32 = arith.constant 0 : i32
    %c0_i32_0 = arith.constant 0 : i32
    %c0_i32_1 = arith.constant 0 : i32
    return %c0_i32, %c0_i32_0 : i32, i32
  }
  func.func @transform_3(%arg0: i32) -> (i32, i32) {
    %c0_i32 = arith.constant 0 : i32
    %c0_i32_0 = arith.constant 0 : i32
    %c0_i32_1 = arith.constant 0 : i32
    return %c0_i32, %c0_i32_0 : i32, i32
  }
  func.func @transform_4(%arg0: i32) -> (i32, i32) {
    %c0_i32 = arith.constant 0 : i32
    %c0_i32_0 = arith.constant 0 : i32
    %c0_i32_1 = arith.constant 0 : i32
    return %c0_i32, %c0_i32_0 : i32, i32
  }
  func.func @transform_5(%arg0: i32) -> (i32, i32) {
    %c0_i32 = arith.constant 0 : i32
    %c0_i32_0 = arith.constant 0 : i32
    %c0_i32_1 = arith.constant 0 : i32
    return %c0_i32, %c0_i32_0 : i32, i32
  }
  func.func @transform_6(%arg0: i32) -> (i32, i32) {
    %c0_i32 = arith.constant 0 : i32
    %c0_i32_0 = arith.constant 0 : i32
    %c0_i32_1 = arith.constant 0 : i32
    return %c0_i32, %c0_i32_0 : i32, i32
  }
  func.func @transform_7(%arg0: i32) -> (i32, i32, i32) {
    %c0_i32 = arith.constant 0 : i32
    %c0_i32_0 = arith.constant 0 : i32
    %c0_i32_1 = arith.constant 0 : i32
    %c0_i32_2 = arith.constant 0 : i32
    return %c0_i32, %c0_i32_0, %c0_i32_1 : i32, i32, i32
  }
  func.func @transform_8(%arg0: i32) -> (i32, i32) {
    %c0_i32 = arith.constant 0 : i32
    %c0_i32_0 = arith.constant 0 : i32
    %c0_i32_1 = arith.constant 0 : i32
    return %c0_i32, %c0_i32_0 : i32, i32
  }
  func.func @transform_9(%arg0: i32) -> (i32, i32, i32) {
    %c0_i32 = arith.constant 0 : i32
    %c0_i32_0 = arith.constant 0 : i32
    %c0_i32_1 = arith.constant 0 : i32
    return %arg0, %c0_i32, %c0_i32_0 : i32, i32, i32
  }
}

module attributes {stable_mosaic.version = 11 : i64} {
  func.func @_perceiver_attn_kernel(%arg0: i32, %arg1: memref<3x16x32xf32, #tpu.memory_space<vmem>>, %arg2: memref<3x8x32xf32, #tpu.memory_space<vmem>>, %arg3: memref<1x32xf32, #tpu.memory_space<vmem>>, %arg4: memref<1x32xf32, #tpu.memory_space<vmem>>, %arg5: memref<1x32xf32, #tpu.memory_space<vmem>>, %arg6: memref<1x32xf32, #tpu.memory_space<vmem>>, %arg7: memref<32x32xf32, #tpu.memory_space<vmem>>, %arg8: memref<2x32x32xf32, #tpu.memory_space<vmem>>, %arg9: memref<32x32xf32, #tpu.memory_space<vmem>>, %arg10: memref<3x8x32xf32, #tpu.memory_space<vmem>>) attributes {dimension_semantics = [#tpu.dimension_semantics<parallel>], iteration_bounds = array<i64: 2>, scalar_prefetch = 0 : i64, scratch_operands = 0 : i64, tpu.core_type = #tpu.core_type<tc>, window_params = [{transform_indices = @transform_0, window_bounds = array<i64: 3, 16, 32>}, {transform_indices = @transform_1, window_bounds = array<i64: 3, 8, 32>}, {pipeline_mode = #tpu.pipeline_mode<synchronous>, transform_indices = @transform_2, window_bounds = array<i64: 1, 32>}, {pipeline_mode = #tpu.pipeline_mode<synchronous>, transform_indices = @transform_3, window_bounds = array<i64: 1, 32>}, {pipeline_mode = #tpu.pipeline_mode<synchronous>, transform_indices = @transform_4, window_bounds = array<i64: 1, 32>}, {pipeline_mode = #tpu.pipeline_mode<synchronous>, transform_indices = @transform_5, window_bounds = array<i64: 1, 32>}, {pipeline_mode = #tpu.pipeline_mode<synchronous>, transform_indices = @transform_6, window_bounds = array<i64: 32, 32>}, {pipeline_mode = #tpu.pipeline_mode<synchronous>, transform_indices = @transform_7, window_bounds = array<i64: 2, 32, 32>}, {pipeline_mode = #tpu.pipeline_mode<synchronous>, transform_indices = @transform_8, window_bounds = array<i64: 32, 32>}, {transform_indices = @transform_9, window_bounds = array<i64: 3, 8, 32>}]} {
    %c0 = arith.constant 0 : index
    %c0_0 = arith.constant 0 : index
    %c0_1 = arith.constant 0 : index
    %0 = vector.load %arg1[%c0, %c0_0, %c0_1] : memref<3x16x32xf32, #tpu.memory_space<vmem>>, vector<3x16x32xf32>
    %1 = vector.shape_cast %0 : vector<3x16x32xf32> to vector<48x32xf32>
    %cst = arith.constant dense<0.000000e+00> : vector<48xf32>
    %2 = vector.multi_reduction <add>, %1, %cst [1] : vector<48x32xf32> to vector<48xf32>
    %3 = vector.shape_cast %2 : vector<48xf32> to vector<48x1xf32>
    %cst_2 = arith.constant 3.200000e+01 : f32
    %4 = vector.broadcast %cst_2 : f32 to vector<48x1xf32>
    %5 = arith.divf %3, %4 : vector<48x1xf32>
    %6 = vector.broadcast %5 : vector<48x1xf32> to vector<48x32xf32>
    %7 = arith.subf %1, %6 : vector<48x32xf32>
    %8 = arith.mulf %7, %7 : vector<48x32xf32>
    %cst_3 = arith.constant dense<0.000000e+00> : vector<48xf32>
    %9 = vector.multi_reduction <add>, %8, %cst_3 [1] : vector<48x32xf32> to vector<48xf32>
    %10 = vector.shape_cast %9 : vector<48xf32> to vector<48x1xf32>
    %cst_4 = arith.constant 3.200000e+01 : f32
    %11 = vector.broadcast %cst_4 : f32 to vector<48x1xf32>
    %12 = arith.divf %10, %11 : vector<48x1xf32>
    %13 = vector.broadcast %5 : vector<48x1xf32> to vector<48x32xf32>
    %14 = arith.subf %1, %13 : vector<48x32xf32>
    %cst_5 = arith.constant 9.99999974E-6 : f32
    %15 = vector.broadcast %cst_5 : f32 to vector<48x1xf32>
    %16 = arith.addf %12, %15 : vector<48x1xf32>
    %17 = math.rsqrt %16 : vector<48x1xf32>
    %18 = vector.broadcast %17 : vector<48x1xf32> to vector<48x32xf32>
    %19 = arith.mulf %14, %18 : vector<48x32xf32>
    %c0_6 = arith.constant 0 : index
    %c0_7 = arith.constant 0 : index
    %20 = vector.load %arg3[%c0_6, %c0_7] : memref<1x32xf32, #tpu.memory_space<vmem>>, vector<1x32xf32>
    %21 = vector.broadcast %20 : vector<1x32xf32> to vector<48x32xf32>
    %22 = arith.mulf %19, %21 : vector<48x32xf32>
    %c0_8 = arith.constant 0 : index
    %c0_9 = arith.constant 0 : index
    %23 = vector.load %arg4[%c0_8, %c0_9] : memref<1x32xf32, #tpu.memory_space<vmem>>, vector<1x32xf32>
    %24 = vector.broadcast %23 : vector<1x32xf32> to vector<48x32xf32>
    %25 = arith.addf %22, %24 : vector<48x32xf32>
    %c0_10 = arith.constant 0 : index
    %c0_11 = arith.constant 0 : index
    %c0_12 = arith.constant 0 : index
    %26 = vector.load %arg2[%c0_10, %c0_11, %c0_12] : memref<3x8x32xf32, #tpu.memory_space<vmem>>, vector<3x8x32xf32>
    %27 = vector.shape_cast %26 : vector<3x8x32xf32> to vector<24x32xf32>
    %cst_13 = arith.constant dense<0.000000e+00> : vector<24xf32>
    %28 = vector.multi_reduction <add>, %27, %cst_13 [1] : vector<24x32xf32> to vector<24xf32>
    %29 = vector.shape_cast %28 : vector<24xf32> to vector<24x1xf32>
    %cst_14 = arith.constant 3.200000e+01 : f32
    %30 = vector.broadcast %cst_14 : f32 to vector<24x1xf32>
    %31 = arith.divf %29, %30 : vector<24x1xf32>
    %32 = vector.broadcast %31 : vector<24x1xf32> to vector<24x32xf32>
    %33 = arith.subf %27, %32 : vector<24x32xf32>
    %34 = arith.mulf %33, %33 : vector<24x32xf32>
    %cst_15 = arith.constant dense<0.000000e+00> : vector<24xf32>
    %35 = vector.multi_reduction <add>, %34, %cst_15 [1] : vector<24x32xf32> to vector<24xf32>
    %36 = vector.shape_cast %35 : vector<24xf32> to vector<24x1xf32>
    %cst_16 = arith.constant 3.200000e+01 : f32
    %37 = vector.broadcast %cst_16 : f32 to vector<24x1xf32>
    %38 = arith.divf %36, %37 : vector<24x1xf32>
    %39 = vector.broadcast %31 : vector<24x1xf32> to vector<24x32xf32>
    %40 = arith.subf %27, %39 : vector<24x32xf32>
    %cst_17 = arith.constant 9.99999974E-6 : f32
    %41 = vector.broadcast %cst_17 : f32 to vector<24x1xf32>
    %42 = arith.addf %38, %41 : vector<24x1xf32>
    %43 = math.rsqrt %42 : vector<24x1xf32>
    %44 = vector.broadcast %43 : vector<24x1xf32> to vector<24x32xf32>
    %45 = arith.mulf %40, %44 : vector<24x32xf32>
    %c0_18 = arith.constant 0 : index
    %c0_19 = arith.constant 0 : index
    %46 = vector.load %arg5[%c0_18, %c0_19] : memref<1x32xf32, #tpu.memory_space<vmem>>, vector<1x32xf32>
    %47 = vector.broadcast %46 : vector<1x32xf32> to vector<24x32xf32>
    %48 = arith.mulf %45, %47 : vector<24x32xf32>
    %c0_20 = arith.constant 0 : index
    %c0_21 = arith.constant 0 : index
    %49 = vector.load %arg6[%c0_20, %c0_21] : memref<1x32xf32, #tpu.memory_space<vmem>>, vector<1x32xf32>
    %50 = vector.broadcast %49 : vector<1x32xf32> to vector<24x32xf32>
    %51 = arith.addf %48, %50 : vector<24x32xf32>
    %c0_22 = arith.constant 0 : index
    %c0_23 = arith.constant 0 : index
    %52 = vector.load %arg7[%c0_22, %c0_23] : memref<32x32xf32, #tpu.memory_space<vmem>>, vector<32x32xf32>
    %cst_24 = arith.constant dense<0.000000e+00> : vector<24x32xf32>
    %53 = tpu.matmul %51, %52, %cst_24 {dimension_numbers = #tpu.dot_dimension_numbers<[1], [0], [0], [1], [0, 0, 1, 1], [], []>} : vector<24x32xf32>, vector<32x32xf32>, vector<24x32xf32> -> vector<24x32xf32>
    %c0_25 = arith.constant 0 : index
    %c0_26 = arith.constant 0 : index
    %c0_27 = arith.constant 0 : index
    %54 = vector.load %arg8[%c0_25, %c0_26, %c0_27] : memref<2x32x32xf32, #tpu.memory_space<vmem>>, vector<1x32x32xf32>
    %55 = vector.shape_cast %54 : vector<1x32x32xf32> to vector<32x32xf32>
    %c1 = arith.constant 1 : index
    %c0_28 = arith.constant 0 : index
    %c0_29 = arith.constant 0 : index
    %56 = vector.load %arg8[%c1, %c0_28, %c0_29] : memref<2x32x32xf32, #tpu.memory_space<vmem>>, vector<1x32x32xf32>
    %57 = vector.shape_cast %56 : vector<1x32x32xf32> to vector<32x32xf32>
    %cst_30 = arith.constant dense<0.000000e+00> : vector<48x32xf32>
    %58 = tpu.matmul %25, %55, %cst_30 {dimension_numbers = #tpu.dot_dimension_numbers<[1], [0], [0], [1], [0, 0, 1, 1], [], []>} : vector<48x32xf32>, vector<32x32xf32>, vector<48x32xf32> -> vector<48x32xf32>
    %cst_31 = arith.constant dense<0.000000e+00> : vector<48x32xf32>
    %59 = tpu.matmul %25, %57, %cst_31 {dimension_numbers = #tpu.dot_dimension_numbers<[1], [0], [0], [1], [0, 0, 1, 1], [], []>} : vector<48x32xf32>, vector<32x32xf32>, vector<48x32xf32> -> vector<48x32xf32>
    %cst_32 = arith.constant dense<0.000000e+00> : vector<24x32xf32>
    %60 = tpu.matmul %51, %55, %cst_32 {dimension_numbers = #tpu.dot_dimension_numbers<[1], [0], [0], [1], [0, 0, 1, 1], [], []>} : vector<24x32xf32>, vector<32x32xf32>, vector<24x32xf32> -> vector<24x32xf32>
    %cst_33 = arith.constant dense<0.000000e+00> : vector<24x32xf32>
    %61 = tpu.matmul %51, %57, %cst_33 {dimension_numbers = #tpu.dot_dimension_numbers<[1], [0], [0], [1], [0, 0, 1, 1], [], []>} : vector<24x32xf32>, vector<32x32xf32>, vector<24x32xf32> -> vector<24x32xf32>
    %62 = vector.shape_cast %53 : vector<24x32xf32> to vector<3x8x32xf32>
    %63 = vector.shape_cast %58 : vector<48x32xf32> to vector<3x16x32xf32>
    %64 = vector.shape_cast %59 : vector<48x32xf32> to vector<3x16x32xf32>
    %65 = vector.shape_cast %60 : vector<24x32xf32> to vector<3x8x32xf32>
    %66 = vector.shape_cast %61 : vector<24x32xf32> to vector<3x8x32xf32>
    %cst_34 = arith.constant 0.000000e+00 : f32
    %67 = vector.broadcast %cst_34 : f32 to vector<24x32xf32>
    %68 = vector.extract_strided_slice %62 {offsets = [0, 0, 0], sizes = [3, 8, 8], strides = [1, 1, 1]} : vector<3x8x32xf32> to vector<3x8x8xf32>
    %69 = vector.extract_strided_slice %63 {offsets = [0, 0, 0], sizes = [3, 16, 8], strides = [1, 1, 1]} : vector<3x16x32xf32> to vector<3x16x8xf32>
    "tpu.trace_start"() <{level = 10 : i32, message = "bid,bjd->bij"}> : () -> ()
    %cst_35 = arith.constant dense<0.000000e+00> : vector<3x8x16xf32>
    %70 = tpu.matmul %68, %69, %cst_35 {dimension_numbers = #tpu.dot_dimension_numbers<[2], [2], [1], [1], [0, 0, 0, 1, 1, 1], [0], [0]>} : vector<3x8x8xf32>, vector<3x16x8xf32>, vector<3x8x16xf32> -> vector<3x8x16xf32>
    "tpu.trace_stop"() : () -> ()
    %71 = vector.extract_strided_slice %65 {offsets = [0, 0, 0], sizes = [3, 8, 8], strides = [1, 1, 1]} : vector<3x8x32xf32> to vector<3x8x8xf32>
    "tpu.trace_start"() <{level = 10 : i32, message = "bid,bjd->bij"}> : () -> ()
    %cst_36 = arith.constant dense<0.000000e+00> : vector<3x8x8xf32>
    %72 = tpu.matmul %68, %71, %cst_36 {dimension_numbers = #tpu.dot_dimension_numbers<[2], [2], [1], [1], [0, 0, 0, 1, 1, 1], [0], [0]>} : vector<3x8x8xf32>, vector<3x8x8xf32>, vector<3x8x8xf32> -> vector<3x8x8xf32>
    "tpu.trace_stop"() : () -> ()
    %cst_37 = arith.constant dense<0xFF800000> : vector<3x8xf32>
    %73 = vector.multi_reduction <maximumf>, %70, %cst_37 [2] : vector<3x8x16xf32> to vector<3x8xf32>
    %74 = vector.shape_cast %73 : vector<3x8xf32> to vector<3x8x1xf32>
    %cst_38 = arith.constant dense<0xFF800000> : vector<3x8xf32>
    %75 = vector.multi_reduction <maximumf>, %72, %cst_38 [2] : vector<3x8x8xf32> to vector<3x8xf32>
    %76 = vector.shape_cast %75 : vector<3x8xf32> to vector<3x8x1xf32>
    %77 = arith.maximumf %74, %76 : vector<3x8x1xf32>
    %78 = vector.broadcast %77 : vector<3x8x1xf32> to vector<3x8x16xf32>
    %79 = arith.subf %70, %78 : vector<3x8x16xf32>
    %80 = math.exp %79 : vector<3x8x16xf32>
    %81 = vector.broadcast %77 : vector<3x8x1xf32> to vector<3x8x8xf32>
    %82 = arith.subf %72, %81 : vector<3x8x8xf32>
    %83 = math.exp %82 : vector<3x8x8xf32>
    %cst_39 = arith.constant dense<0.000000e+00> : vector<3x8xf32>
    %84 = vector.multi_reduction <add>, %80, %cst_39 [2] : vector<3x8x16xf32> to vector<3x8xf32>
    %85 = vector.shape_cast %84 : vector<3x8xf32> to vector<3x8x1xf32>
    %cst_40 = arith.constant dense<0.000000e+00> : vector<3x8xf32>
    %86 = vector.multi_reduction <add>, %83, %cst_40 [2] : vector<3x8x8xf32> to vector<3x8xf32>
    %87 = vector.shape_cast %86 : vector<3x8xf32> to vector<3x8x1xf32>
    %88 = arith.addf %85, %87 : vector<3x8x1xf32>
    %89 = vector.extract_strided_slice %64 {offsets = [0, 0, 0], sizes = [3, 16, 8], strides = [1, 1, 1]} : vector<3x16x32xf32> to vector<3x16x8xf32>
    "tpu.trace_start"() <{level = 10 : i32, message = "bij,bjd->bid"}> : () -> ()
    %cst_41 = arith.constant dense<0.000000e+00> : vector<3x8x8xf32>
    %90 = tpu.matmul %80, %89, %cst_41 {dimension_numbers = #tpu.dot_dimension_numbers<[2], [1], [1], [2], [0, 0, 0, 1, 1, 2], [0], [0]>} : vector<3x8x16xf32>, vector<3x16x8xf32>, vector<3x8x8xf32> -> vector<3x8x8xf32>
    "tpu.trace_stop"() : () -> ()
    %91 = vector.extract_strided_slice %66 {offsets = [0, 0, 0], sizes = [3, 8, 8], strides = [1, 1, 1]} : vector<3x8x32xf32> to vector<3x8x8xf32>
    "tpu.trace_start"() <{level = 10 : i32, message = "bij,bjd->bid"}> : () -> ()
    %cst_42 = arith.constant dense<0.000000e+00> : vector<3x8x8xf32>
    %92 = tpu.matmul %83, %91, %cst_42 {dimension_numbers = #tpu.dot_dimension_numbers<[2], [1], [1], [2], [0, 0, 0, 1, 1, 2], [0], [0]>} : vector<3x8x8xf32>, vector<3x8x8xf32>, vector<3x8x8xf32> -> vector<3x8x8xf32>
    "tpu.trace_stop"() : () -> ()
    %93 = arith.addf %90, %92 : vector<3x8x8xf32>
    %cst_43 = arith.constant 1.000000e+00 : f32
    %94 = vector.broadcast %cst_43 : f32 to vector<3x8x1xf32>
    %95 = arith.divf %94, %88 : vector<3x8x1xf32>
    %96 = vector.broadcast %95 : vector<3x8x1xf32> to vector<3x8x8xf32>
    %97 = arith.mulf %93, %96 : vector<3x8x8xf32>
    %98 = vector.shape_cast %97 : vector<3x8x8xf32> to vector<24x8xf32>
    %c0_44 = arith.constant 0 : index
    %c0_45 = arith.constant 0 : index
    %99 = vector.load %arg9[%c0_44, %c0_45] : memref<32x32xf32, #tpu.memory_space<vmem>>, vector<8x32xf32>
    %cst_46 = arith.constant dense<0.000000e+00> : vector<24x32xf32>
    %100 = tpu.matmul %98, %99, %cst_46 {dimension_numbers = #tpu.dot_dimension_numbers<[1], [0], [0], [1], [0, 0, 1, 1], [], []>} : vector<24x8xf32>, vector<8x32xf32>, vector<24x32xf32> -> vector<24x32xf32>
    %101 = arith.addf %67, %100 : vector<24x32xf32>
    %102 = vector.extract_strided_slice %62 {offsets = [0, 0, 8], sizes = [3, 8, 8], strides = [1, 1, 1]} : vector<3x8x32xf32> to vector<3x8x8xf32>
    %103 = vector.extract_strided_slice %63 {offsets = [0, 0, 8], sizes = [3, 16, 8], strides = [1, 1, 1]} : vector<3x16x32xf32> to vector<3x16x8xf32>
    "tpu.trace_start"() <{level = 10 : i32, message = "bid,bjd->bij"}> : () -> ()
    %cst_47 = arith.constant dense<0.000000e+00> : vector<3x8x16xf32>
    %104 = tpu.matmul %102, %103, %cst_47 {dimension_numbers = #tpu.dot_dimension_numbers<[2], [2], [1], [1], [0, 0, 0, 1, 1, 1], [0], [0]>} : vector<3x8x8xf32>, vector<3x16x8xf32>, vector<3x8x16xf32> -> vector<3x8x16xf32>
    "tpu.trace_stop"() : () -> ()
    %105 = vector.extract_strided_slice %65 {offsets = [0, 0, 8], sizes = [3, 8, 8], strides = [1, 1, 1]} : vector<3x8x32xf32> to vector<3x8x8xf32>
    "tpu.trace_start"() <{level = 10 : i32, message = "bid,bjd->bij"}> : () -> ()
    %cst_48 = arith.constant dense<0.000000e+00> : vector<3x8x8xf32>
    %106 = tpu.matmul %102, %105, %cst_48 {dimension_numbers = #tpu.dot_dimension_numbers<[2], [2], [1], [1], [0, 0, 0, 1, 1, 1], [0], [0]>} : vector<3x8x8xf32>, vector<3x8x8xf32>, vector<3x8x8xf32> -> vector<3x8x8xf32>
    "tpu.trace_stop"() : () -> ()
    %cst_49 = arith.constant dense<0xFF800000> : vector<3x8xf32>
    %107 = vector.multi_reduction <maximumf>, %104, %cst_49 [2] : vector<3x8x16xf32> to vector<3x8xf32>
    %108 = vector.shape_cast %107 : vector<3x8xf32> to vector<3x8x1xf32>
    %cst_50 = arith.constant dense<0xFF800000> : vector<3x8xf32>
    %109 = vector.multi_reduction <maximumf>, %106, %cst_50 [2] : vector<3x8x8xf32> to vector<3x8xf32>
    %110 = vector.shape_cast %109 : vector<3x8xf32> to vector<3x8x1xf32>
    %111 = arith.maximumf %108, %110 : vector<3x8x1xf32>
    %112 = vector.broadcast %111 : vector<3x8x1xf32> to vector<3x8x16xf32>
    %113 = arith.subf %104, %112 : vector<3x8x16xf32>
    %114 = math.exp %113 : vector<3x8x16xf32>
    %115 = vector.broadcast %111 : vector<3x8x1xf32> to vector<3x8x8xf32>
    %116 = arith.subf %106, %115 : vector<3x8x8xf32>
    %117 = math.exp %116 : vector<3x8x8xf32>
    %cst_51 = arith.constant dense<0.000000e+00> : vector<3x8xf32>
    %118 = vector.multi_reduction <add>, %114, %cst_51 [2] : vector<3x8x16xf32> to vector<3x8xf32>
    %119 = vector.shape_cast %118 : vector<3x8xf32> to vector<3x8x1xf32>
    %cst_52 = arith.constant dense<0.000000e+00> : vector<3x8xf32>
    %120 = vector.multi_reduction <add>, %117, %cst_52 [2] : vector<3x8x8xf32> to vector<3x8xf32>
    %121 = vector.shape_cast %120 : vector<3x8xf32> to vector<3x8x1xf32>
    %122 = arith.addf %119, %121 : vector<3x8x1xf32>
    %123 = vector.extract_strided_slice %64 {offsets = [0, 0, 8], sizes = [3, 16, 8], strides = [1, 1, 1]} : vector<3x16x32xf32> to vector<3x16x8xf32>
    "tpu.trace_start"() <{level = 10 : i32, message = "bij,bjd->bid"}> : () -> ()
    %cst_53 = arith.constant dense<0.000000e+00> : vector<3x8x8xf32>
    %124 = tpu.matmul %114, %123, %cst_53 {dimension_numbers = #tpu.dot_dimension_numbers<[2], [1], [1], [2], [0, 0, 0, 1, 1, 2], [0], [0]>} : vector<3x8x16xf32>, vector<3x16x8xf32>, vector<3x8x8xf32> -> vector<3x8x8xf32>
    "tpu.trace_stop"() : () -> ()
    %125 = vector.extract_strided_slice %66 {offsets = [0, 0, 8], sizes = [3, 8, 8], strides = [1, 1, 1]} : vector<3x8x32xf32> to vector<3x8x8xf32>
    "tpu.trace_start"() <{level = 10 : i32, message = "bij,bjd->bid"}> : () -> ()
    %cst_54 = arith.constant dense<0.000000e+00> : vector<3x8x8xf32>
    %126 = tpu.matmul %117, %125, %cst_54 {dimension_numbers = #tpu.dot_dimension_numbers<[2], [1], [1], [2], [0, 0, 0, 1, 1, 2], [0], [0]>} : vector<3x8x8xf32>, vector<3x8x8xf32>, vector<3x8x8xf32> -> vector<3x8x8xf32>
    "tpu.trace_stop"() : () -> ()
    %127 = arith.addf %124, %126 : vector<3x8x8xf32>
    %cst_55 = arith.constant 1.000000e+00 : f32
    %128 = vector.broadcast %cst_55 : f32 to vector<3x8x1xf32>
    %129 = arith.divf %128, %122 : vector<3x8x1xf32>
    %130 = vector.broadcast %129 : vector<3x8x1xf32> to vector<3x8x8xf32>
    %131 = arith.mulf %127, %130 : vector<3x8x8xf32>
    %132 = vector.shape_cast %131 : vector<3x8x8xf32> to vector<24x8xf32>
    %c8 = arith.constant 8 : index
    %c0_56 = arith.constant 0 : index
    %133 = vector.load %arg9[%c8, %c0_56] : memref<32x32xf32, #tpu.memory_space<vmem>>, vector<8x32xf32>
    %cst_57 = arith.constant dense<0.000000e+00> : vector<24x32xf32>
    %134 = tpu.matmul %132, %133, %cst_57 {dimension_numbers = #tpu.dot_dimension_numbers<[1], [0], [0], [1], [0, 0, 1, 1], [], []>} : vector<24x8xf32>, vector<8x32xf32>, vector<24x32xf32> -> vector<24x32xf32>
    %135 = arith.addf %101, %134 : vector<24x32xf32>
    %136 = vector.extract_strided_slice %62 {offsets = [0, 0, 16], sizes = [3, 8, 8], strides = [1, 1, 1]} : vector<3x8x32xf32> to vector<3x8x8xf32>
    %137 = vector.extract_strided_slice %63 {offsets = [0, 0, 16], sizes = [3, 16, 8], strides = [1, 1, 1]} : vector<3x16x32xf32> to vector<3x16x8xf32>
    "tpu.trace_start"() <{level = 10 : i32, message = "bid,bjd->bij"}> : () -> ()
    %cst_58 = arith.constant dense<0.000000e+00> : vector<3x8x16xf32>
    %138 = tpu.matmul %136, %137, %cst_58 {dimension_numbers = #tpu.dot_dimension_numbers<[2], [2], [1], [1], [0, 0, 0, 1, 1, 1], [0], [0]>} : vector<3x8x8xf32>, vector<3x16x8xf32>, vector<3x8x16xf32> -> vector<3x8x16xf32>
    "tpu.trace_stop"() : () -> ()
    %139 = vector.extract_strided_slice %65 {offsets = [0, 0, 16], sizes = [3, 8, 8], strides = [1, 1, 1]} : vector<3x8x32xf32> to vector<3x8x8xf32>
    "tpu.trace_start"() <{level = 10 : i32, message = "bid,bjd->bij"}> : () -> ()
    %cst_59 = arith.constant dense<0.000000e+00> : vector<3x8x8xf32>
    %140 = tpu.matmul %136, %139, %cst_59 {dimension_numbers = #tpu.dot_dimension_numbers<[2], [2], [1], [1], [0, 0, 0, 1, 1, 1], [0], [0]>} : vector<3x8x8xf32>, vector<3x8x8xf32>, vector<3x8x8xf32> -> vector<3x8x8xf32>
    "tpu.trace_stop"() : () -> ()
    %cst_60 = arith.constant dense<0xFF800000> : vector<3x8xf32>
    %141 = vector.multi_reduction <maximumf>, %138, %cst_60 [2] : vector<3x8x16xf32> to vector<3x8xf32>
    %142 = vector.shape_cast %141 : vector<3x8xf32> to vector<3x8x1xf32>
    %cst_61 = arith.constant dense<0xFF800000> : vector<3x8xf32>
    %143 = vector.multi_reduction <maximumf>, %140, %cst_61 [2] : vector<3x8x8xf32> to vector<3x8xf32>
    %144 = vector.shape_cast %143 : vector<3x8xf32> to vector<3x8x1xf32>
    %145 = arith.maximumf %142, %144 : vector<3x8x1xf32>
    %146 = vector.broadcast %145 : vector<3x8x1xf32> to vector<3x8x16xf32>
    %147 = arith.subf %138, %146 : vector<3x8x16xf32>
    %148 = math.exp %147 : vector<3x8x16xf32>
    %149 = vector.broadcast %145 : vector<3x8x1xf32> to vector<3x8x8xf32>
    %150 = arith.subf %140, %149 : vector<3x8x8xf32>
    %151 = math.exp %150 : vector<3x8x8xf32>
    %cst_62 = arith.constant dense<0.000000e+00> : vector<3x8xf32>
    %152 = vector.multi_reduction <add>, %148, %cst_62 [2] : vector<3x8x16xf32> to vector<3x8xf32>
    %153 = vector.shape_cast %152 : vector<3x8xf32> to vector<3x8x1xf32>
    %cst_63 = arith.constant dense<0.000000e+00> : vector<3x8xf32>
    %154 = vector.multi_reduction <add>, %151, %cst_63 [2] : vector<3x8x8xf32> to vector<3x8xf32>
    %155 = vector.shape_cast %154 : vector<3x8xf32> to vector<3x8x1xf32>
    %156 = arith.addf %153, %155 : vector<3x8x1xf32>
    %157 = vector.extract_strided_slice %64 {offsets = [0, 0, 16], sizes = [3, 16, 8], strides = [1, 1, 1]} : vector<3x16x32xf32> to vector<3x16x8xf32>
    "tpu.trace_start"() <{level = 10 : i32, message = "bij,bjd->bid"}> : () -> ()
    %cst_64 = arith.constant dense<0.000000e+00> : vector<3x8x8xf32>
    %158 = tpu.matmul %148, %157, %cst_64 {dimension_numbers = #tpu.dot_dimension_numbers<[2], [1], [1], [2], [0, 0, 0, 1, 1, 2], [0], [0]>} : vector<3x8x16xf32>, vector<3x16x8xf32>, vector<3x8x8xf32> -> vector<3x8x8xf32>
    "tpu.trace_stop"() : () -> ()
    %159 = vector.extract_strided_slice %66 {offsets = [0, 0, 16], sizes = [3, 8, 8], strides = [1, 1, 1]} : vector<3x8x32xf32> to vector<3x8x8xf32>
    "tpu.trace_start"() <{level = 10 : i32, message = "bij,bjd->bid"}> : () -> ()
    %cst_65 = arith.constant dense<0.000000e+00> : vector<3x8x8xf32>
    %160 = tpu.matmul %151, %159, %cst_65 {dimension_numbers = #tpu.dot_dimension_numbers<[2], [1], [1], [2], [0, 0, 0, 1, 1, 2], [0], [0]>} : vector<3x8x8xf32>, vector<3x8x8xf32>, vector<3x8x8xf32> -> vector<3x8x8xf32>
    "tpu.trace_stop"() : () -> ()
    %161 = arith.addf %158, %160 : vector<3x8x8xf32>
    %cst_66 = arith.constant 1.000000e+00 : f32
    %162 = vector.broadcast %cst_66 : f32 to vector<3x8x1xf32>
    %163 = arith.divf %162, %156 : vector<3x8x1xf32>
    %164 = vector.broadcast %163 : vector<3x8x1xf32> to vector<3x8x8xf32>
    %165 = arith.mulf %161, %164 : vector<3x8x8xf32>
    %166 = vector.shape_cast %165 : vector<3x8x8xf32> to vector<24x8xf32>
    %c16 = arith.constant 16 : index
    %c0_67 = arith.constant 0 : index
    %167 = vector.load %arg9[%c16, %c0_67] : memref<32x32xf32, #tpu.memory_space<vmem>>, vector<8x32xf32>
    %cst_68 = arith.constant dense<0.000000e+00> : vector<24x32xf32>
    %168 = tpu.matmul %166, %167, %cst_68 {dimension_numbers = #tpu.dot_dimension_numbers<[1], [0], [0], [1], [0, 0, 1, 1], [], []>} : vector<24x8xf32>, vector<8x32xf32>, vector<24x32xf32> -> vector<24x32xf32>
    %169 = arith.addf %135, %168 : vector<24x32xf32>
    %170 = vector.extract_strided_slice %62 {offsets = [0, 0, 24], sizes = [3, 8, 8], strides = [1, 1, 1]} : vector<3x8x32xf32> to vector<3x8x8xf32>
    %171 = vector.extract_strided_slice %63 {offsets = [0, 0, 24], sizes = [3, 16, 8], strides = [1, 1, 1]} : vector<3x16x32xf32> to vector<3x16x8xf32>
    "tpu.trace_start"() <{level = 10 : i32, message = "bid,bjd->bij"}> : () -> ()
    %cst_69 = arith.constant dense<0.000000e+00> : vector<3x8x16xf32>
    %172 = tpu.matmul %170, %171, %cst_69 {dimension_numbers = #tpu.dot_dimension_numbers<[2], [2], [1], [1], [0, 0, 0, 1, 1, 1], [0], [0]>} : vector<3x8x8xf32>, vector<3x16x8xf32>, vector<3x8x16xf32> -> vector<3x8x16xf32>
    "tpu.trace_stop"() : () -> ()
    %173 = vector.extract_strided_slice %65 {offsets = [0, 0, 24], sizes = [3, 8, 8], strides = [1, 1, 1]} : vector<3x8x32xf32> to vector<3x8x8xf32>
    "tpu.trace_start"() <{level = 10 : i32, message = "bid,bjd->bij"}> : () -> ()
    %cst_70 = arith.constant dense<0.000000e+00> : vector<3x8x8xf32>
    %174 = tpu.matmul %170, %173, %cst_70 {dimension_numbers = #tpu.dot_dimension_numbers<[2], [2], [1], [1], [0, 0, 0, 1, 1, 1], [0], [0]>} : vector<3x8x8xf32>, vector<3x8x8xf32>, vector<3x8x8xf32> -> vector<3x8x8xf32>
    "tpu.trace_stop"() : () -> ()
    %cst_71 = arith.constant dense<0xFF800000> : vector<3x8xf32>
    %175 = vector.multi_reduction <maximumf>, %172, %cst_71 [2] : vector<3x8x16xf32> to vector<3x8xf32>
    %176 = vector.shape_cast %175 : vector<3x8xf32> to vector<3x8x1xf32>
    %cst_72 = arith.constant dense<0xFF800000> : vector<3x8xf32>
    %177 = vector.multi_reduction <maximumf>, %174, %cst_72 [2] : vector<3x8x8xf32> to vector<3x8xf32>
    %178 = vector.shape_cast %177 : vector<3x8xf32> to vector<3x8x1xf32>
    %179 = arith.maximumf %176, %178 : vector<3x8x1xf32>
    %180 = vector.broadcast %179 : vector<3x8x1xf32> to vector<3x8x16xf32>
    %181 = arith.subf %172, %180 : vector<3x8x16xf32>
    %182 = math.exp %181 : vector<3x8x16xf32>
    %183 = vector.broadcast %179 : vector<3x8x1xf32> to vector<3x8x8xf32>
    %184 = arith.subf %174, %183 : vector<3x8x8xf32>
    %185 = math.exp %184 : vector<3x8x8xf32>
    %cst_73 = arith.constant dense<0.000000e+00> : vector<3x8xf32>
    %186 = vector.multi_reduction <add>, %182, %cst_73 [2] : vector<3x8x16xf32> to vector<3x8xf32>
    %187 = vector.shape_cast %186 : vector<3x8xf32> to vector<3x8x1xf32>
    %cst_74 = arith.constant dense<0.000000e+00> : vector<3x8xf32>
    %188 = vector.multi_reduction <add>, %185, %cst_74 [2] : vector<3x8x8xf32> to vector<3x8xf32>
    %189 = vector.shape_cast %188 : vector<3x8xf32> to vector<3x8x1xf32>
    %190 = arith.addf %187, %189 : vector<3x8x1xf32>
    %191 = vector.extract_strided_slice %64 {offsets = [0, 0, 24], sizes = [3, 16, 8], strides = [1, 1, 1]} : vector<3x16x32xf32> to vector<3x16x8xf32>
    "tpu.trace_start"() <{level = 10 : i32, message = "bij,bjd->bid"}> : () -> ()
    %cst_75 = arith.constant dense<0.000000e+00> : vector<3x8x8xf32>
    %192 = tpu.matmul %182, %191, %cst_75 {dimension_numbers = #tpu.dot_dimension_numbers<[2], [1], [1], [2], [0, 0, 0, 1, 1, 2], [0], [0]>} : vector<3x8x16xf32>, vector<3x16x8xf32>, vector<3x8x8xf32> -> vector<3x8x8xf32>
    "tpu.trace_stop"() : () -> ()
    %193 = vector.extract_strided_slice %66 {offsets = [0, 0, 24], sizes = [3, 8, 8], strides = [1, 1, 1]} : vector<3x8x32xf32> to vector<3x8x8xf32>
    "tpu.trace_start"() <{level = 10 : i32, message = "bij,bjd->bid"}> : () -> ()
    %cst_76 = arith.constant dense<0.000000e+00> : vector<3x8x8xf32>
    %194 = tpu.matmul %185, %193, %cst_76 {dimension_numbers = #tpu.dot_dimension_numbers<[2], [1], [1], [2], [0, 0, 0, 1, 1, 2], [0], [0]>} : vector<3x8x8xf32>, vector<3x8x8xf32>, vector<3x8x8xf32> -> vector<3x8x8xf32>
    "tpu.trace_stop"() : () -> ()
    %195 = arith.addf %192, %194 : vector<3x8x8xf32>
    %cst_77 = arith.constant 1.000000e+00 : f32
    %196 = vector.broadcast %cst_77 : f32 to vector<3x8x1xf32>
    %197 = arith.divf %196, %190 : vector<3x8x1xf32>
    %198 = vector.broadcast %197 : vector<3x8x1xf32> to vector<3x8x8xf32>
    %199 = arith.mulf %195, %198 : vector<3x8x8xf32>
    %200 = vector.shape_cast %199 : vector<3x8x8xf32> to vector<24x8xf32>
    %c24 = arith.constant 24 : index
    %c0_78 = arith.constant 0 : index
    %201 = vector.load %arg9[%c24, %c0_78] : memref<32x32xf32, #tpu.memory_space<vmem>>, vector<8x32xf32>
    %cst_79 = arith.constant dense<0.000000e+00> : vector<24x32xf32>
    %202 = tpu.matmul %200, %201, %cst_79 {dimension_numbers = #tpu.dot_dimension_numbers<[1], [0], [0], [1], [0, 0, 1, 1], [], []>} : vector<24x8xf32>, vector<8x32xf32>, vector<24x32xf32> -> vector<24x32xf32>
    %203 = arith.addf %169, %202 : vector<24x32xf32>
    %204 = vector.shape_cast %203 : vector<24x32xf32> to vector<3x8x32xf32>
    %c0_80 = arith.constant 0 : index
    %c0_81 = arith.constant 0 : index
    %c0_82 = arith.constant 0 : index
    %205 = vector.load %arg10[%c0_80, %c0_81, %c0_82] : memref<3x8x32xf32, #tpu.memory_space<vmem>>, vector<3x8x32xf32>
    tpu.vector_store %arg10[%c0_80, %c0_81, %c0_82], %204 {strides = array<i32>} : memref<3x8x32xf32, #tpu.memory_space<vmem>>, vector<3x8x32xf32>,
    return
  }
  func.func @transform_0(%arg0: i32) -> (i32, i32, i32) {
    %c0_i32 = arith.constant 0 : i32
    %c0_i32_0 = arith.constant 0 : i32
    %c0_i32_1 = arith.constant 0 : i32
    return %arg0, %c0_i32, %c0_i32_0 : i32, i32, i32
  }
  func.func @transform_1(%arg0: i32) -> (i32, i32, i32) {
    %c0_i32 = arith.constant 0 : i32
    %c0_i32_0 = arith.constant 0 : i32
    %c0_i32_1 = arith.constant 0 : i32
    return %arg0, %c0_i32, %c0_i32_0 : i32, i32, i32
  }
  func.func @transform_2(%arg0: i32) -> (i32, i32) {
    %c0_i32 = arith.constant 0 : i32
    %c0_i32_0 = arith.constant 0 : i32
    %c0_i32_1 = arith.constant 0 : i32
    return %c0_i32, %c0_i32_0 : i32, i32
  }
  func.func @transform_3(%arg0: i32) -> (i32, i32) {
    %c0_i32 = arith.constant 0 : i32
    %c0_i32_0 = arith.constant 0 : i32
    %c0_i32_1 = arith.constant 0 : i32
    return %c0_i32, %c0_i32_0 : i32, i32
  }
  func.func @transform_4(%arg0: i32) -> (i32, i32) {
    %c0_i32 = arith.constant 0 : i32
    %c0_i32_0 = arith.constant 0 : i32
    %c0_i32_1 = arith.constant 0 : i32
    return %c0_i32, %c0_i32_0 : i32, i32
  }
  func.func @transform_5(%arg0: i32) -> (i32, i32) {
    %c0_i32 = arith.constant 0 : i32
    %c0_i32_0 = arith.constant 0 : i32
    %c0_i32_1 = arith.constant 0 : i32
    return %c0_i32, %c0_i32_0 : i32, i32
  }
  func.func @transform_6(%arg0: i32) -> (i32, i32) {
    %c0_i32 = arith.constant 0 : i32
    %c0_i32_0 = arith.constant 0 : i32
    %c0_i32_1 = arith.constant 0 : i32
    return %c0_i32, %c0_i32_0 : i32, i32
  }
  func.func @transform_7(%arg0: i32) -> (i32, i32, i32) {
    %c0_i32 = arith.constant 0 : i32
    %c0_i32_0 = arith.constant 0 : i32
    %c0_i32_1 = arith.constant 0 : i32
    %c0_i32_2 = arith.constant 0 : i32
    return %c0_i32, %c0_i32_0, %c0_i32_1 : i32, i32, i32
  }
  func.func @transform_8(%arg0: i32) -> (i32, i32) {
    %c0_i32 = arith.constant 0 : i32
    %c0_i32_0 = arith.constant 0 : i32
    %c0_i32_1 = arith.constant 0 : i32
    return %c0_i32, %c0_i32_0 : i32, i32
  }
  func.func @transform_9(%arg0: i32) -> (i32, i32, i32) {
    %c0_i32 = arith.constant 0 : i32
    %c0_i32_0 = arith.constant 0 : i32
    %c0_i32_1 = arith.constant 0 : i32
    return %arg0, %c0_i32, %c0_i32_0 : i32, i32, i32
  }
}

</mosaic_0001>

<bundles_post_ra>
// kernel: tpu_custom_call.1
= control target key start
LH: loop header
LB: loop body
LE: loop exit
PB: predicated region body
PF: predicated region fallthrough
CT: control target
= control target key end

     0   :  { %s8028_s0 = inlined_call_operand.hbm [shape: f32[6,16,32], index: 0, kind: input, shape index: {}]   ;;  %s8029_s1 = inlined_call_operand.hbm [shape: f32[6,8,32], index: 1, kind: input, shape index: {}]   ;;  %s8030_s2 = inlined_call_operand.vmem [shape: f32[1,32], index: 2, kind: input, shape index: {}]   ;;  %s8031_s3 = inlined_call_operand.vmem [shape: f32[1,32], index: 3, kind: input, shape index: {}]   ;;  %s8032_s4 = inlined_call_operand.vmem [shape: f32[1,32], index: 4, kind: input, shape index: {}]   ;;  %s8033_s5 = inlined_call_operand.vmem [shape: f32[1,32], index: 5, kind: input, shape index: {}]   ;;  %s8034_s6 = inlined_call_operand.hbm [shape: f32[32,32], index: 6, kind: input, shape index: {}]   ;;  %s8035_s7 = inlined_call_operand.hbm [shape: f32[2,32,32], index: 7, kind: input, shape index: {}]   ;;  %s8036_s8 = inlined_call_operand.hbm [shape: f32[32,32], index: 8, kind: input, shape index: {}]   ;;  %s8037_s9 = inlined_call_operand.hbm [shape: f32[6,8,32], index: 9, kind: output, shape index: {}]  }
   0x1   :  { %8048 = sst [smem:[#allocation19_spill]] %s8028_s0 }
   0x2   :  { %8049 = sst [smem:[#allocation20_spill]] %s8034_s6 }
   0x3   :  { %8050 = sst [smem:[#allocation21_spill]] %s8035_s7 }
   0x4   :  { %8051 = sst [smem:[#allocation22_spill]] %s8036_s8 }
   0x5   :  { %8052 = sst [smem:[#allocation23_spill]] %s8037_s9 }
   0x6   :  { %14 = vsyncpa [#allocation3], 0 }
   0x7   :  { %16 = vsyncpa [#allocation3 + $0x1], 0 }
   0x8   :  { %17 = vsyncpa [#allocation6], 0 }
   0x9   :  { %19 = vsyncpa [#allocation6 + $0x1], 0 }
   0xa   :  { %20 = vsyncpa [#allocation9], 0 }
   0xb   :  { %21 = vsyncpa [#allocation4], 0 }
   0xc   :  { %23 = vsyncpa [#allocation4 + $0x1], 0  ;;  %s7028_s30 = smov 0   ;;  %s7030_s10 = smov 0  }
   0xd   :  { %s7032_s11 = smov 0   ;;  %s7034_s12 = smov 0  }
   0xe LB: > { %8053 = sst [smem:[#allocation17_spill]] %s6948_s30  ;;  %s7049_s13 = sadd.s32 4294967295, %s6960_s12   ;;  %s6960_s12 = sphi %s7034_s12, %s8086_s12   ;;  %s6956_s11 = sphi %s7032_s11, %s8085_s11   ;;  %s6952_s10 = sphi %s7030_s10, %s8084_s10   ;;  %s6948_s30 = sphi %s7028_s30, %s8083_s30  }
   0xf   : > { %s5569_s14 = sadd.s32 4294967294, %s6960_s12   ;;  %p49_p0 = scmp.ne.s32.totalorder %s6952_s10, %s6948_s30 }
  0x10   : > { %p8038_p1 = scmp.eq.s32.totalorder %s7049_s13, 0  ;;  %p252_p3 = scmp.eq.s32.totalorder %s5569_s14, 1 }
  0x11   : > { %p5570_p5 = scmp.ge.s32.totalorder %s6960_s12, 1  ;;  %p259_p7 = scmp.lt.s32.totalorder %s6960_s12, 3 }
  0x12   : > { %p7058_p4 = por %p8038_p1, %p49_p0  ;;  %p7063_p6 = por %p252_p3, %p49_p0 }
  0x13   : > { %p7068_p8 = pnand %p5570_p5, %p259_p7  ;;  %s6962_s18 = smov [#allocation7]  }
  0x14   : > { %s8054_s15 = scalar_select %p7058_p4, 1, 0 }
  0x15   : > { %s8055_s16 = scalar_select %p7063_p6, 1, 0 }
  0x16   : > { %s8057_s17 = scalar_select %p7068_p8, 1, 0 }
  0x17   : > { %8056 = sst [smem:[#allocation18_spill]] %s8055_s16  ;;  %s283_s19 = sshll.u32 %s6962_s18, 4  ;;  %s7072_s19 = int_to_ptr.vmem [resolvable:$true] %s283_s19 }
  0x18   : > { %p6484_p9 = pneg %p7068_p8  ;;  %s6963_s21 = smov [#allocation8]  }
  0x19   : > { %s296_s22 = sshll.u32 %s6963_s21, 4  ;;  %s6964_s23 = smov [#allocation10]   ;;  %s7083_s22 = int_to_ptr.vmem [resolvable:$true] %s296_s22 }
  0x1a   : > { %p7079_p11 = pnand %p6484_p9, %p8038_p1  ;;  %s7085_s24 = sshll.u32 %s6964_s23, 4  ;;  %s310_s24 = int_to_ptr.vmem [resolvable:$true] %s7085_s24 }
  0x1b   : > { %s8059_s6 = sld [smem:[#allocation20_spill]] }
  0x1c   : > { %p7095_p13 = pneg %p7079_p11 }
  0x21   : > { %s6738_s27 = scalar_lea.hbm %s8059_s6, 512 }
  0x22   : > { %p6739_p12 = scmp.ne.s32.totalorder %s8059_s6, %s6738_s27  ;;  %p6745_p5 = scmp.lt.u32.totalorder %s6738_s27, %s8059_s6 }
  0x24   : > { %p6741_p0 = pnand %p7095_p13, %p6739_p12 }
  0x26   : > { %p6742_p3 = pneg %p6741_p0 }
  0x28   : > { %p6747_p7 = pnand %p6745_p5, %p6742_p3 }
  0x2a   : > { %6750 = shalt.err (!%p6747_p7)
}
  0x2b   : > { %s6751_s23 = scalar_lea.vmem %s7072_s19, 512  ;;  %p6759_p2 = scmp.lt.s32.totalorder %s7072_s19, %s7072_s19 }
  0x2c   : > { %p6752_p9 = scmp.ne.s32.totalorder %s7072_s19, %s6751_s23  ;;  %p6760_p6 = scmp.lt.s32.totalorder %s6751_s23, %s6751_s23 }
  0x2e   : > { %p6754_p10 = pnand %p6752_p9, %p7095_p13  ;;  %p6761_p12 = por %p6760_p6, %p6759_p2 }
  0x30   : > { %p6755_p1 = pneg %p6754_p10 }
  0x32   : > { %p6762_p0 = pnand %p6761_p12, %p6755_p1 }
  0x34   : > { %6765 = shalt.err (!%p6762_p0)
}
  0x35   : > { %s8044_s25 = smov 128   ;;  %s8046_s26 = smov 8  }
  0x36   : > { %6487 = dma.hbm_to_vmem [thread:$0]  (!%p7079_p11), %s8059_s6, 512, %s7072_s19, [#allocation6], %s8044_s25, %s8044_s25, %s8046_s26  }
  0x37   : > { %s8061_s7 = sld [smem:[#allocation21_spill]] }
  0x3d   : > { %s6766_s21 = scalar_lea.hbm %s8061_s7, 1024 }
  0x3e   : > { %p6767_p1 = scmp.ne.s32.totalorder %s8061_s7, %s6766_s21  ;;  %p6773_p10 = scmp.lt.u32.totalorder %s6766_s21, %s8061_s7 }
  0x40   : > { %p6769_p2 = pnand %p6767_p1, %p7095_p13 }
  0x42   : > { %p6770_p6 = pneg %p6769_p2 }
  0x44   : > { %p6775_p3 = pnand %p6773_p10, %p6770_p6 }
  0x46   : > { %6778 = shalt.err (!%p6775_p3)
}
  0x47   : > { %s6779_s19 = scalar_lea.vmem %s7083_s22, 1024  ;;  %p6787_p12 = scmp.lt.s32.totalorder %s7083_s22, %s7083_s22 }
  0x48   : > { %p6780_p5 = scmp.ne.s32.totalorder %s7083_s22, %s6779_s19  ;;  %p6788_p0 = scmp.lt.s32.totalorder %s6779_s19, %s6779_s19 }
  0x4a   : > { %p6782_p7 = pnand %p6780_p5, %p7095_p13  ;;  %p6789_p1 = por %p6788_p0, %p6787_p12 }
  0x4c   : > { %p6783_p9 = pneg %p6782_p7 }
  0x4e   : > { %p6790_p2 = pnand %p6789_p1, %p6783_p9 }
  0x50   : > { %6793 = shalt.err (!%p6790_p2)
}
  0x51   : > { %6490 = dma.hbm_to_vmem [thread:$0]  (!%p7079_p11), %s8061_s7, 1024, %s7083_s22, [#allocation9], %s8044_s25, %s8044_s25, %s8046_s26  }
  0x52   : > { %s8062_s8 = sld [smem:[#allocation22_spill]] }
  0x58   : > { %s6794_s28 = scalar_lea.hbm %s8062_s8, 512 }
  0x59   : > { %p6795_p6 = scmp.ne.s32.totalorder %s8062_s8, %s6794_s28  ;;  %p6801_p5 = scmp.lt.u32.totalorder %s6794_s28, %s8062_s8 }
  0x5b   : > { %p6797_p10 = pnand %p6795_p6, %p7095_p13 }
  0x5d   : > { %p6798_p3 = pneg %p6797_p10 }
  0x5f   : > { %p6803_p7 = pnand %p6801_p5, %p6798_p3 }
  0x61   : > { %6806 = shalt.err (!%p6803_p7)
}
  0x62   : > { %s6807_s19 = scalar_lea.vmem %s310_s24, 512  ;;  %p6815_p1 = scmp.lt.s32.totalorder %s310_s24, %s310_s24 }
  0x63   : > { %p6808_p9 = scmp.ne.s32.totalorder %s310_s24, %s6807_s19  ;;  %p6816_p2 = scmp.lt.s32.totalorder %s6807_s19, %s6807_s19 }
  0x65   : > { %p6810_p12 = pnand %p6808_p9, %p7095_p13  ;;  %p6817_p4 = por %p6816_p2, %p6815_p1 }
  0x67   : > { %p6811_p0 = pneg %p6810_p12 }
  0x69   : > { %p6818_p8 = pnand %p6817_p4, %p6811_p0 }
  0x6b   : > { %6821 = shalt.err (!%p6818_p8)
}
  0x6c   : > { %6493 = dma.hbm_to_vmem [thread:$0]  (!%p7079_p11), %s8062_s8, 512, %s310_s24, [#allocation9], %s8044_s25, %s8044_s25, %s8046_s26  }
  0x6d   : > { %s7168_s14 = sadd.s32 1, %s6960_s12   ;;  %s36_s30 = sadd.s32 1, %s6956_s11 }
  0x6e   : > { %s33_s20 = ssub.s32 %s6960_s12, %s7168_s14  ;;  %p43_p8 = scmp.ne.s32.totalorder %s6956_s11, %s6952_s10 }
  0x6f   : > { %p34_p4 = scmp.eq.s32.totalorder %s33_s20, 0  ;;  %p44_p13 = scmp.eq.s32.totalorder %s6960_s12, 0 }
  0x70   : > { %p6508_p6 = scmp.lt.s32.totalorder %s6960_s12, 2  ;;  %p8063_p3 = scmp.eq.s32.totalorder %s7049_s13, 1 }
  0x71   : > { %s7178_s16 = scalar_select %p34_p4, %s6956_s11, %s36_s30  }
  0x72   : > { %p45_p10 = por %p44_p13, %p43_p8  ;;  %p7182_p5 = por %p8063_p3, %p43_p8 }
  0x73   : > { %s7187_s28 = sand.u32 1, %s6956_s11   ;;  %s5710_s24 = smul.u32 768, %s6960_s12 }
  0x74   : > { %s6462_s29 = smul.u32 48, %s7187_s28  ;;  %p7191_p11 = pnand %p6508_p6, %p45_p10 }
  0x75   : > { %s8066_s0 = sld [smem:[#allocation19_spill]]  ;;  %s324_s30 = scalar_lea.sflag [#allocation3], %s7187_s28 }
  0x76   : > { %s327_s22 = scalar_lea.vmem [#allocation2], %s6462_s29  ;;  %p6824_p9 = pneg %p7191_p11 }
  0x77   : > { %s335_s9 = sshll.u32 %s327_s22, 4  ;;  %s7200_s9 = int_to_ptr.vmem [resolvable:$true] %s335_s9 }
  0x7b   : > { %s7198_s19 = scalar_lea.hbm %s8066_s0, %s5710_s24  ;;  %s6827_s23 = scalar_lea.hbm %s8066_s0, 1536 }
  0x7c   : > { %s6822_s25 = scalar_lea.hbm %s7198_s19, 768  ;;  %p6828_p1 = scmp.lt.u32.totalorder %s7198_s19, %s8066_s0 }
  0x7d   : > { %p6823_p7 = scmp.ne.s32.totalorder %s7198_s19, %s6822_s25  ;;  %p6829_p2 = scmp.lt.u32.totalorder %s6827_s23, %s6822_s25 }
  0x7e   : > { %p6831_p8 = scmp.lt.u32.totalorder %s6822_s25, %s7198_s19 }
  0x7f   : > { %p6825_p12 = pnand %p6824_p9, %p6823_p7  ;;  %p6830_p4 = por %p6829_p2, %p6828_p1 }
  0x81   : > { %p6826_p0 = pneg %p6825_p12  ;;  %p6832_p13 = por %p6831_p8, %p6830_p4 }
  0x83   : > { %p6833_p6 = pnand %p6832_p13, %p6826_p0 }
  0x85   : > { %6836 = shalt.err (!%p6833_p6)
}
  0x86   : > { %s6837_s29 = scalar_lea.vmem %s7200_s9, 768  ;;  %s6967_s22 = smov [#allocation2]  }
  0x87   : > { %p6838_p10 = scmp.ne.s32.totalorder %s7200_s9, %s6837_s29  ;;  %s6842_s24 = sshll.u32 %s6967_s22, 4  ;;  %s6843_s24 = int_to_ptr.vmem [resolvable:$false] %s6842_s24 }
  0x88   : > { %s6844_s6 = scalar_lea.vmem %s6843_s24, 1536  ;;  %p6845_p12 = scmp.lt.s32.totalorder %s7200_s9, %s6843_s24 }
  0x89   : > { %p6840_p3 = pnand %p6838_p10, %p6824_p9  ;;  %p6846_p1 = scmp.lt.s32.totalorder %s6844_s6, %s6837_s29 }
  0x8b   : > { %p6841_p7 = pneg %p6840_p3  ;;  %p6847_p2 = por %p6846_p1, %p6845_p12 }
  0x8d   : > { %p6848_p4 = pnand %p6847_p2, %p6841_p7 }
  0x8f   : > { %6851 = shalt.err (!%p6848_p4)
}
  0x90   : > { %s8067_s25 = smov 8   ;;  %s8068_s26 = smov 128  }
  0x91   : > { %6497 = dma.hbm_to_vmem [thread:$0]  (!%p7191_p11), %s7198_s19, 768, %s7200_s9, %s324_s30, %s8068_s26, %s8068_s26, %s8067_s25  }
  0x92   : > { %s6463_s21 = smul.u32 24, %s7187_s28  ;;  %s8069_s0 = sand.u32 1, %s6960_s12  }
  0x93   : > { %s5708_s23 = smul.u32 384, %s6960_s12  ;;  %s7245_s7 = scalar_lea.sflag [#allocation6], %s8069_s0 }
  0x94   : > { %s349_s6 = scalar_lea.vmem [#allocation5], %s6463_s21  ;;  %s6857_s9 = scalar_lea.hbm %s8029_s1, 768 }
  0x95   : > { %s7239_s24 = scalar_lea.hbm %s8029_s1, %s5708_s23  ;;  %s356_s20 = sshll.u32 %s349_s6, 4  ;;  %s7241_s20 = int_to_ptr.vmem [resolvable:$true] %s356_s20 }
  0x96   : > { %s6852_s8 = scalar_lea.hbm %s7239_s24, 384  ;;  %p6858_p6 = scmp.lt.u32.totalorder %s7239_s24, %s8029_s1 }
  0x97   : > { %p6853_p0 = scmp.ne.s32.totalorder %s7239_s24, %s6852_s8  ;;  %p6859_p10 = scmp.lt.u32.totalorder %s6857_s9, %s6852_s8 }
  0x98   : > { %p6861_p7 = scmp.lt.u32.totalorder %s6852_s8, %s7239_s24 }
  0x99   : > { %p6855_p8 = pnand %p6853_p0, %p6824_p9  ;;  %p6860_p3 = por %p6859_p10, %p6858_p6 }
  0x9b   : > { %p6856_p13 = pneg %p6855_p8  ;;  %p6862_p12 = por %p6861_p7, %p6860_p3 }
  0x9d   : > { %p6863_p1 = pnand %p6862_p12, %p6856_p13 }
  0x9f   : > { %6866 = shalt.err (!%p6863_p1)
}
  0xa0   : > { %s6867_s0 = scalar_lea.vmem %s7241_s20, 384  ;;  %s6968_s21 = smov [#allocation5]  }
  0xa1   : > { %p6868_p2 = scmp.ne.s32.totalorder %s7241_s20, %s6867_s0  ;;  %s6872_s29 = sshll.u32 %s6968_s21, 4  ;;  %s6873_s29 = int_to_ptr.vmem [resolvable:$false] %s6872_s29 }
  0xa2   : > { %s6874_s22 = scalar_lea.vmem %s6873_s29, 768  ;;  %p6875_p8 = scmp.lt.s32.totalorder %s7241_s20, %s6873_s29 }
  0xa3   : > { %p6870_p4 = pnand %p6868_p2, %p6824_p9  ;;  %p6876_p6 = scmp.lt.s32.totalorder %s6874_s22, %s6867_s0 }
  0xa5   : > { %p6871_p0 = pneg %p6870_p4  ;;  %p6877_p10 = por %p6876_p6, %p6875_p8 }
  0xa7   : > { %p6878_p3 = pnand %p6877_p10, %p6871_p0 }
  0xa9   : > { %6881 = shalt.err (!%p6878_p3)
}
  0xaa   : > { %6500 = dma.hbm_to_vmem [thread:$0]  (!%p7191_p11), %s7239_s24, 384, %s7241_s20, %s7245_s7, %s8068_s26, %s8068_s26, %s8067_s25  }
  0xab   : > { %p8070_p9 = scmp.ne.s32.totalorder %s8057_s17, 0 }
  0xac   : > { %s7277_s8 = sand.u32 (!%p8070_p9), 1, %s6952_s10   ;;  %p8071_p13 = scmp.ne.s32.totalorder (!%p8070_p9), %s8054_s15, 0 }
  0xad   : > { %368 = sbr.rel (%p8070_p9) target bundleno = 3214 (0xc8e), region = 56  ;;  %s371_s28 = scalar_lea.sflag (!%p8070_p9), [#allocation3], %s7277_s8 }
  0xae   : > { %s6464_s6 = smul.u32 (!%p8070_p9), 48, %s7277_s8 }
  0xb0   : > { %s374_s19 = scalar_lea.vmem (!%p8070_p9), [#allocation2], %s6464_s6 }
  0xb4   : > { %6927 = dma.done.wait (%p8071_p13), %s371_s28, 768  }
  0xb5   : > { %6929 = vsyncadd (%p8071_p13), %s371_s28, 4294966528  ;;  %s379_s7 = sand.u32 1, %s7049_s13   ;;  %s6465_s17 = smul.u32 24, %s7277_s8 }
  0xb6   : > { %s380_s18 = scalar_lea.sflag [#allocation6], %s379_s7 }
  0xb7   : > { %s383_s20 = scalar_lea.vmem [#allocation5], %s6465_s17 }
  0xb8   : > { %6931 = dma.done.wait (%p8071_p13), %s380_s18, 384  }
  0xb9   : > { %6933 = vsyncadd (%p8071_p13), %s380_s18, 4294966912  ;;  %p8072_p11 = scmp.eq.s32.totalorder %s7049_s13, 0 }
  0xbb   : > { %6935 = dma.done.wait (%p8072_p11), [#allocation6], 512   ;;  %p8073_p7 = pmov %p8072_p11 }
  0xbd   : > { %6937 = vsyncadd (%p8073_p7), [#allocation6], 4294966784  ;;  %p8074_p12 = pmov %p8073_p7 }
  0xbe   : > { %p8075_p1 = pmov %p8073_p7 }
  0xbf   : > { %6939 = dma.done.wait (%p8074_p12), [#allocation9], 1536  }
  0xc0   : > { %6941 = vsyncadd (%p8075_p1), [#allocation9], 4294965760  ;;  %vm444_vm0 = vcmask 261120   ;;  %v438_v0 = vld [vmem:[%s374_s19] sm:$0xff]  ;;  %v440_v1 = vld [vmem:[%s374_s19 + $0x10] sm:$0xff]  ;;  %vm6970_vm1 = vmmov 0  }
  0xc1   : > { %v439_v2 = vld [vmem:[%s374_s19 + $0x8] sm:$0xff]  ;;  %v445_v3 = vsel %vm444_vm0, %v438_v0, 0.0  ;;  %v451_v4 = vsel %vm444_vm0, %v440_v1, 0.0  ;;  %v441_v5 = vld [vmem:[%s374_s19 + $0x18] sm:$0xff]  ;;  %v442_v8 = vld [vmem:[%s374_s19 + $0x20] sm:$0xff]  ;;  %vm1082_vm2 = vcmask 64512  }
  0xc2   : > { %446 = vadd.xlane.f32.xlu0 %v445_v3  ;;  %452 = vadd.xlane.f32.xlu1 %v451_v4  ;;  %v448_v6 = vsel %vm444_vm0, %v439_v2, 0.0  ;;  %v454_v7 = vsel %vm444_vm0, %v441_v5, 0.0  ;;  %v443_v9 = vld [vmem:[%s374_s19 + $0x28] sm:$0xff]  ;;  %v457_v10 = vsel %vm444_vm0, %v442_v8, 0.0  ;;  %v552_v16 = vld [vmem:[%s383_s20 + $0x10] sm:$0xff]  ;;  %vm7444_vm3 = vmpackc.low %vm1082_vm2, %vm1082_vm2  ;;  %vm1539_vm4 = vcmask 130048  }
  0xc3   : > { %v460_v11 = vsel %vm444_vm0, %v443_v9, 0.0  ;;  %v550_v12 = vld [vmem:[%s383_s20] sm:$0xff]  ;;  %v551_v13 = vld [vmem:[%s383_s20 + $0x8] sm:$0xff]  ;;  %v559_v17 = vsel %vm444_vm0, %v552_v16, 0.0  ;;  %v705_v63 = vld [vmem:[#allocation8] sm:$0xff]  ;;  %s6972_s21 = smov 120  }
  0xc4   : > { %v553_v14 = vsel %vm444_vm0, %v550_v12, 0.0  ;;  %v556_v15 = vsel %vm444_vm0, %v551_v13, 0.0  ;;  %v708_v3 = vld [vmem:[#allocation8 + $0x18] sm:$0xff]  ;;  %s6973_s29 = smov 112   ;;  %s6974_s22 = smov 104  }
  0xc5   : > { %s434_s6 = scalar_lea.vmem [#allocation11], %s6465_s17  ;;  %s5709_s19 = smul.u32 384, %s7049_s13 }
  0xc6   : > { %449 = vadd.xlane.f32.xlu0 %v448_v6  ;;  %455 = vadd.xlane.f32.xlu1 %v454_v7  ;;  %v612_v6 = vld [vmem:[#allocation7] sm:$0xff]  ;;  %v613_v7 = vld [vmem:[#allocation7 + $0x8] sm:$0xff]  ;;  %s5445_s28 = sshll.u32 %s434_s6, 4  ;;  %s8078_s18 = sld [smem:[#allocation23_spill]]  ;;  %s7976_s28 = int_to_ptr.vmem [resolvable:$true] %s5445_s28 }
  0xc7   : > { %s5432_s15 = scalar_lea.sflag [#allocation4], %s7277_s8  ;;  %s6882_s13 = scalar_lea.vmem %s7976_s28, 384 }
  0xc8   : > { %p6883_p2 = scmp.ne.s32.totalorder %s7976_s28, %s6882_s13  ;;  %s6975_s25 = smov [#allocation11]  }
  0xc9   : > { %s6886_s26 = sshll.u32 %s6975_s25, 4  ;;  %s6887_s26 = int_to_ptr.vmem [resolvable:$false] %s6886_s26 }
  0xca   : > { %458 = vadd.xlane.f32.xlu0 %v457_v10  ;;  %461 = vadd.xlane.f32.xlu1 %v460_v11  ;;  %v615_v10 = vld [vmem:[#allocation7 + $0x18] sm:$0xff]  ;;  %p6884_p4 = pnand %p6883_p2, %p7182_p5  ;;  %s6888_s24 = scalar_lea.vmem %s6887_s26, 768 }
  0xcb   : > { %p6889_p8 = scmp.lt.s32.totalorder %s7976_s28, %s6887_s26  ;;  %p6890_p6 = scmp.lt.s32.totalorder %s6888_s24, %s6882_s13 }
  0xcc   : > { %s7983_s20 = scalar_lea.hbm %s8078_s18, %s5709_s19  ;;  %p6885_p0 = pneg %p6884_p4 }
  0xcd   : > { %p6891_p10 = por %p6890_p6, %p6889_p8 }
  0xce   : > { %554 = vadd.xlane.f32.xlu0 %v553_v14  ;;  %557 = vadd.xlane.f32.xlu1 %v556_v15  ;;  %v711_v14 = vld [vmem:[#allocation8 + $0x28] sm:$0xff] }
  0xcf   : > { %p6892_p3 = pnand %p6891_p10, %p6885_p0 }
  0xd2   : > { %560 = vadd.xlane.f32.xlu0 %v559_v17 }
 0x14f   : > { %v447_v18 = vpop.xlane.xlu0 %446  ;;  %v453_v19 = vpop.xlane.xlu1 %452 }
 0x150   : > { %v464_v20 = vmul.f32 0.03125, %v447_v18  ;;  %v466_v21 = vmul.f32 0.03125, %v453_v19 }
 0x152   : > { %v7310_v22 = vsub.f32 %v438_v0, %v464_v20  ;;  %v7312_v23 = vsub.f32 %v440_v1, %v466_v21  ;;  %v706_v0 = vld [vmem:[#allocation8 + $0x8] sm:$0xff] }
 0x153   : > { %v450_v24 = vpop.xlane.xlu0 %449  ;;  %v456_v25 = vpop.xlane.xlu1 %455  ;;  %v7355_v1 = vpack.c.bf16 %v706_v0, %v705_v63 }
 0x154   : > { %v465_v26 = vmul.f32 0.03125, %v450_v24  ;;  %v467_v27 = vmul.f32 0.03125, %v456_v25  ;;  %v476_v28 = vmul.f32 %v7310_v22, %v7310_v22  ;;  %v478_v29 = vmul.f32 %v7312_v23, %v7312_v23 }
 0x155   : > { %6312 = vmatprep.subr.bf16.mxu1 %v7355_v1 }
 0x156   : > { %v7318_v30 = vsub.f32 %v439_v2, %v465_v26  ;;  %v7320_v31 = vsub.f32 %v441_v5, %v467_v27  ;;  %v482_v32 = vsel %vm444_vm0, %v476_v28, 0.0  ;;  %v488_v35 = vsel %vm444_vm0, %v478_v29, 0.0  ;;  %6314 = vmatpush3.bf16.msra.mxu1 %v7355_v1  ;;  %v707_v2 = vld [vmem:[#allocation8 + $0x10] sm:$0xff] }
 0x157   : > { %483 = vadd.xlane.f32.xlu1 %v482_v32  ;;  %v459_v33 = vpop.xlane.xlu0 %458  ;;  %v462_v34 = vpop.xlane.xlu1 %461  ;;  %v7359_v4 = vpack.c.bf16 %v708_v3, %v707_v2  ;;  %v6969_v5 = vmov 0.0|0.0  }
 0x158   : > { %v468_v36 = vmul.f32 0.03125, %v459_v33  ;;  %v469_v37 = vmul.f32 0.03125, %v462_v34  ;;  %v477_v38 = vmul.f32 %v7318_v30, %v7318_v30  ;;  %v479_v39 = vmul.f32 %v7320_v31, %v7320_v31  ;;  %6305 = vmatprep.subr.bf16.mxu0 %v6969_v5 }
 0x159   : > { %6316 = vmatprep.subr.bf16.mxu1 %v7359_v4 }
 0x15a   : > { %v7328_v40 = vsub.f32 %v442_v8, %v468_v36  ;;  %v7330_v41 = vsub.f32 %v443_v9, %v469_v37  ;;  %v485_v42 = vsel %vm444_vm0, %v477_v38, 0.0  ;;  %v491_v45 = vsel %vm444_vm0, %v479_v39, 0.0  ;;  %6318 = vmatpush3.bf16.msra.mxu1 %v7359_v4  ;;  %v614_v9 = vld [vmem:[#allocation7 + $0x10] sm:$0xff] }
 0x15b   : > { %489 = vadd.xlane.f32.xlu1 %v488_v35  ;;  %486 = vadd.xlane.f32.xlu0 %v485_v42  ;;  %v555_v43 = vpop.xlane.xlu0 %554  ;;  %v558_v44 = vpop.xlane.xlu1 %557  ;;  %v6306_v8 = vpack.c.bf16 %v613_v7, %v612_v6  ;;  %v6309_v11 = vpack.c.bf16 %v615_v10, %v614_v9 }
 0x15c   : > { %v562_v46 = vmul.f32 0.03125, %v555_v43  ;;  %v563_v47 = vmul.f32 0.03125, %v558_v44  ;;  %v480_v48 = vmul.f32 %v7328_v40, %v7328_v40  ;;  %v481_v49 = vmul.f32 %v7330_v41, %v7330_v41  ;;  %6327 = vmatprep.subr.bf16.mxu1 %v6969_v5  ;;  %v5582_v44 = vld [vmem:[%s8030_s2] ss:$0 sm:$0xff] }
 0x15d   : > { %6307 = vmatpush3.bf16.msra.mxu0 %v6306_v8 }
 0x15e   : > { %v7338_v50 = vsub.f32 %v550_v12, %v562_v46  ;;  %v7340_v51 = vsub.f32 %v551_v13, %v563_v47  ;;  %v494_v52 = vsel %vm444_vm0, %v480_v48, 0.0  ;;  %v497_v55 = vsel %vm444_vm0, %v481_v49, 0.0  ;;  %6308 = vmatprep.subr.bf16.mxu0 %v6969_v5  ;;  %v710_v13 = vld [vmem:[#allocation8 + $0x20] sm:$0xff] }
 0x15f   : > { %492 = vadd.xlane.f32.xlu0 %v491_v45  ;;  %495 = vadd.xlane.f32.xlu1 %v494_v52  ;;  %v561_v53 = vpop.xlane.xlu0 %560  ;;  %v6971_v12 = vmov 0.0   ;;  %v7368_v15 = vpack.c.bf16 %v711_v14, %v710_v13  ;;  %v5583_v52 = vld [vmem:[%s8031_s3] ss:$0 sm:$0xff] }
 0x160   : > { %v564_v54 = vmul.f32 0.03125, %v561_v53  ;;  %v568_v56 = vmul.f32 %v7338_v50, %v7338_v50  ;;  %v569_v57 = vmul.f32 %v7340_v51, %v7340_v51  ;;  %5896 = vmatprep.mubr.msk.f32.mxu0 %vm6970_vm1, %v6971_v12 }
 0x161   : > { %6310 = vmatpush3.bf16.msra.mxu0 %v6309_v11 }
 0x162   : > { %v7348_v58 = vsub.f32 %v552_v16, %v564_v54  ;;  %v571_v59 = vsel %vm444_vm0, %v568_v56, 0.0  ;;  %v574_v60 = vsel %vm444_vm0, %v569_v57, 0.0  ;;  %6320 = vmatprep.subr.bf16.mxu0 %v7368_v15 }
 0x163   : > { %498 = vadd.xlane.f32.xlu0 %v497_v55  ;;  %572 = vadd.xlane.f32.xlu1 %v571_v59 }
 0x164   : > { %v570_v61 = vmul.f32 %v7348_v58, %v7348_v58 }
 0x166   : > { %v577_v62 = vsel %vm444_vm0, %v570_v61, 0.0 }
 0x167   : > { %575 = vadd.xlane.f32.xlu0 %v574_v60  ;;  %578 = vadd.xlane.f32.xlu1 %v577_v62 }
 0x1e4   : > { %v484_v16 = vpop.xlane.xlu1 %483 }
 0x1e5   : > { %v500_v17 = vmul.f32 0.03125, %v484_v16 }
 0x1e7   : > { %v506_v18 = vadd.f32 1e-05, %v500_v17  ;;  %v712_v17 = vld [vmem:[#allocation8 + $0x30] sm:$0xff] }
 0x1e8   : > { %v490_v19 = vpop.xlane.xlu1 %489  ;;  %v487_v20 = vpop.xlane.xlu0 %486 }
 0x1e9   : > { %6648 = vrsqrt.f32 %v506_v18  ;;  %v502_v21 = vmul.f32 0.03125, %v490_v19  ;;  %v501_v24 = vmul.f32 0.03125, %v487_v20  ;;  %v713_v18 = vld [vmem:[#allocation8 + $0x38] sm:$0xff] }
 0x1eb   : > { %v508_v25 = vadd.f32 1e-05, %v502_v21  ;;  %v507_v26 = vadd.f32 1e-05, %v501_v24 }
 0x1ec   : > { %v496_v27 = vpop.xlane.xlu1 %495  ;;  %v493_v28 = vpop.xlane.xlu0 %492 }
 0x1ed   : > { %6650 = vrsqrt.f32 %v508_v25  ;;  %v504_v29 = vmul.f32 0.03125, %v496_v27  ;;  %v503_v32 = vmul.f32 0.03125, %v493_v28  ;;  %v6323_v25 = vpack.c.bf16 %v713_v18, %v712_v17 }
 0x1ee   : > { %6652 = vrsqrt.f32 %v507_v26 }
 0x1ef   : > { %v510_v33 = vadd.f32 1e-05, %v504_v29  ;;  %v509_v34 = vadd.f32 1e-05, %v503_v32 }
 0x1f0   : > { %v573_v35 = vpop.xlane.xlu1 %572  ;;  %v499_v36 = vpop.xlane.xlu0 %498 }
 0x1f1   : > { %6654 = vrsqrt.f32 %v510_v33  ;;  %v580_v37 = vmul.f32 0.03125, %v573_v35  ;;  %v505_v38 = vmul.f32 0.03125, %v499_v36 }
 0x1f2   : > { %6656 = vrsqrt.f32 %v509_v34 }
 0x1f3   : > { %v6649_v39 = vpop.eup %6648  ;;  %v583_v42 = vadd.f32 1e-05, %v580_v37  ;;  %v511_v43 = vadd.f32 1e-05, %v505_v38 }
 0x1f4   : > { %v579_v45 = vpop.xlane.xlu1 %578  ;;  %v576_v46 = vpop.xlane.xlu0 %575  ;;  %v518_v47 = vmul.f32 %v6649_v39, %v7310_v22 }
 0x1f5   : > { %6658 = vrsqrt.f32 %v583_v42  ;;  %v582_v48 = vmul.f32 0.03125, %v579_v45  ;;  %v581_v49 = vmul.f32 0.03125, %v576_v46 }
 0x1f6   : > { %6660 = vrsqrt.f32 %v511_v43  ;;  %v531_v53 = vmul.f32 %v5582_v44, %v518_v47 }
 0x1f7   : > { %v6651_v54 = vpop.eup %6650  ;;  %v585_v55 = vadd.f32 1e-05, %v582_v48  ;;  %v584_v56 = vadd.f32 1e-05, %v581_v49 }
 0x1f8   : > { %v6653_v57 = vpop.eup %6652  ;;  %v544_v59 = vadd.f32 %v5583_v52, %v531_v53  ;;  %v520_v60 = vmul.f32 %v6651_v54, %v7312_v23 }
 0x1f9   : > { %6662 = vrsqrt.f32 %v585_v55  ;;  %v519_v61 = vmul.f32 %v6653_v57, %v7318_v30  ;;  %v5584_v30 = vld [vmem:[%s8032_s4] ss:$0 sm:$0xff] }
 0x1fa   : > { %6664 = vrsqrt.f32 %v584_v56  ;;  %5913 = vmatprep.mubr.msk.f32.mxu1 %vm444_vm0, %v544_v59  ;;  %v533_v22 = vmul.f32 %v5582_v44, %v520_v60 }
 0x1fb   : > { %v6655_v62 = vpop.eup %6654  ;;  %v532_v63 = vmul.f32 %v5582_v44, %v519_v61 }
 0x1fc   : > { %v6657_v0 = vpop.eup %6656  ;;  %v546_v2 = vadd.f32 %v5583_v52, %v533_v22  ;;  %v522_v3 = vmul.f32 %v6655_v62, %v7328_v40 }
 0x1fd   : > { %v545_v6 = vadd.f32 %v5583_v52, %v532_v63  ;;  %v521_v7 = vmul.f32 %v6657_v0, %v7320_v31  ;;  %v5585_v31 = vld [vmem:[%s8033_s5] ss:$0 sm:$0xff] }
 0x1fe   : > { %v535_v8 = vmul.f32 %v5582_v44, %v522_v3 }
 0x1ff   : > { %v6659_v9 = vpop.eup %6658  ;;  %5914 = vmatmul.mubr.msk.f32.vlgmr.msra.gmra.mrb[0].mxu1 %vm444_vm0, %v545_v6  ;;  %v534_v23 = vmul.f32 %v5582_v44, %v521_v7 }
 0x200   : > { %v6661_v10 = vpop.eup %6660  ;;  %5916 = vmatprep.mubr.msk.f32.mxu1 %vm444_vm0, %v546_v2  ;;  %v548_v11 = vadd.f32 %v5583_v52, %v535_v8  ;;  %6329 = vmatpush3.bf16.msra.mxu1 %v7355_v1  ;;  %v589_v40 = vmul.f32 %v6659_v9, %v7338_v50 }
 0x201   : > { %v547_v13 = vadd.f32 %v5583_v52, %v534_v23  ;;  %v523_v14 = vmul.f32 %v6661_v10, %v7330_v41  ;;  %6330 = vmatprep.subr.bf16.mxu1 %v6969_v5 }
 0x202   : > { %v599_v16 = vmul.f32 %v5584_v30, %v589_v40 }
 0x203   : > { %v6663_v19 = vpop.eup %6662  ;;  %5917 = vmatmul.mubr.msk.f32.gmra.mrb[2].mxu1 %vm444_vm0, %v547_v13  ;;  %v536_v20 = vmul.f32 %v5582_v44, %v523_v14 }
 0x204   : > { %v6665_v21 = vpop.eup %6664  ;;  %5919 = vmatprep.mubr.msk.f32.mxu1 %vm444_vm0, %v548_v11  ;;  %v609_v50 = vadd.f32 %v5585_v31, %v599_v16  ;;  %6332 = vmatpush3.bf16.msra.mxu1 %v7359_v4  ;;  %v591_v41 = vmul.f32 %v6663_v19, %v7348_v58 }
 0x205   : > { %v549_v1 = vadd.f32 %v5583_v52, %v536_v20  ;;  %v590_v24 = vmul.f32 %v6665_v21, %v7340_v51  ;;  %6339 = vmatprep.subr.bf16.mxu1 %v6969_v5 }
 0x206   : > { %5897 = vmatmul.mubr.msk.f32.vlgmr.msra.gmra.mrb[0].mxu0 %vm444_vm0, %v609_v50  ;;  %v601_v51 = vmul.f32 %v5584_v30, %v591_v41 }
 0x207   : > { %5920 = vmatmul.mubr.msk.f32.gmra.mrb[4].mxu1 %vm444_vm0, %v549_v1  ;;  %5899 = vmatprep.mubr.msk.f32.mxu0 %vm6970_vm1, %v6971_v12  ;;  %v600_v26 = vmul.f32 %v5584_v30, %v590_v24 }
 0x208   : > { %5947 = vmatprep.mubr.msk.f32.mxu1 %vm6970_vm1, %v6971_v12  ;;  %6322 = vmatpush3.bf16.msra.mxu0 %v7368_v15  ;;  %v611_v58 = vadd.f32 %v5585_v31, %v601_v51 }
 0x209   : > { %v610_v4 = vadd.f32 %v5585_v31, %v600_v26  ;;  %6324 = vmatprep.subr.bf16.mxu0 %v6323_v25 }
 0x20b   : > { %5900 = vmatmul.mubr.msk.f32.gmra.mrb[2].mxu0 %vm444_vm0, %v610_v4  ;;  %5948 = vmatmul.mubr.msk.f32.vlgmr.msra.gmra.mrb[6].mxu1 %vm444_vm0, %v609_v50 }
 0x20c   : > { %5902 = vmatprep.mubr.msk.f32.mxu0 %vm6970_vm1, %v6971_v12  ;;  %5950 = vmatprep.mubr.msk.f32.mxu1 %vm6970_vm1, %v6971_v12 }
 0x20d   : > { %6326 = vmatpush3.bf16.msra.mxu0 %v6323_v25 }
 0x20e   : > { %6333 = vmatprep.subr.bf16.mxu0 %v6969_v5 }
 0x20f   : > { %5903 = vmatmul.mubr.msk.f32.gmra.mrb[4].mxu0 %vm444_vm0, %v611_v58  ;;  %5951 = vmatmul.mubr.msk.f32.gmra.mrb[8].mxu1 %vm444_vm0, %v610_v4 }
 0x210   : > { %5930 = vmatprep.mubr.msk.f32.mxu0 %vm444_vm0, %v544_v59  ;;  %5953 = vmatprep.mubr.msk.f32.mxu1 %vm6970_vm1, %v6971_v12 }
 0x213   : > { %5931 = vmatmul.mubr.msk.f32.vlgmr.msra.gmra.mrb[6].mxu0 %vm444_vm0, %v545_v6  ;;  %5954 = vmatmul.mubr.msk.f32.gmra.mrb[10].mxu1 %vm444_vm0, %v611_v58 }
 0x214   : > { %5933 = vmatprep.mubr.msk.f32.mxu0 %vm444_vm0, %v546_v2  ;;  %6335 = vmatpush3.bf16.msra.mxu0 %v7368_v15 }
 0x215   : > { %6336 = vmatprep.subr.bf16.mxu0 %v6969_v5  ;;  %5977 = vmatprep.mubr.msk.f32.mxu1 %vm6970_vm1, %v6971_v12 }
 0x217   : > { %5934 = vmatmul.mubr.msk.f32.gmra.mrb[8].mxu0 %vm444_vm0, %v547_v13 }
 0x218   : > { %5936 = vmatprep.mubr.msk.f32.mxu0 %vm444_vm0, %v548_v11  ;;  %6338 = vmatpush3.bf16.msra.mxu0 %v6323_v25 }
 0x219   : > { %6347 = vmatprep.subr.bf16.mxu0 %v6969_v5 }
 0x21b   : > { %5937 = vmatmul.mubr.msk.f32.gmra.mrb[10].mxu0 %vm444_vm0, %v549_v1 }
 0x21c   : > { %5964 = vmatprep.mubr.msk.f32.mxu0 %vm6970_vm1, %v6971_v12 }
 0x21f   : > { %5965 = vmatmul.mubr.msk.f32.vlgmr.msra.gmra.mrb[12].mxu0 %vm444_vm0, %v609_v50 }
 0x220   : > { %5967 = vmatprep.mubr.msk.f32.mxu0 %vm6970_vm1, %v6971_v12 }
 0x223   : > { %5968 = vmatmul.mubr.msk.f32.gmra.mrb[14].mxu0 %vm444_vm0, %v610_v4 }
 0x224   : > { %5970 = vmatprep.mubr.msk.f32.mxu0 %vm6970_vm1, %v6971_v12 }
 0x227   : > { %5971 = vmatmul.mubr.msk.f32.gmra.mrb[16].mxu0 %vm444_vm0, %v611_v58 }
 0x228   : > { %5991 = vmatprep.mubr.msk.f32.mxu0 %vm6970_vm1, %v6971_v12 }
 0x2d2   : > { %v5915_v15 = vpop.f32.mrb[0].mxu1 }
 0x2d3   : > { %v798_v27 = vpop.f32.mrb[1].mxu1 }
 0x2d4   : > { %v6340_v29 = vpack.c.bf16 %v5915_v15, %v798_v27  ;;  %v7448_v32 = vpack.i.bf16 %v5915_v15, %v798_v27 }
 0x2d6   : > { %v5918_v33 = vpop.f32.mrb[2].mxu1  ;;  %6342 = vmatpush3.bf16.xpose.msk.msra.mxu1 %vm7444_vm3, %v6340_v29 }
 0x2d7   : > { %v808_v34 = vpop.f32.mrb[3].mxu1  ;;  %6343 = vmatprep.subr.bf16.mxu1 %v6969_v5 }
 0x2d8   : > { %v6344_v35 = vpack.c.bf16 %v5918_v33, %v808_v34  ;;  %v7453_v36 = vpack.i.bf16 %v5918_v33, %v808_v34 }
 0x2d9   : > { %v7455_v37 = vpop.f32.mrb[0].mxu0 }
 0x2da   : > { %v5921_v38 = vpop.f32.mrb[4].mxu1  ;;  %v5898_v39 = vpop.f32.mrb[1].mxu0 }
 0x2db   : > { %v818_v42 = vpop.f32.mrb[5].mxu1 }
 0x2dc   : > { %v6348_v43 = vpack.c.bf16 %v5921_v38, %v818_v42  ;;  %v7457_v44 = vpack.i.bf16 %v5921_v38, %v818_v42 }
 0x2dd   : > { %5978 = vmatmul.mubr.msk.f32.vlgmr.msra.gmra.mrb[12].mxu1 %vm1082_vm2, %v7455_v37 }
 0x2de   : > { %v7461_v45 = vpop.f32.mrb[2].mxu0  ;;  %v7463_v46 = vpop.f32.mrb[6].mxu1  ;;  %6346 = vmatpush3.bf16.xpose.msk.msra.mxu1 %vm7444_vm3, %v6344_v35  ;;  %6350 = vmatpush3.bf16.xpose.msk.msra.mxu0 %vm7444_vm3, %v6348_v43 }
 0x2df   : > { %v5901_v47 = vpop.f32.mrb[3].mxu0  ;;  %v5949_v48 = vpop.f32.mrb[7].mxu1  ;;  %5984 = vmatprep.mubr.msk.f32.mxu1 %vm6970_vm1, %v6971_v12  ;;  %5994 = vmatprep.subr.mxu1 %v6971_v12 }
 0x2e0   : > { %5999 = vmatprep.subr.mxu0 %v6971_v12 }
 0x2e2   : > { %v7473_v49 = vpop.f32.mrb[4].mxu0  ;;  %v7475_v52 = vpop.f32.mrb[8].mxu1 }
 0x2e3   : > { %v5904_v53 = vpop.f32.mrb[5].mxu0  ;;  %v5952_v54 = vpop.f32.mrb[9].mxu1 }
 0x2e5   : > { %5985 = vmatmul.mubr.msk.f32.vlgmr.msra.gmra.mrb[14].mxu1 %vm1082_vm2, %v7461_v45  ;;  %5992 = vmatmul.mubr.msk.f32.vlgmr.msra.gmra.mrb[18].mxu0 %vm1082_vm2, %v7473_v49 }
 0x2e6   : > { %v7481_v55 = vpop.f32.mrb[6].mxu0  ;;  %v7483_v56 = vpop.f32.mrb[10].mxu1  ;;  %5995 = vmatpush3.xpose.msk.msra.mxu1 %vm1082_vm2, %v7463_v46  ;;  %6000 = vmatpush3.xpose.msk.msra.mxu0 %vm1082_vm2, %v7475_v52 }
 0x2e7   : > { %v7489_v57 = vpop.f32.mrb[7].mxu0  ;;  %v5955_v59 = vpop.f32.mrb[11].mxu1  ;;  %5996 = vmatprep.mubr.msk.f32.mxu1 %vm6970_vm1, %v6971_v12  ;;  %6001 = vmatprep.mubr.msk.f32.mxu0 %vm6970_vm1, %v6971_v12 }
 0x2e8   : > { %v7497_v60 = vpack.i.bf16 %v7481_v55, %v7489_v57  ;;  %v6352_v61 = vpack.c.bf16 %v7481_v55, %v7489_v57  ;;  %6004 = vmatprep.subr.mxu1 %v6971_v12  ;;  %6009 = vmatprep.subr.mxu0 %v6971_v12 }
 0x2e9   : > { %5997 = vmatmul.mubr.msk.f32.vlgmr.msra.gmra.mrb[16].mxu1 %vm1082_vm2, %v7455_v37  ;;  %6002 = vmatmul.mubr.msk.f32.vlgmr.msra.gmra.mrb[20].mxu0 %vm1082_vm2, %v7461_v45 }
 0x2ea   : > { %v7507_v22 = vpop.f32.mrb[8].mxu0  ;;  %6005 = vmatpush3.xpose.msk.msra.mxu1 %vm1082_vm2, %v7483_v56  ;;  %6006 = vmatprep.mubr.msk.f32.mxu1 %vm6970_vm1, %v6971_v12 }
 0x2eb   : > { %v7513_v62 = vpop.f32.mrb[9].mxu0  ;;  %6014 = vmatprep.subr.mxu1 %v6971_v12  ;;  %6011 = vmatprep.mubr.msk.f32.mxu0 %vm6970_vm1, %v6971_v12 }
 0x2ec   : > { %v7520_v63 = vpack.i.bf16 %v7507_v22, %v7513_v62  ;;  %v6355_v0 = vpack.c.bf16 %v7507_v22, %v7513_v62 }
 0x2ed   : > { %6007 = vmatmul.mubr.msk.f32.vlgmr.msra.gmra.mrb[18].mxu1 %vm1082_vm2, %v7473_v49 }
 0x2ee   : > { %v7526_v2 = vpop.f32.mrb[10].mxu0  ;;  %6016 = vmatprep.mubr.msk.f32.mxu1 %vm6970_vm1, %v6971_v12 }
 0x2ef   : > { %v7530_v3 = vpop.f32.mrb[11].mxu0 }
 0x2f0   : > { %v7534_v6 = vpack.i.bf16 %v7526_v2, %v7530_v3  ;;  %v6358_v7 = vpack.c.bf16 %v7526_v2, %v7530_v3 }
 0x2f2   : > { %v7538_v8 = vpop.f32.mrb[12].mxu0 }
 0x2f3   : > { %v5966_v9 = vpop.f32.mrb[13].mxu0  ;;  %6010 = vmatpush3.msra.mxu0 %v7538_v8 }
 0x2f4   : > { %6019 = vmatprep.subr.mxu0 %v6971_v12 }
 0x2f6   : > { %v7542_v23 = vpop.f32.mrb[14].mxu0 }
 0x2f7   : > { %v5969_v30 = vpop.f32.mrb[15].mxu0  ;;  %6015 = vmatpush3.msra.mxu1 %v7542_v23 }
 0x2f8   : > { %6354 = vmatprep.subr.bf16.mxu1 %v6969_v5 }
 0x2fa   : > { %v7546_v10 = vpop.f32.mrb[16].mxu0 }
 0x2fb   : > { %v5972_v11 = vpop.f32.mrb[17].mxu0 }
 0x3b0   : > { %v1158_v40 = vpop.f32.mrb[12].mxu1 }
 0x3b1   : > { %v5979_v13 = vpop.f32.mrb[13].mxu1  ;;  %v1540_v31 = vsel %vm1539_vm4, %v1158_v40, -inf }
 0x3b2   : > { %1541 = vmax.xlane.f32.xlu0 %v1540_v31 }
 0x3b8   : > { %v1237_v14 = vpop.f32.mrb[14].mxu1  ;;  %v1316_v16 = vpop.f32.mrb[18].mxu0 }
 0x3b9   : > { %v5986_v17 = vpop.f32.mrb[15].mxu1  ;;  %v5993_v18 = vpop.f32.mrb[19].mxu0  ;;  %v1543_v19 = vsel %vm1539_vm4, %v1237_v14, -inf  ;;  %v1546_v20 = vsel %vm1539_vm4, %v1316_v16, -inf }
 0x3ba   : > { %1544 = vmax.xlane.f32.xlu0 %v1543_v19  ;;  %1547 = vmax.xlane.f32.xlu1 %v1546_v20 }
 0x3bc   : > { %v1389_v21 = vpop.f32.mrb[16].mxu1  ;;  %v1462_v50 = vpop.f32.mrb[20].mxu0 }
 0x3bd   : > { %v5998_v1 = vpop.f32.mrb[17].mxu1  ;;  %v6003_v24 = vpop.f32.mrb[21].mxu0  ;;  %v1549_v41 = vsel %vm1082_vm2, %v1389_v21, -inf  ;;  %v1552_v25 = vsel %vm1082_vm2, %v1462_v50, -inf }
 0x3be   : > { %1550 = vmax.xlane.f32.xlu1 %v1549_v41  ;;  %1553 = vmax.xlane.f32.xlu0 %v1552_v25 }
 0x3c0   : > { %v1535_v26 = vpop.f32.mrb[18].mxu1 }
 0x3c1   : > { %v6008_v4 = vpop.f32.mrb[19].mxu1  ;;  %v1555_v51 = vsel %vm1082_vm2, %v1535_v26, -inf }
 0x3c2   : > { %1556 = vmax.xlane.f32.xlu1 %v1555_v51 }
 0x3d3   : > { %6564 = vrot.lane.b32.xlu1 %v7453_v36, %s6972_s21 }
 0x3d4   : > { %6559 = vrot.lane.b32.xlu0 %v7448_v32, %s6972_s21 }
 0x3d7   : > { %6569 = vrot.lane.b32.xlu1 %v7457_v44, %s6972_s21 }
 0x3d8   : > { %2130 = vrot.lane.b32.xlu0 %v7461_v45, %s6972_s21 }
 0x3db   : > { %2048 = vrot.lane.b32.xlu1 %v7455_v37, %s6972_s21 }
 0x3dc   : > { %2212 = vrot.lane.b32.xlu0 %v7473_v49, %s6972_s21 }
 0x3df   : > { %2294 = vrot.lane.b32.xlu1 %v7463_v46, %s6972_s21 }
 0x3e0   : > { %2442 = vrot.lane.b32.xlu0 %v7483_v56, %s6972_s21 }
 0x3e3   : > { %2368 = vrot.lane.b32.xlu1 %v7475_v52, %s6972_s21 }
 0x3e7   : > { %2577 = vrot.lane.b32.xlu1 %v7538_v8, %s6972_s21 }
 0x43f   : > { %v1542_v58 = vpop.xlane.xlu0 %1541 }
 0x447   : > { %v1545_v15 = vpop.xlane.xlu0 %1544  ;;  %v1548_v27 = vpop.xlane.xlu1 %1547 }
 0x44b   : > { %v1551_v29 = vpop.xlane.xlu1 %1550  ;;  %v1554_v33 = vpop.xlane.xlu0 %1553 }
 0x44c   : > { %v1558_v34 = vmax.f32 %v1542_v58, %v1551_v29  ;;  %v1559_v35 = vmax.f32 %v1545_v15, %v1554_v33 }
 0x44e   : > { %v1570_v38 = vsub.f32 %v1389_v21, %v1558_v34  ;;  %v1571_v39 = vsub.f32 %v1462_v50, %v1559_v35  ;;  %v1561_v54 = vsub.f32 %v1158_v40, %v1558_v34  ;;  %v1562_v9 = vsub.f32 %v1237_v14, %v1559_v35 }
 0x44f   : > { %v1557_v42 = vpop.xlane.xlu1 %1556 }
 0x450   : > { %v1573_v43 = vmul.f32 1.442695, %v1570_v38  ;;  %v1560_v47 = vmax.f32 %v1548_v27, %v1557_v42  ;;  %v1575_v48 = vmul.f32 1.442695, %v1571_v39  ;;  %v1564_v30 = vmul.f32 1.442695, %v1561_v54 }
 0x451   : > { %v1566_v13 = vmul.f32 1.442695, %v1562_v9 }
 0x452   : > { %v1572_v53 = vsub.f32 %v1535_v26, %v1560_v47  ;;  %6666 = vpow2.f32 %v1573_v43  ;;  %v1563_v11 = vsub.f32 %v1316_v16, %v1560_v47  ;;  %v6560_v16 = vpop.permute.xlu0 %6559 }
 0x453   : > { %6668 = vpow2.f32 %v1575_v48  ;;  %v6565_v40 = vpop.permute.xlu1 %6564  ;;  %v6562_v19 = vunpack.i.h.bf16 %v6560_v16  ;;  %v6561_v20 = vunpack.i.l.bf16 %v6560_v16 }
 0x454   : > { %v1577_v59 = vmul.f32 1.442695, %v1572_v53  ;;  %v1568_v31 = vmul.f32 1.442695, %v1563_v11  ;;  %v6566_v21 = vunpack.i.l.bf16 %v6565_v40 }
 0x455   : > { %v6361_v55 = vpack.c.bf16 %v6562_v19, %v6561_v20 }
 0x456   : > { %6670 = vpow2.f32 %v1577_v59  ;;  %v2131_v1 = vpop.permute.xlu0 %2130 }
 0x457   : > { %6672 = vpow2.f32 %v1564_v30  ;;  %v6570_v62 = vpop.permute.xlu1 %6569 }
 0x458   : > { %6674 = vpow2.f32 %v1566_v13  ;;  %v6572_v3 = vunpack.i.h.bf16 %v6570_v62 }
 0x459   : > { %6676 = vpow2.f32 %v1568_v31 }
 0x45a   : > { %v2213_v25 = vpop.permute.xlu0 %2212 }
 0x45b   : > { %v2049_v2 = vpop.permute.xlu1 %2048 }
 0x45c   : > { %v7574_v17 = vpop.eup %6666 }
 0x45d   : > { %6012 = vmatmul.mubr.msk.f32.vlgmr.msra.gmra.mrb[22].mxu0 %vm1082_vm2, %v7574_v17  ;;  %v7578_v18 = vpop.eup %6668 }
 0x45e   : > { %6020 = vmatpush3.msra.mxu0 %v7546_v10  ;;  %6021 = vmatprep.mubr.msk.f32.mxu0 %vm6970_vm1, %v6971_v12  ;;  %v2443_v4 = vpop.permute.xlu0 %2442 }
 0x45f   : > { %6017 = vmatmul.mubr.msk.f32.vlgmr.msra.gmra.mrb[20].mxu1 %vm1082_vm2, %v7578_v18  ;;  %6351 = vmatprep.subr.bf16.mxu0 %v6969_v5  ;;  %v2295_v41 = vpop.permute.xlu1 %2294 }
 0x460   : > { %v7586_v14 = vpop.eup %6670  ;;  %6356 = vmatpush3.bf16.msra.mxu1 %v6355_v0  ;;  %6035 = vmatprep.mubr.msk.f32.mxu1 %vm6970_vm1, %v6971_v12 }
 0x461   : > { %6022 = vmatmul.mubr.msk.f32.vlgmr.msra.gmra.mrb[24].mxu0 %vm1082_vm2, %v7586_v14  ;;  %6360 = vmatprep.subr.bf16.mxu1 %v6969_v5  ;;  %v7602_v22 = vpop.eup %6672 }
 0x462   : > { %6353 = vmatpush3.bf16.msra.mxu0 %v6352_v61  ;;  %6028 = vmatprep.mubr.msk.f32.mxu0 %vm6970_vm1, %v6971_v12  ;;  %v7606_v0 = vpop.eup %6674  ;;  %v6567_v61 = vunpack.i.h.bf16 %v6565_v40  ;;  %v1579_v20 = vsel %vm1539_vm4, %v7602_v22, 0.0 }
 0x463   : > { %6357 = vmatprep.subr.bf16.mxu0 %v6969_v5  ;;  %v7616_v57 = vpop.eup %6676  ;;  %v2369_v26 = vpop.permute.xlu1 %2368 }
 0x464   : > { %v6365_v50 = vpack.c.bf16 %v6567_v61, %v6566_v21  ;;  %v1591_v61 = vsel %vm1082_vm2, %v7578_v18, 0.0  ;;  %v1585_v21 = vsel %vm1539_vm4, %v7616_v57, 0.0 }
 0x465   : > { %6029 = vmatmul.mubr.msk.f32.vlgmr.msra.gmra.mrb[22].mxu0 %vm1539_vm4, %v7602_v22  ;;  %v1594_v22 = vsel %vm1082_vm2, %v7586_v14, 0.0 }
 0x466   : > { %6359 = vmatpush3.bf16.msra.mxu0 %v6358_v7  ;;  %6042 = vmatprep.mubr.msk.f32.mxu0 %vm6970_vm1, %v6971_v12  ;;  %v6571_v7 = vunpack.i.l.bf16 %v6570_v62  ;;  %v1588_v62 = vsel %vm1082_vm2, %v7574_v17, 0.0 }
 0x467   : > { %6036 = vmatmul.mubr.msk.f32.vlgmr.msra.gmra.mrb[20].mxu1 %vm1539_vm4, %v7606_v0  ;;  %6364 = vmatprep.subr.bf16.mxu0 %v6969_v5  ;;  %v2578_v51 = vpop.permute.xlu1 %2577 }
 0x468   : > { %6049 = vmatprep.mubr.msk.f32.mxu1 %vm6970_vm1, %v6971_v12  ;;  %v6369_v24 = vpack.c.bf16 %v6572_v3, %v6571_v7 }
 0x469   : > { %6363 = vmatpush3.bf16.xpose.msk.msra.mxu1 %vm7444_vm3, %v6361_v55  ;;  %6043 = vmatmul.mubr.msk.f32.vlgmr.msra.gmra.mrb[24].mxu0 %vm1539_vm4, %v7616_v57  ;;  %v1582_v55 = vsel %vm1539_vm4, %v7606_v0, 0.0 }
 0x46a   : > { %6368 = vmatprep.subr.bf16.mxu1 %v6969_v5  ;;  %6056 = vmatprep.mubr.msk.f32.mxu0 %vm6970_vm1, %v6971_v12 }
 0x46f   : > { %6367 = vmatpush3.bf16.xpose.msk.msra.mxu0 %vm7444_vm3, %v6365_v50 }
 0x470   : > { %6050 = vmatmul.mubr.msk.f32.vlgmr.msra.gmra.mrb[22].mxu1 %vm1082_vm2, %v2049_v2  ;;  %6066 = vmatprep.subr.mxu0 %v6971_v12 }
 0x471   : > { %6371 = vmatpush3.bf16.xpose.msk.msra.mxu1 %vm7444_vm3, %v6369_v24  ;;  %6063 = vmatprep.mubr.msk.f32.mxu1 %vm6970_vm1, %v6971_v12 }
 0x472   : > { %6071 = vmatprep.subr.mxu1 %v6971_v12 }
 0x476   : > { %6057 = vmatmul.mubr.msk.f32.vlgmr.msra.gmra.mrb[26].mxu0 %vm1082_vm2, %v2131_v1 }
 0x477   : > { %6067 = vmatpush3.xpose.msk.msra.mxu0 %vm1082_vm2, %v2295_v41  ;;  %6068 = vmatprep.mubr.msk.f32.mxu0 %vm6970_vm1, %v6971_v12 }
 0x478   : > { %6064 = vmatmul.mubr.msk.f32.vlgmr.msra.gmra.mrb[24].mxu1 %vm1082_vm2, %v2213_v25  ;;  %6076 = vmatprep.subr.mxu0 %v6971_v12 }
 0x479   : > { %6072 = vmatpush3.xpose.msk.msra.mxu1 %vm1082_vm2, %v2369_v26  ;;  %6073 = vmatprep.mubr.msk.f32.mxu1 %vm6970_vm1, %v6971_v12 }
 0x47a   : > { %6069 = vmatmul.mubr.msk.f32.vlgmr.msra.gmra.mrb[28].mxu0 %vm1082_vm2, %v2049_v2  ;;  %6081 = vmatprep.subr.mxu1 %v6971_v12 }
 0x47b   : > { %6077 = vmatpush3.xpose.msk.msra.mxu0 %vm1082_vm2, %v2443_v4  ;;  %6078 = vmatprep.mubr.msk.f32.mxu0 %vm6970_vm1, %v6971_v12 }
 0x47c   : > { %6074 = vmatmul.mubr.msk.f32.vlgmr.msra.gmra.mrb[26].mxu1 %vm1082_vm2, %v2131_v1  ;;  %6086 = vmatprep.subr.mxu0 %v6971_v12 }
 0x47d   : > { %6082 = vmatpush3.msra.mxu1 %v2578_v51  ;;  %6083 = vmatprep.mubr.msk.f32.mxu1 %vm6970_vm1, %v6971_v12 }
 0x47e   : > { %6079 = vmatmul.mubr.msk.f32.vlgmr.msra.gmra.mrb[30].mxu0 %vm1082_vm2, %v2213_v25  ;;  %6091 = vmatprep.subr.mxu1 %v6971_v12 }
 0x47f   : > { %6088 = vmatprep.mubr.msk.f32.mxu0 %vm6970_vm1, %v6971_v12 }
 0x538   : > { %v7658_v58 = vpop.f32.mrb[22].mxu0 }
 0x539   : > { %v6030_v15 = vpop.f32.mrb[23].mxu0 }
 0x53a   : > { %v7660_v27 = vpop.f32.mrb[20].mxu1 }
 0x53b   : > { %v6037_v29 = vpop.f32.mrb[21].mxu1 }
 0x53c   : > { %v7662_v33 = vpop.f32.mrb[24].mxu0 }
 0x53d   : > { %v6044_v34 = vpop.f32.mrb[25].mxu0 }
 0x543   : > { %v2126_v35 = vpop.f32.mrb[22].mxu1 }
 0x544   : > { %v6051_v38 = vpop.f32.mrb[23].mxu1  ;;  %v2516_v39 = vsel %vm1539_vm4, %v2126_v35, -inf }
 0x545   : > { %2517 = vmax.xlane.f32.xlu1 %v2516_v39 }
 0x549   : > { %v2208_v42 = vpop.f32.mrb[26].mxu0 }
 0x54a   : > { %v6058_v43 = vpop.f32.mrb[27].mxu0  ;;  %v2519_v47 = vsel %vm1539_vm4, %v2208_v42, -inf }
 0x54b   : > { %v2290_v48 = vpop.f32.mrb[24].mxu1  ;;  %2520 = vmax.xlane.f32.xlu0 %v2519_v47 }
 0x54c   : > { %v6065_v53 = vpop.f32.mrb[25].mxu1  ;;  %v2522_v9 = vsel %vm1539_vm4, %v2290_v48, -inf }
 0x54d   : > { %v2364_v54 = vpop.f32.mrb[28].mxu0 }
 0x54e   : > { %v6070_v59 = vpop.f32.mrb[29].mxu0  ;;  %v2525_v16 = vsel %vm1082_vm2, %v2364_v54, -inf }
 0x54f   : > { %v2438_v30 = vpop.f32.mrb[26].mxu1  ;;  %2523 = vmax.xlane.f32.xlu0 %v2522_v9 }
 0x550   : > { %v6075_v11 = vpop.f32.mrb[27].mxu1  ;;  %v2528_v13 = vsel %vm1082_vm2, %v2438_v30, -inf }
 0x551   : > { %2529 = vmax.xlane.f32.xlu1 %v2528_v13  ;;  %v2512_v31 = vpop.f32.mrb[30].mxu0 }
 0x552   : > { %v6080_v40 = vpop.f32.mrb[31].mxu0  ;;  %v2531_v19 = vsel %vm1082_vm2, %v2512_v31, -inf }
 0x553   : > { %2526 = vmax.xlane.f32.xlu0 %v2525_v16 }
 0x557   : > { %2532 = vmax.xlane.f32.xlu0 %v2531_v19 }
 0x562   : > { %2731 = vrot.lane.b32.xlu1 %v7546_v10, %s6972_s21 }
 0x566   : > { %6574 = vrot.lane.b32.xlu1 %v7497_v60, %s6972_s21 }
 0x56a   : > { %6579 = vrot.lane.b32.xlu1 %v7520_v63, %s6972_s21 }
 0x56d   : > { %2654 = vrot.lane.b32.xlu0 %v7542_v23, %s6972_s21 }
 0x571   : > { %6584 = vrot.lane.b32.xlu0 %v7534_v6, %s6972_s21 }
 0x58e   : > { %1580 = vadd.xlane.f32.xlu1 %v1579_v20 }
 0x590   : > { %1589 = vadd.xlane.f32.xlu0 %v1588_v62 }
 0x592   : > { %1583 = vadd.xlane.f32.xlu1 %v1582_v55 }
 0x594   : > { %1592 = vadd.xlane.f32.xlu0 %v1591_v61 }
 0x596   : > { %1586 = vadd.xlane.f32.xlu1 %v1585_v21 }
 0x598   : > { %1595 = vadd.xlane.f32.xlu0 %v1594_v22 }
 0x5a7   : > { %6589 = vrot.lane.b32.xlu1 %v7448_v32, %s6973_s29 }
 0x5d2   : > { %v2518_v2 = vpop.xlane.xlu1 %2517 }
 0x5d8   : > { %v2521_v17 = vpop.xlane.xlu0 %2520 }
 0x5dc   : > { %v2524_v0 = vpop.xlane.xlu0 %2523 }
 0x5de   : > { %v2530_v3 = vpop.xlane.xlu1 %2529 }
 0x5df   : > { %v2535_v7 = vmax.f32 %v2521_v17, %v2530_v3 }
 0x5e0   : > { %v2527_v50 = vpop.xlane.xlu0 %2526 }
 0x5e1   : > { %v2547_v18 = vsub.f32 %v2438_v30, %v2535_v7  ;;  %v2534_v1 = vmax.f32 %v2518_v2, %v2527_v50  ;;  %v2538_v24 = vsub.f32 %v2208_v42, %v2535_v7  ;;  %v2047_v2 = vld [vmem:[#allocation10] sm:$0xff] }
 0x5e2   : > { %v2732_v41 = vpop.permute.xlu1 %2731 }
 0x5e3   : > { %v2551_v57 = vmul.f32 1.442695, %v2547_v18  ;;  %v2537_v25 = vsub.f32 %v2126_v35, %v2534_v1  ;;  %v2546_v26 = vsub.f32 %v2364_v54, %v2534_v1  ;;  %v2542_v29 = vmul.f32 1.442695, %v2538_v24 }
 0x5e4   : > { %v2533_v4 = vpop.xlane.xlu0 %2532 }
 0x5e5   : > { %v2540_v14 = vmul.f32 1.442695, %v2537_v25  ;;  %v2549_v51 = vmul.f32 1.442695, %v2546_v26  ;;  %v2536_v15 = vmax.f32 %v2524_v0, %v2533_v4  ;;  %6678 = vpow2.f32 %v2551_v57 }
 0x5e6   : > { %v6575_v34 = vpop.permute.xlu1 %6574 }
 0x5e7   : > { %6680 = vpow2.f32 %v2540_v14  ;;  %v2539_v38 = vsub.f32 %v2290_v48, %v2536_v15  ;;  %v2548_v39 = vsub.f32 %v2512_v31, %v2536_v15  ;;  %v6577_v11 = vunpack.i.h.bf16 %v6575_v34 }
 0x5e8   : > { %6682 = vpow2.f32 %v2549_v51  ;;  %v2655_v43 = vpop.permute.xlu0 %2654  ;;  %v6576_v13 = vunpack.i.l.bf16 %v6575_v34 }
 0x5e9   : > { %v2544_v47 = vmul.f32 1.442695, %v2539_v38  ;;  %6087 = vmatpush3.msra.mxu0 %v2655_v43  ;;  %6684 = vpow2.f32 %v2542_v29  ;;  %v2553_v42 = vmul.f32 1.442695, %v2548_v39 }
 0x5ea   : > { %v6580_v53 = vpop.permute.xlu1 %6579  ;;  %6375 = vmatprep.subr.bf16.mxu0 %v6969_v5  ;;  %v6373_v55 = vpack.c.bf16 %v6577_v11, %v6576_v13 }
 0x5eb   : > { %6686 = vpow2.f32 %v2544_v47  ;;  %v6582_v35 = vunpack.i.h.bf16 %v6580_v53  ;;  %v6581_v54 = vunpack.i.l.bf16 %v6580_v53 }
 0x5ec   : > { %6688 = vpow2.f32 %v2553_v42  ;;  %v6585_v40 = vpop.permute.xlu0 %6584 }
 0x5ed   : > { %v6376_v59 = vpack.c.bf16 %v6582_v35, %v6581_v54  ;;  %v6587_v61 = vunpack.i.h.bf16 %v6585_v40  ;;  %v6586_v21 = vunpack.i.l.bf16 %v6585_v40 }
 0x5ef   : > { %v6679_v9 = vpop.eup %6678  ;;  %v6379_v0 = vpack.c.bf16 %v6587_v61, %v6586_v21 }
 0x5f0   : > { %6089 = vmatmul.mubr.msk.f32.vlgmr.msra.gmra.mrb[32].mxu0 %vm1082_vm2, %v6679_v9  ;;  %v2567_v3 = vsel %vm1082_vm2, %v6679_v9, 0.0 }
 0x5f1   : > { %v6681_v30 = vpop.eup %6680  ;;  %6377 = vmatpush3.bf16.msra.mxu0 %v6376_v59  ;;  %6107 = vmatprep.mubr.msk.f32.mxu0 %vm6970_vm1, %v6971_v12 }
 0x5f2   : > { %v6683_v48 = vpop.eup %6682  ;;  %v2555_v31 = vsel %vm1539_vm4, %v6681_v30, 0.0  ;;  %6128 = vmatprep.subr.mxu0 %v6971_v12 }
 0x5f3   : > { %6084 = vmatmul.mubr.msk.f32.vlgmr.msra.gmra.mrb[28].mxu1 %vm1082_vm2, %v6683_v48  ;;  %2556 = vadd.xlane.f32.xlu1 %v2555_v31  ;;  %v2564_v16 = vsel %vm1082_vm2, %v6683_v48, 0.0  ;;  %v6685_v19 = vpop.eup %6684 }
 0x5f4   : > { %6092 = vmatpush3.msra.mxu1 %v2732_v41  ;;  %2565 = vadd.xlane.f32.xlu0 %v2564_v16  ;;  %v2558_v17 = vsel %vm1539_vm4, %v6685_v19, 0.0 }
 0x5f5   : > { %v6687_v20 = vpop.eup %6686  ;;  %6093 = vmatprep.mubr.msk.f32.mxu1 %vm6970_vm1, %v6971_v12  ;;  %6372 = vmatprep.subr.bf16.mxu1 %v6969_v5 }
 0x5f6   : > { %v6689_v62 = vpop.eup %6688  ;;  %v2561_v22 = vsel %vm1539_vm4, %v6687_v20, 0.0 }
 0x5f7   : > { %6094 = vmatmul.mubr.msk.f32.vlgmr.msra.gmra.mrb[30].mxu1 %vm1082_vm2, %v6689_v62  ;;  %2562 = vadd.xlane.f32.xlu1 %v2561_v22  ;;  %v2570_v7 = vsel %vm1082_vm2, %v6689_v62, 0.0 }
 0x5f8   : > { %6374 = vmatpush3.bf16.msra.mxu1 %v6373_v55  ;;  %2559 = vadd.xlane.f32.xlu0 %v2558_v17 }
 0x5f9   : > { %6108 = vmatmul.mubr.msk.f32.vlgmr.msra.gmra.mrb[32].mxu0 %vm1539_vm4, %v6685_v19  ;;  %6100 = vmatprep.mubr.msk.f32.mxu1 %vm6970_vm1, %v6971_v12 }
 0x5fa   : > { %6378 = vmatprep.subr.bf16.mxu1 %v6969_v5  ;;  %6129 = vmatpush3.msra.mxu0 %v2047_v2 }
 0x5fb   : > { %6101 = vmatmul.mubr.msk.f32.vlgmr.msra.gmra.mrb[28].mxu1 %vm1539_vm4, %v6681_v30  ;;  %6130 = vmatprep.mubr.msk.f32.mxu0 %vm6970_vm1, %v6971_v12 }
 0x5fc   : > { %6380 = vmatpush3.bf16.msra.mxu1 %v6379_v0  ;;  %2568 = vadd.xlane.f32.xlu0 %v2567_v3 }
 0x5fd   : > { %6114 = vmatprep.mubr.msk.f32.mxu1 %vm6970_vm1, %v6971_v12  ;;  %6389 = vmatprep.subr.bf16.mxu0 %v6969_v5 }
 0x5fe   : > { %6117 = vmatprep.subr.mxu1 %v6971_v12 }
 0x5ff   : > { %6115 = vmatmul.mubr.msk.f32.vlgmr.msra.gmra.mrb[30].mxu1 %vm1539_vm4, %v6687_v20 }
 0x600   : > { %2571 = vadd.xlane.f32.xlu0 %v2570_v7  ;;  %6119 = vmatprep.mubr.msk.f32.mxu1 %vm6970_vm1, %v6971_v12 }
 0x608   : > { %3238 = vrot.lane.b32.xlu1 %v7455_v37, %s6973_s29 }
 0x60c   : > { %6599 = vrot.lane.b32.xlu1 %v7457_v44, %s6973_s29 }
 0x610   : > { %3320 = vrot.lane.b32.xlu1 %v7461_v45, %s6973_s29 }
 0x614   : > { %3402 = vrot.lane.b32.xlu1 %v7473_v49, %s6973_s29 }
 0x616   : > { %6594 = vrot.lane.b32.xlu0 %v7453_v36, %s6973_s29 }
 0x618   : > { %3632 = vrot.lane.b32.xlu1 %v7483_v56, %s6973_s29 }
 0x61a   : > { %3484 = vrot.lane.b32.xlu0 %v7463_v46, %s6973_s29 }
 0x61b   : > { %v1581_v50 = vpop.xlane.xlu1 %1580 }
 0x61d   : > { %v1590_v18 = vpop.xlane.xlu0 %1589 }
 0x61e   : > { %3558 = vrot.lane.b32.xlu0 %v7475_v52, %s6973_s29  ;;  %v1597_v1 = vadd.f32 %v1590_v18, %v1581_v50 }
 0x61f   : > { %v1584_v24 = vpop.xlane.xlu1 %1583 }
 0x620   : > { %6690 = vrcp.f32 %v1597_v1 }
 0x621   : > { %v1593_v41 = vpop.xlane.xlu0 %1592 }
 0x622   : > { %v1598_v57 = vadd.f32 %v1593_v41, %v1584_v24 }
 0x623   : > { %v1587_v25 = vpop.xlane.xlu1 %1586 }
 0x624   : > { %6692 = vrcp.f32 %v1598_v57 }
 0x625   : > { %v1596_v26 = vpop.xlane.xlu0 %1595 }
 0x626   : > { %v1599_v4 = vadd.f32 %v1596_v26, %v1587_v25 }
 0x627   : > { %v6590_v39 = vpop.permute.xlu1 %6589 }
 0x628   : > { %6694 = vrcp.f32 %v1599_v4  ;;  %v6592_v19 = vunpack.i.h.bf16 %v6590_v39  ;;  %v6591_v20 = vunpack.i.l.bf16 %v6590_v39 }
 0x62a   : > { %v6691_v14 = vpop.eup %6690  ;;  %v6382_v2 = vpack.c.bf16 %v6592_v19, %v6591_v20 }
 0x62b   : > { %v2044_v51 = vmul.f32 %v6691_v14, %v7658_v58  ;;  %v3059_v58 = vld [vmem:[#allocation10 + $0x8] sm:$0xff] }
 0x62c   : > { %6118 = vmatpush3.msra.mxu1 %v3059_v58 }
 0x62d   : > { %6131 = vmatmul.mubr.msk.f32.vlgmr.msra.gmra.mrb[34].mxu0 %vm1082_vm2, %v2044_v51  ;;  %6381 = vmatprep.subr.bf16.mxu1 %v6969_v5 }
 0x62e   : > { %v6693_v15 = vpop.eup %6692  ;;  %6133 = vmatprep.mubr.msk.f32.mxu0 %vm6970_vm1, %v6971_v12 }
 0x62f   : > { %v2045_v29 = vmul.f32 %v6693_v15, %v7660_v27 }
 0x631   : > { %6134 = vmatmul.mubr.msk.f32.gmra.mrb[36].mxu0 %vm1082_vm2, %v2045_v29 }
 0x632   : > { %v6695_v34 = vpop.eup %6694  ;;  %6136 = vmatprep.mubr.msk.f32.mxu0 %vm6970_vm1, %v6971_v12 }
 0x633   : > { %v2046_v38 = vmul.f32 %v6695_v34, %v7662_v33 }
 0x635   : > { %6137 = vmatmul.mubr.msk.f32.gmra.mrb[38].mxu0 %vm1082_vm2, %v2046_v38 }
 0x636   : > { %6157 = vmatprep.mubr.msk.f32.mxu0 %vm6970_vm1, %v6971_v12 }
 0x680   : > { %v2557_v43 = vpop.xlane.xlu1 %2556 }
 0x681   : > { %v2566_v30 = vpop.xlane.xlu0 %2565 }
 0x682   : > { %v2573_v13 = vadd.f32 %v2566_v30, %v2557_v43 }
 0x684   : > { %v2563_v27 = vpop.xlane.xlu1 %2562  ;;  %6696 = vrcp.f32 %v2573_v13 }
 0x685   : > { %v2560_v48 = vpop.xlane.xlu0 %2559 }
 0x688   : > { %v7753_v47 = vpop.permute.xlu1 %3238 }
 0x689   : > { %v2569_v11 = vpop.xlane.xlu0 %2568 }
 0x68a   : > { %v2574_v40 = vadd.f32 %v2569_v11, %v2560_v48 }
 0x68c   : > { %v6600_v42 = vpop.permute.xlu1 %6599  ;;  %6698 = vrcp.f32 %v2574_v40 }
 0x68d   : > { %v6602_v53 = vunpack.i.h.bf16 %v6600_v42  ;;  %v6601_v35 = vunpack.i.l.bf16 %v6600_v42  ;;  %v2572_v31 = vpop.xlane.xlu0 %2571 }
 0x68e   : > { %v2575_v16 = vadd.f32 %v2572_v31, %v2563_v27  ;;  %v6697_v61 = vpop.eup %6696 }
 0x68f   : > { %v6390_v54 = vpack.c.bf16 %v6602_v53, %v6601_v35 }
 0x690   : > { %v3321_v59 = vpop.permute.xlu1 %3320  ;;  %6700 = vrcp.f32 %v2575_v16 }
 0x691   : > { %6392 = vmatpush3.bf16.xpose.msk.msra.mxu0 %vm7444_vm3, %v6390_v54  ;;  %v6595_v24 = vpop.permute.xlu0 %6594 }
 0x692   : > { %6170 = vmatprep.subr.mxu0 %v6971_v12  ;;  %v6597_v41 = vunpack.i.h.bf16 %v6595_v24  ;;  %v6596_v57 = vunpack.i.l.bf16 %v6595_v24 }
 0x694   : > { %v3403_v33 = vpop.permute.xlu1 %3402  ;;  %v6386_v25 = vpack.c.bf16 %v6597_v41, %v6596_v57 }
 0x695   : > { %v3485_v26 = vpop.permute.xlu0 %3484 }
 0x696   : > { %v6699_v0 = vpop.eup %6698 }
 0x698   : > { %v3633_v9 = vpop.permute.xlu1 %3632  ;;  %6158 = vmatmul.mubr.msk.f32.vlgmr.msra.gmra.mrb[40].mxu0 %vm1082_vm2, %v3403_v33 }
 0x699   : > { %6171 = vmatpush3.xpose.msk.msra.mxu0 %vm1082_vm2, %v3633_v9  ;;  %6172 = vmatprep.mubr.msk.f32.mxu0 %vm6970_vm1, %v6971_v12  ;;  %v3559_v4 = vpop.permute.xlu0 %3558 }
 0x69a   : > { %6180 = vmatprep.subr.mxu0 %v6971_v12  ;;  %v6701_v3 = vpop.eup %6700 }
 0x69c   : > { %6173 = vmatmul.mubr.msk.f32.vlgmr.msra.gmra.mrb[42].mxu0 %vm1082_vm2, %v3403_v33 }
 0x69d   : > { %6182 = vmatprep.mubr.msk.f32.mxu0 %vm6970_vm1, %v6971_v12 }
 0x6cc   : > { %v2965_v62 = vpop.f32.mrb[32].mxu0 }
 0x6cd   : > { %v6109_v55 = vpop.f32.mrb[33].mxu0  ;;  %v3057_v50 = vmul.f32 %v6699_v0, %v2965_v62 }
 0x6ce   : > { %v2884_v21 = vpop.f32.mrb[28].mxu1 }
 0x6cf   : > { %v3056_v22 = vmul.f32 %v6697_v61, %v2884_v21  ;;  %v6102_v17 = vpop.f32.mrb[29].mxu1 }
 0x6d1   : > { %6120 = vmatmul.mubr.msk.f32.vlgmr.msra.gmra.mrb[32].mxu1 %vm1082_vm2, %v3056_v22 }
 0x6d2   : > { %6384 = vmatpush3.bf16.xpose.msk.msra.mxu1 %vm7444_vm3, %v6382_v2  ;;  %v3046_v7 = vpop.f32.mrb[30].mxu1  ;;  %6122 = vmatprep.mubr.msk.f32.mxu1 %vm6970_vm1, %v6971_v12 }
 0x6d3   : > { %v3058_v18 = vmul.f32 %v6701_v3, %v3046_v7  ;;  %v6116_v1 = vpop.f32.mrb[31].mxu1  ;;  %6385 = vmatprep.subr.bf16.mxu1 %v6969_v5 }
 0x6d5   : > { %6123 = vmatmul.mubr.msk.f32.gmra.mrb[34].mxu1 %vm1082_vm2, %v3057_v50 }
 0x6d6   : > { %6125 = vmatprep.mubr.msk.f32.mxu1 %vm6970_vm1, %v6971_v12 }
 0x6d9   : > { %6126 = vmatmul.mubr.msk.f32.gmra.mrb[36].mxu1 %vm1082_vm2, %v3058_v18 }
 0x6da   : > { %6143 = vmatprep.mubr.msk.f32.mxu1 %vm6970_vm1, %v6971_v12 }
 0x6dd   : > { %6144 = vmatmul.mubr.msk.f32.vlgmr.msra.gmra.mrb[38].mxu1 %vm1082_vm2, %v7753_v47 }
 0x6de   : > { %6388 = vmatpush3.bf16.xpose.msk.msra.mxu1 %vm7444_vm3, %v6386_v25  ;;  %6150 = vmatprep.mubr.msk.f32.mxu1 %vm6970_vm1, %v6971_v12 }
 0x6df   : > { %6160 = vmatprep.subr.mxu1 %v6971_v12 }
 0x6e5   : > { %6151 = vmatmul.mubr.msk.f32.vlgmr.msra.gmra.mrb[40].mxu1 %vm1082_vm2, %v3321_v59 }
 0x6e6   : > { %6161 = vmatpush3.xpose.msk.msra.mxu1 %vm1082_vm2, %v3485_v26  ;;  %6162 = vmatprep.mubr.msk.f32.mxu1 %vm6970_vm1, %v6971_v12 }
 0x6e7   : > { %6165 = vmatprep.subr.mxu1 %v6971_v12 }
 0x6e9   : > { %6163 = vmatmul.mubr.msk.f32.vlgmr.msra.gmra.mrb[42].mxu1 %vm1082_vm2, %v7753_v47 }
 0x6ea   : > { %6166 = vmatpush3.xpose.msk.msra.mxu1 %vm1082_vm2, %v3559_v4  ;;  %6167 = vmatprep.mubr.msk.f32.mxu1 %vm6970_vm1, %v6971_v12 }
 0x6eb   : > { %6175 = vmatprep.subr.mxu1 %v6971_v12 }
 0x6ed   : > { %6168 = vmatmul.mubr.msk.f32.vlgmr.msra.gmra.mrb[44].mxu1 %vm1082_vm2, %v3321_v59 }
 0x6ee   : > { %6177 = vmatprep.mubr.msk.f32.mxu1 %vm6970_vm1, %v6971_v12 }
 0x76b   : > { %v3480_v14 = vpop.f32.mrb[40].mxu0 }
 0x76c   : > { %v6159_v51 = vpop.f32.mrb[41].mxu0  ;;  %v3712_v15 = vsel %vm1539_vm4, %v3480_v14, -inf }
 0x76d   : > { %3713 = vmax.xlane.f32.xlu0 %v3712_v15 }
 0x76f   : > { %v3702_v29 = vpop.f32.mrb[42].mxu0 }
 0x770   : > { %v6174_v34 = vpop.f32.mrb[43].mxu0  ;;  %v3721_v38 = vsel %vm1082_vm2, %v3702_v29, -inf }
 0x771   : > { %3722 = vmax.xlane.f32.xlu1 %v3721_v38 }
 0x7a4   : > { %v7801_v58 = vpop.f32.mrb[32].mxu1 }
 0x7a5   : > { %v6121_v39 = vpop.f32.mrb[33].mxu1 }
 0x7a8   : > { %v7803_v43 = vpop.f32.mrb[34].mxu1 }
 0x7a9   : > { %v6124_v27 = vpop.f32.mrb[35].mxu1 }
 0x7ac   : > { %v7805_v47 = vpop.f32.mrb[36].mxu1 }
 0x7ad   : > { %v6127_v42 = vpop.f32.mrb[37].mxu1 }
 0x7b0   : > { %v3316_v53 = vpop.f32.mrb[38].mxu1 }
 0x7b1   : > { %v6145_v35 = vpop.f32.mrb[39].mxu1  ;;  %v3706_v54 = vsel %vm1539_vm4, %v3316_v53, -inf }
 0x7b2   : > { %3707 = vmax.xlane.f32.xlu0 %v3706_v54 }
 0x7b8   : > { %v3398_v59 = vpop.f32.mrb[40].mxu1 }
 0x7b9   : > { %v6152_v33 = vpop.f32.mrb[41].mxu1  ;;  %v3709_v9 = vsel %vm1539_vm4, %v3398_v59, -inf }
 0x7ba   : > { %3710 = vmax.xlane.f32.xlu0 %v3709_v9 }
 0x7bc   : > { %v3554_v30 = vpop.f32.mrb[42].mxu1 }
 0x7bd   : > { %v6164_v48 = vpop.f32.mrb[43].mxu1  ;;  %v3715_v11 = vsel %vm1082_vm2, %v3554_v30, -inf }
 0x7be   : > { %3716 = vmax.xlane.f32.xlu1 %v3715_v11 }
 0x7c0   : > { %v3628_v13 = vpop.f32.mrb[44].mxu1 }
 0x7c1   : > { %v6169_v31 = vpop.f32.mrb[45].mxu1  ;;  %v3718_v40 = vsel %vm1082_vm2, %v3628_v13, -inf }
 0x7c2   : > { %3719 = vmax.xlane.f32.xlu0 %v3718_v40 }
 0x7cf   : > { %3842 = vrot.lane.b32.xlu1 %v7542_v23, %s6973_s29 }
 0x7d3   : > { %3918 = vrot.lane.b32.xlu1 %v7546_v10, %s6973_s29 }
 0x7d7   : > { %6604 = vrot.lane.b32.xlu1 %v7497_v60, %s6973_s29 }
 0x7d8   : > { %3766 = vrot.lane.b32.xlu0 %v7538_v8, %s6973_s29 }
 0x7db   : > { %6614 = vrot.lane.b32.xlu1 %v7534_v6, %s6973_s29 }
 0x7dc   : > { %6609 = vrot.lane.b32.xlu0 %v7520_v63, %s6973_s29 }
 0x7fa   : > { %v3714_v16 = vpop.xlane.xlu0 %3713 }
 0x7fe   : > { %v3723_v19 = vpop.xlane.xlu1 %3722 }
 0x7ff   : > { %v3726_v20 = vmax.f32 %v3714_v16, %v3723_v19 }
 0x801   : > { %v3729_v62 = vsub.f32 %v3480_v14, %v3726_v20  ;;  %v3738_v55 = vsub.f32 %v3702_v29, %v3726_v20 }
 0x803   : > { %v3734_v61 = vmul.f32 1.442695, %v3729_v62  ;;  %v3743_v21 = vmul.f32 1.442695, %v3738_v55 }
 0x805   : > { %6702 = vpow2.f32 %v3734_v61 }
 0x806   : > { %6704 = vpow2.f32 %v3743_v21 }
 0x80f   : > { %v7823_v22 = vpop.eup %6702 }
 0x810   : > { %v6705_v17 = vpop.eup %6704  ;;  %v3751_v2 = vsel %vm1539_vm4, %v7823_v22, 0.0 }
 0x811   : > { %v3760_v0 = vsel %vm1082_vm2, %v6705_v17, 0.0  ;;  %3752 = vadd.xlane.f32.xlu0 %v3751_v2 }
 0x812   : > { %3761 = vadd.xlane.f32.xlu1 %v3760_v0 }
 0x83f   : > { %v3708_v3 = vpop.xlane.xlu0 %3707 }
 0x847   : > { %v3711_v7 = vpop.xlane.xlu0 %3710 }
 0x84b   : > { %v3717_v50 = vpop.xlane.xlu1 %3716 }
 0x84c   : > { %v3724_v18 = vmax.f32 %v3708_v3, %v3717_v50 }
 0x84e   : > { %v3727_v1 = vsub.f32 %v3316_v53, %v3724_v18  ;;  %v3736_v24 = vsub.f32 %v3554_v30, %v3724_v18 }
 0x84f   : > { %v3720_v41 = vpop.xlane.xlu0 %3719  ;;  %v3843_v57 = vpop.permute.xlu1 %3842 }
 0x850   : > { %v3730_v25 = vmul.f32 1.442695, %v3727_v1  ;;  %v3739_v26 = vmul.f32 1.442695, %v3736_v24  ;;  %v3725_v4 = vmax.f32 %v3711_v7, %v3720_v41  ;;  %6181 = vmatpush3.msra.mxu0 %v3843_v57 }
 0x851   : > { %6396 = vmatprep.subr.bf16.mxu0 %v6969_v5 }
 0x852   : > { %6706 = vpow2.f32 %v3730_v25  ;;  %v3728_v14 = vsub.f32 %v3398_v59, %v3725_v4  ;;  %v3737_v51 = vsub.f32 %v3628_v13, %v3725_v4 }
 0x853   : > { %6708 = vpow2.f32 %v3739_v26  ;;  %v3767_v15 = vpop.permute.xlu0 %3766  ;;  %v3919_v29 = vpop.permute.xlu1 %3918 }
 0x854   : > { %v3732_v34 = vmul.f32 1.442695, %v3728_v14  ;;  %v3741_v38 = vmul.f32 1.442695, %v3737_v51  ;;  %6176 = vmatpush3.msra.mxu1 %v3767_v15 }
 0x855   : > { %6185 = vmatprep.subr.mxu1 %v6971_v12 }
 0x856   : > { %6710 = vpow2.f32 %v3732_v34 }
 0x857   : > { %6712 = vpow2.f32 %v3741_v38  ;;  %v6605_v39 = vpop.permute.xlu1 %6604  ;;  %v6610_v27 = vpop.permute.xlu0 %6609 }
 0x858   : > { %v6612_v53 = vunpack.i.h.bf16 %v6610_v27  ;;  %v6611_v35 = vunpack.i.l.bf16 %v6610_v27  ;;  %v6607_v33 = vunpack.i.h.bf16 %v6605_v39  ;;  %v6606_v9 = vunpack.i.l.bf16 %v6605_v39 }
 0x85a   : > { %v6397_v13 = vpack.c.bf16 %v6612_v53, %v6611_v35  ;;  %v6394_v40 = vpack.c.bf16 %v6607_v33, %v6606_v9 }
 0x85b   : > { %v6615_v30 = vpop.permute.xlu1 %6614 }
 0x85c   : > { %v6707_v42 = vpop.eup %6706  ;;  %v6617_v16 = vunpack.i.h.bf16 %v6615_v30  ;;  %v6616_v19 = vunpack.i.l.bf16 %v6615_v30 }
 0x85d   : > { %v6709_v54 = vpop.eup %6708  ;;  %v3745_v59 = vsel %vm1539_vm4, %v6707_v42, 0.0 }
 0x85e   : > { %6178 = vmatmul.mubr.msk.f32.vlgmr.msra.gmra.mrb[46].mxu1 %vm1082_vm2, %v6709_v54  ;;  %v3754_v48 = vsel %vm1082_vm2, %v6709_v54, 0.0  ;;  %3746 = vadd.xlane.f32.xlu0 %v3745_v59  ;;  %v6400_v62 = vpack.c.bf16 %v6617_v16, %v6616_v19 }
 0x85f   : > { %6186 = vmatpush3.msra.mxu1 %v3919_v29  ;;  %3755 = vadd.xlane.f32.xlu1 %v3754_v48 }
 0x860   : > { %v6711_v11 = vpop.eup %6710  ;;  %6187 = vmatprep.mubr.msk.f32.mxu1 %vm6970_vm1, %v6971_v12  ;;  %6393 = vmatprep.subr.bf16.mxu1 %v6969_v5 }
 0x861   : > { %v6713_v31 = vpop.eup %6712  ;;  %v3748_v20 = vsel %vm1539_vm4, %v6711_v11, 0.0 }
 0x862   : > { %6183 = vmatmul.mubr.msk.f32.vlgmr.msra.gmra.mrb[44].mxu0 %vm1082_vm2, %v6713_v31  ;;  %6188 = vmatmul.mubr.msk.f32.vlgmr.msra.gmra.mrb[48].mxu1 %vm1082_vm2, %v6705_v17  ;;  %v3757_v55 = vsel %vm1082_vm2, %v6713_v31, 0.0 }
 0x863   : > { %6395 = vmatpush3.bf16.msra.mxu1 %v6394_v40  ;;  %6398 = vmatpush3.bf16.msra.mxu0 %v6397_v13 }
 0x864   : > { %3749 = vadd.xlane.f32.xlu0 %v3748_v20  ;;  %6194 = vmatprep.mubr.msk.f32.mxu1 %vm6970_vm1, %v6971_v12 }
 0x865   : > { %6399 = vmatprep.subr.bf16.mxu1 %v6969_v5  ;;  %6201 = vmatprep.mubr.msk.f32.mxu0 %vm6970_vm1, %v6971_v12 }
 0x866   : > { %6195 = vmatmul.mubr.msk.f32.vlgmr.msra.gmra.mrb[46].mxu1 %vm1539_vm4, %v6707_v42  ;;  %6211 = vmatprep.subr.mxu0 %v6971_v12 }
 0x867   : > { %6401 = vmatpush3.bf16.msra.mxu1 %v6400_v62  ;;  %6208 = vmatprep.mubr.msk.f32.mxu1 %vm6970_vm1, %v6971_v12 }
 0x868   : > { %3758 = vadd.xlane.f32.xlu0 %v3757_v55  ;;  %6402 = vmatprep.subr.bf16.mxu1 %v6969_v5 }
 0x86a   : > { %6202 = vmatmul.mubr.msk.f32.vlgmr.msra.gmra.mrb[44].mxu0 %vm1539_vm4, %v6711_v11  ;;  %6209 = vmatmul.mubr.msk.f32.vlgmr.msra.gmra.mrb[48].mxu1 %vm1539_vm4, %v7823_v22 }
 0x86b   : > { %6226 = vmatprep.mubr.msk.f32.mxu1 %vm6970_vm1, %v6971_v12  ;;  %6213 = vmatprep.mubr.msk.f32.mxu0 %vm6970_vm1, %v6971_v12 }
 0x870   : > { %6624 = vrot.lane.b32.xlu1 %v7453_v36, %s6974_s22  ;;  %v4240_v36 = vld [vmem:[#allocation10 + $0x10] sm:$0xff] }
 0x871   : > { %6212 = vmatpush3.msra.mxu0 %v4240_v36 }
 0x872   : > { %6406 = vmatprep.subr.bf16.mxu0 %v6969_v5 }
 0x874   : > { %6629 = vrot.lane.b32.xlu1 %v7457_v44, %s6974_s22 }
 0x878   : > { %4333 = vrot.lane.b32.xlu1 %v7455_v37, %s6974_s22 }
 0x87c   : > { %4579 = vrot.lane.b32.xlu1 %v7463_v46, %s6974_s22 }
 0x87e   : > { %6619 = vrot.lane.b32.xlu0 %v7448_v32, %s6974_s22 }
 0x880   : > { %4653 = vrot.lane.b32.xlu1 %v7475_v52, %s6974_s22 }
 0x882   : > { %4415 = vrot.lane.b32.xlu0 %v7461_v45, %s6974_s22 }
 0x886   : > { %4497 = vrot.lane.b32.xlu0 %v7473_v49, %s6974_s22 }
 0x88a   : > { %4727 = vrot.lane.b32.xlu0 %v7483_v56, %s6974_s22 }
 0x89e   : > { %v3753_v37 = vpop.xlane.xlu0 %3752 }
 0x89f   : > { %v3762_v46 = vpop.xlane.xlu1 %3761 }
 0x8a0   : > { %v3765_v41 = vadd.f32 %v3762_v46, %v3753_v37 }
 0x8eb   : > { %v3747_v44 = vpop.xlane.xlu0 %3746 }
 0x8ec   : > { %v3756_v32 = vpop.xlane.xlu1 %3755 }
 0x8ed   : > { %v3763_v24 = vadd.f32 %v3756_v32, %v3747_v44 }
 0x8ef   : > { %6714 = vrcp.f32 %v3763_v24 }
 0x8f0   : > { %v6625_v52 = vpop.permute.xlu1 %6624  ;;  %6716 = vrcp.f32 %v3765_v41 }
 0x8f1   : > { %v3750_v61 = vpop.xlane.xlu0 %3749  ;;  %v6627_v25 = vunpack.i.h.bf16 %v6625_v52  ;;  %v6626_v26 = vunpack.i.l.bf16 %v6625_v52 }
 0x8f3   : > { %v6407_v29 = vpack.c.bf16 %v6627_v25, %v6626_v26 }
 0x8f4   : > { %v6630_v0 = vpop.permute.xlu1 %6629 }
 0x8f5   : > { %v3759_v21 = vpop.xlane.xlu0 %3758  ;;  %v6632_v49 = vunpack.i.h.bf16 %v6630_v0  ;;  %v6631_v56 = vunpack.i.l.bf16 %v6630_v0 }
 0x8f6   : > { %v3764_v57 = vadd.f32 %v3759_v21, %v3750_v61 }
 0x8f7   : > { %v6411_v7 = vpack.c.bf16 %v6632_v49, %v6631_v56 }
 0x8f8   : > { %v4334_v50 = vpop.permute.xlu1 %4333  ;;  %6718 = vrcp.f32 %v3764_v57 }
 0x8f9   : > { %v6620_v22 = vpop.permute.xlu0 %6619  ;;  %v6715_v4 = vpop.eup %6714 }
 0x8fa   : > { %v6622_v17 = vunpack.i.h.bf16 %v6620_v22  ;;  %v6621_v45 = vunpack.i.l.bf16 %v6620_v22  ;;  %v6717_v34 = vpop.eup %6716 }
 0x8fc   : > { %v6403_v2 = vpack.c.bf16 %v6622_v17, %v6621_v45  ;;  %v4580_v28 = vpop.permute.xlu1 %4579 }
 0x8fd   : > { %v4416_v3 = vpop.permute.xlu0 %4415 }
 0x8fe   : > { %6405 = vmatpush3.bf16.xpose.msk.msra.mxu1 %vm7444_vm3, %v6403_v2 }
 0x8ff   : > { %6410 = vmatprep.subr.bf16.mxu1 %v6969_v5 }
 0x900   : > { %v4654_v33 = vpop.permute.xlu1 %4653 }
 0x901   : > { %v4498_v18 = vpop.permute.xlu0 %4497 }
 0x902   : > { %v6719_v38 = vpop.eup %6718 }
 0x905   : > { %6227 = vmatmul.mubr.msk.f32.vlgmr.msra.gmra.mrb[50].mxu1 %vm1082_vm2, %v4334_v50  ;;  %v4728_v1 = vpop.permute.xlu0 %4727 }
 0x906   : > { %6413 = vmatpush3.bf16.xpose.msk.msra.mxu1 %vm7444_vm3, %v6411_v7  ;;  %6240 = vmatprep.mubr.msk.f32.mxu1 %vm6970_vm1, %v6971_v12 }
 0x907   : > { %6253 = vmatprep.subr.mxu1 %v6971_v12 }
 0x90d   : > { %6241 = vmatmul.mubr.msk.f32.vlgmr.msra.gmra.mrb[52].mxu1 %vm1082_vm2, %v4498_v18 }
 0x90e   : > { %6254 = vmatpush3.xpose.msk.msra.mxu1 %vm1082_vm2, %v4728_v1  ;;  %6255 = vmatprep.mubr.msk.f32.mxu1 %vm6970_vm1, %v6971_v12 }
 0x90f   : > { %6263 = vmatprep.subr.mxu1 %v6971_v12 }
 0x911   : > { %6256 = vmatmul.mubr.msk.f32.vlgmr.msra.gmra.mrb[54].mxu1 %vm1082_vm2, %v4498_v18 }
 0x912   : > { %6265 = vmatprep.mubr.msk.f32.mxu1 %vm6970_vm1, %v6971_v12 }
 0x939   : > { %v4069_v14 = vpop.f32.mrb[46].mxu1 }
 0x93a   : > { %v4237_v51 = vmul.f32 %v6715_v4, %v4069_v14  ;;  %v6196_v15 = vpop.f32.mrb[47].mxu1 }
 0x93c   : > { %6214 = vmatmul.mubr.msk.f32.vlgmr.msra.gmra.mrb[34].mxu0 %vm1082_vm2, %v4237_v51 }
 0x93d   : > { %6409 = vmatpush3.bf16.xpose.msk.msra.mxu0 %vm7444_vm3, %v6407_v29  ;;  %v4148_v39 = vpop.f32.mrb[44].mxu0  ;;  %v4227_v27 = vpop.f32.mrb[48].mxu1  ;;  %6216 = vmatprep.mubr.msk.f32.mxu0 %vm6970_vm1, %v6971_v12 }
 0x93e   : > { %v4238_v42 = vmul.f32 %v6719_v38, %v4148_v39  ;;  %v4239_v53 = vmul.f32 %v6717_v34, %v4227_v27  ;;  %v6203_v35 = vpop.f32.mrb[45].mxu0  ;;  %v6210_v54 = vpop.f32.mrb[49].mxu1  ;;  %6243 = vmatprep.subr.mxu0 %v6971_v12 }
 0x940   : > { %6217 = vmatmul.mubr.msk.f32.gmra.mrb[36].mxu0 %vm1082_vm2, %v4238_v42 }
 0x941   : > { %6219 = vmatprep.mubr.msk.f32.mxu0 %vm6970_vm1, %v6971_v12 }
 0x944   : > { %6220 = vmatmul.mubr.msk.f32.gmra.mrb[38].mxu0 %vm1082_vm2, %v4239_v53 }
 0x945   : > { %6233 = vmatprep.mubr.msk.f32.mxu0 %vm6970_vm1, %v6971_v12 }
 0x948   : > { %6234 = vmatmul.mubr.msk.f32.vlgmr.msra.gmra.mrb[46].mxu0 %vm1082_vm2, %v4416_v3 }
 0x949   : > { %6244 = vmatpush3.xpose.msk.msra.mxu0 %vm1082_vm2, %v4580_v28  ;;  %6245 = vmatprep.mubr.msk.f32.mxu0 %vm6970_vm1, %v6971_v12 }
 0x94a   : > { %6248 = vmatprep.subr.mxu0 %v6971_v12 }
 0x94c   : > { %6246 = vmatmul.mubr.msk.f32.vlgmr.msra.gmra.mrb[48].mxu0 %vm1082_vm2, %v4334_v50 }
 0x94d   : > { %6249 = vmatpush3.xpose.msk.msra.mxu0 %vm1082_vm2, %v4654_v33  ;;  %6250 = vmatprep.mubr.msk.f32.mxu0 %vm6970_vm1, %v6971_v12 }
 0x94e   : > { %6258 = vmatprep.subr.mxu0 %v6971_v12 }
 0x950   : > { %6251 = vmatmul.mubr.msk.f32.vlgmr.msra.gmra.mrb[50].mxu0 %vm1082_vm2, %v4416_v3 }
 0x951   : > { %6260 = vmatprep.mubr.msk.f32.mxu0 %vm6970_vm1, %v6971_v12 }
 0x9d8   : > { %v4411_v9 = vpop.f32.mrb[50].mxu1 }
 0x9d9   : > { %v6228_v59 = vpop.f32.mrb[51].mxu1  ;;  %v4801_v30 = vsel %vm1539_vm4, %v4411_v9, -inf }
 0x9da   : > { %4802 = vmax.xlane.f32.xlu1 %v4801_v30 }
 0x9e0   : > { %v4575_v48 = vpop.f32.mrb[52].mxu1 }
 0x9e1   : > { %v6242_v11 = vpop.f32.mrb[53].mxu1  ;;  %v4807_v13 = vsel %vm1539_vm4, %v4575_v48, -inf }
 0x9e2   : > { %4808 = vmax.xlane.f32.xlu0 %v4807_v13 }
 0x9e4   : > { %v4797_v31 = vpop.f32.mrb[54].mxu1 }
 0x9e5   : > { %v6257_v40 = vpop.f32.mrb[55].mxu1 }
 0x9eb   : > { %4861 = vrot.lane.b32.xlu1 %v7538_v8, %s6974_s22  ;;  %v4816_v8 = vsel %vm1082_vm2, %v4797_v31, -inf }
 0x9ef   : > { %5013 = vrot.lane.b32.xlu1 %v7546_v10, %s6974_s22 }
 0x9f3   : > { %6634 = vrot.lane.b32.xlu1 %v7497_v60, %s6974_s22 }
 0xa1b   : > { %v4493_v16 = vpop.f32.mrb[46].mxu0 }
 0xa1c   : > { %v6235_v19 = vpop.f32.mrb[47].mxu0  ;;  %v4804_v20 = vsel %vm1539_vm4, %v4493_v16, -inf }
 0xa1d   : > { %4805 = vmax.xlane.f32.xlu0 %v4804_v20 }
 0xa1f   : > { %v4649_v62 = vpop.f32.mrb[48].mxu0 }
 0xa20   : > { %v6247_v55 = vpop.f32.mrb[49].mxu0  ;;  %v4810_v36 = vsel %vm1082_vm2, %v4649_v62, -inf }
 0xa21   : > { %4811 = vmax.xlane.f32.xlu0 %v4810_v36 }
 0xa23   : > { %v4723_v37 = vpop.f32.mrb[50].mxu0 }
 0xa24   : > { %v6252_v44 = vpop.f32.mrb[51].mxu0  ;;  %v4813_v46 = vsel %vm1082_vm2, %v4723_v37, -inf }
 0xa25   : > { %4817 = vmax.xlane.f32.xlu0 %v4816_v8  ;;  %4814 = vmax.xlane.f32.xlu1 %v4813_v46 }
 0xa36   : > { %6639 = vrot.lane.b32.xlu1 %v7520_v63, %s6974_s22 }
 0xa3b   : > { %4937 = vrot.lane.b32.xlu0 %v7542_v23, %s6974_s22 }
 0xa3f   : > { %6644 = vrot.lane.b32.xlu0 %v7534_v6, %s6974_s22 }
 0xa67   : > { %v4803_v60 = vpop.xlane.xlu1 %4802 }
 0xa6b   : > { %v4862_v10 = vpop.permute.xlu1 %4861 }
 0xa6c   : > { %6259 = vmatpush3.msra.mxu0 %v4862_v10 }
 0xa6d   : > { %6268 = vmatprep.subr.mxu0 %v6971_v12 }
 0xa6f   : > { %v4809_v32 = vpop.xlane.xlu0 %4808  ;;  %v5014_v61 = vpop.permute.xlu1 %5013 }
 0xa73   : > { %v6635_v52 = vpop.permute.xlu1 %6634 }
 0xa74   : > { %v6637_v51 = vunpack.i.h.bf16 %v6635_v52  ;;  %v6636_v15 = vunpack.i.l.bf16 %v6635_v52 }
 0xa76   : > { %v6415_v35 = vpack.c.bf16 %v6637_v51, %v6636_v15 }
 0xaaa   : > { %v4806_v21 = vpop.xlane.xlu0 %4805 }
 0xaae   : > { %v4812_v22 = vpop.xlane.xlu0 %4811 }
 0xaaf   : > { %v4819_v17 = vmax.f32 %v4803_v60, %v4812_v22 }
 0xab1   : > { %v4822_v45 = vsub.f32 %v4411_v9, %v4819_v17  ;;  %v4831_v2 = vsub.f32 %v4649_v62, %v4819_v17 }
 0xab2   : > { %v4818_v63 = vpop.xlane.xlu0 %4817  ;;  %v4815_v0 = vpop.xlane.xlu1 %4814 }
 0xab3   : > { %v4825_v49 = vmul.f32 1.442695, %v4822_v45  ;;  %v4834_v23 = vmul.f32 1.442695, %v4831_v2  ;;  %v4821_v56 = vmax.f32 %v4809_v32, %v4818_v63  ;;  %v4820_v3 = vmax.f32 %v4806_v21, %v4815_v0 }
 0xab5   : > { %6720 = vpow2.f32 %v4825_v49  ;;  %v4824_v6 = vsub.f32 %v4575_v48, %v4821_v56  ;;  %v4833_v7 = vsub.f32 %v4797_v31, %v4821_v56  ;;  %v4823_v50 = vsub.f32 %v4493_v16, %v4820_v3 }
 0xab6   : > { %6722 = vpow2.f32 %v4834_v23  ;;  %v4832_v18 = vsub.f32 %v4723_v37, %v4820_v3  ;;  %v4938_v1 = vpop.permute.xlu0 %4937  ;;  %v6640_v4 = vpop.permute.xlu1 %6639 }
 0xab7   : > { %v4829_v24 = vmul.f32 1.442695, %v4824_v6  ;;  %v4838_v41 = vmul.f32 1.442695, %v4833_v7  ;;  %v4827_v57 = vmul.f32 1.442695, %v4823_v50  ;;  %6264 = vmatpush3.msra.mxu1 %v4938_v1  ;;  %v6642_v39 = vunpack.i.h.bf16 %v6640_v4 }
 0xab8   : > { %v4836_v25 = vmul.f32 1.442695, %v4832_v18  ;;  %6417 = vmatprep.subr.bf16.mxu1 %v6969_v5  ;;  %v6641_v27 = vunpack.i.l.bf16 %v6640_v4 }
 0xab9   : > { %6724 = vpow2.f32 %v4829_v24 }
 0xaba   : > { %6726 = vpow2.f32 %v4838_v41  ;;  %v6645_v34 = vpop.permute.xlu0 %6644  ;;  %v6418_v30 = vpack.c.bf16 %v6642_v39, %v6641_v27 }
 0xabb   : > { %6728 = vpow2.f32 %v4827_v57  ;;  %v6647_v54 = vunpack.i.h.bf16 %v6645_v34  ;;  %v6646_v28 = vunpack.i.l.bf16 %v6645_v34 }
 0xabc   : > { %6730 = vpow2.f32 %v4836_v25 }
 0xabd   : > { %v6421_v11 = vpack.c.bf16 %v6647_v54, %v6646_v28 }
 0xabf   : > { %v6721_v26 = vpop.eup %6720 }
 0xac0   : > { %v6723_v14 = vpop.eup %6722  ;;  %v4840_v29 = vsel %vm1539_vm4, %v6721_v26, 0.0 }
 0xac1   : > { %6261 = vmatmul.mubr.msk.f32.vlgmr.msra.gmra.mrb[52].mxu0 %vm1082_vm2, %v6723_v14  ;;  %v4849_v38 = vsel %vm1082_vm2, %v6723_v14, 0.0  ;;  %4841 = vadd.xlane.f32.xlu1 %v4840_v29 }
 0xac2   : > { %6269 = vmatpush3.msra.mxu0 %v5014_v61  ;;  %4850 = vadd.xlane.f32.xlu0 %v4849_v38 }
 0xac3   : > { %v6725_v42 = vpop.eup %6724  ;;  %6270 = vmatprep.mubr.msk.f32.mxu0 %vm6970_vm1, %v6971_v12  ;;  %6414 = vmatprep.subr.bf16.mxu0 %v6969_v5 }
 0xac4   : > { %v6727_v53 = vpop.eup %6726  ;;  %v4846_v33 = vsel %vm1539_vm4, %v6725_v42, 0.0 }
 0xac5   : > { %v6729_v9 = vpop.eup %6728  ;;  %6271 = vmatmul.mubr.msk.f32.vlgmr.msra.gmra.mrb[54].mxu0 %vm1082_vm2, %v6727_v53  ;;  %4847 = vadd.xlane.f32.xlu1 %v4846_v33  ;;  %v4855_v31 = vsel %vm1082_vm2, %v6727_v53, 0.0 }
 0xac6   : > { %v6731_v59 = vpop.eup %6730  ;;  %6416 = vmatpush3.bf16.msra.mxu0 %v6415_v35  ;;  %v4843_v48 = vsel %vm1539_vm4, %v6729_v9, 0.0  ;;  %6277 = vmatprep.mubr.msk.f32.mxu0 %vm6970_vm1, %v6971_v12 }
 0xac7   : > { %6266 = vmatmul.mubr.msk.f32.vlgmr.msra.gmra.mrb[56].mxu1 %vm1082_vm2, %v6731_v59  ;;  %4844 = vadd.xlane.f32.xlu0 %v4843_v48  ;;  %v4852_v13 = vsel %vm1082_vm2, %v6731_v59, 0.0 }
 0xac8   : > { %6419 = vmatpush3.bf16.msra.mxu1 %v6418_v30  ;;  %6420 = vmatprep.subr.bf16.mxu0 %v6969_v5  ;;  %v5335_v5 = vld [vmem:[#allocation10 + $0x18] sm:$0xff] }
 0xac9   : > { %6278 = vmatmul.mubr.msk.f32.vlgmr.msra.gmra.mrb[52].mxu0 %vm1539_vm4, %v6721_v26  ;;  %6284 = vmatprep.mubr.msk.f32.mxu1 %vm6970_vm1, %v6971_v12 }
 0xaca   : > { %6422 = vmatpush3.bf16.msra.mxu0 %v6421_v11  ;;  %6291 = vmatprep.mubr.msk.f32.mxu0 %vm6970_vm1, %v6971_v12 }
 0xacb   : > { %4853 = vadd.xlane.f32.xlu0 %v4852_v13  ;;  %6294 = vmatprep.subr.mxu0 %v6971_v12 }
 0xacd   : > { %6292 = vmatmul.mubr.msk.f32.vlgmr.msra.gmra.mrb[54].mxu0 %vm1539_vm4, %v6725_v42 }
 0xace   : > { %6296 = vmatprep.mubr.msk.f32.mxu0 %vm6970_vm1, %v6971_v12  ;;  %6295 = vmatpush3.msra.mxu0 %v5335_v5 }
 0xacf   : > { %6285 = vmatmul.mubr.msk.f32.vlgmr.msra.gmra.mrb[56].mxu1 %vm1539_vm4, %v6729_v9  ;;  %4856 = vadd.xlane.f32.xlu0 %v4855_v31 }
 0xb4e   : > { %v4842_v19 = vpop.xlane.xlu1 %4841 }
 0xb4f   : > { %v4851_v40 = vpop.xlane.xlu0 %4850 }
 0xb50   : > { %v4858_v20 = vadd.f32 %v4851_v40, %v4842_v19 }
 0xb52   : > { %6732 = vrcp.f32 %v4858_v20  ;;  %v4848_v37 = vpop.xlane.xlu1 %4847 }
 0xb54   : > { %v4845_v16 = vpop.xlane.xlu0 %4844 }
 0xb58   : > { %v4854_v62 = vpop.xlane.xlu0 %4853 }
 0xb59   : > { %v4859_v55 = vadd.f32 %v4854_v62, %v4845_v16 }
 0xb5b   : > { %6734 = vrcp.f32 %v4859_v55 }
 0xb5c   : > { %v4857_v36 = vpop.xlane.xlu0 %4856  ;;  %v6733_v8 = vpop.eup %6732 }
 0xb5d   : > { %v4860_v44 = vadd.f32 %v4857_v36, %v4848_v37 }
 0xb5f   : > { %6736 = vrcp.f32 %v4860_v44 }
 0xb65   : > { %v6735_v21 = vpop.eup %6734 }
 0xb69   : > { %v6737_v45 = vpop.eup %6736 }
 0xb9c   : > { %v5164_v46 = vpop.f32.mrb[52].mxu0 }
 0xb9d   : > { %v5332_v60 = vmul.f32 %v6733_v8, %v5164_v46  ;;  %v6279_v10 = vpop.f32.mrb[53].mxu0 }
 0xb9f   : > { %6297 = vmatmul.mubr.msk.f32.vlgmr.msra.gmra.mrb[34].mxu0 %vm1082_vm2, %v5332_v60 }
 0xba0   : > { %v5322_v32 = vpop.f32.mrb[54].mxu0  ;;  %6299 = vmatprep.mubr.msk.f32.mxu0 %vm6970_vm1, %v6971_v12 }
 0xba1   : > { %v6293_v61 = vpop.f32.mrb[55].mxu0  ;;  %v5334_v2 = vmul.f32 %v6737_v45, %v5322_v32 }
 0xba2   : > { %v5243_v52 = vpop.f32.mrb[56].mxu1 }
 0xba3   : > { %v5333_v22 = vmul.f32 %v6735_v21, %v5243_v52  ;;  %v6286_v17 = vpop.f32.mrb[57].mxu1 }
 0xba5   : > { %6300 = vmatmul.mubr.msk.f32.gmra.mrb[36].mxu0 %vm1082_vm2, %v5333_v22 }
 0xba6   : > { %6302 = vmatprep.mubr.msk.f32.mxu0 %vm6970_vm1, %v6971_v12 }
 0xba9   : > { %6303 = vmatmul.mubr.msk.f32.gmra.mrb[38].mxu0 %vm1082_vm2, %v5334_v2 }
 0xc72   : > { %v5411_v63 = vpop.f32.mrb[34].mxu0 }
 0xc73   : > { %v6423_v0 = vadd.f32 %v5411_v63, %v7801_v58  ;;  %v6298_v49 = vpop.f32.mrb[35].mxu0 }
 0xc75   : > { %5428 = vst.msk [vmem:[%s434_s6] sm:$0xff] %vm444_vm0, %v6423_v0 }
 0xc78   : > { %v5416_v23 = vpop.f32.mrb[36].mxu0 }
 0xc79   : > { %v6424_v56 = vadd.f32 %v5416_v23, %v7803_v43  ;;  %v6301_v3 = vpop.f32.mrb[37].mxu0 }
 0xc7b   : > { %5429 = vst.msk [vmem:[%s434_s6 + $0x8] sm:$0xff] %vm444_vm0, %v6424_v56 }
 0xc7c   : > { %v5421_v12 = vpop.f32.mrb[38].mxu0 }
 0xc7d   : > { %v6425_v58 = vadd.f32 %v5421_v12, %v7805_v47  ;;  %v6304_v6 = vpop.f32.mrb[39].mxu0 }
 0xc7f   : > { %5430 = vst.msk [vmem:[%s434_s6 + $0x10] sm:$0xff] %vm444_vm0, %v6425_v58 }
 0xc80   : > { %6895 = shalt.err (!%p6892_p3)
}
 0xc81   : > { %s6896_s9 = scalar_lea.hbm %s7983_s20, 384  ;;  %s6900_s0 = scalar_lea.hbm %s8078_s18, 768 }
 0xc82   : > { %p6897_p9 = scmp.ne.s32.totalorder %s7983_s20, %s6896_s9  ;;  %p6901_p7 = scmp.lt.u32.totalorder %s7983_s20, %s8078_s18 }
 0xc83   : > { %p6902_p12 = scmp.lt.u32.totalorder %s6900_s0, %s6896_s9  ;;  %p6904_p2 = scmp.lt.u32.totalorder %s6896_s9, %s7983_s20 }
 0xc84   : > { %p6898_p13 = pnand %p6897_p9, %p7182_p5 }
 0xc85   : > { %p6903_p1 = por %p6902_p12, %p6901_p7 }
 0xc86   : > { %p6899_p11 = pneg %p6898_p13 }
 0xc87   : > { %p6905_p4 = por %p6904_p2, %p6903_p1 }
 0xc89   : > { %p6906_p0 = pnand %p6905_p4, %p6899_p11 }
 0xc8b   : > { %6909 = shalt.err (!%p6906_p0)
}
 0xc8c   : > { %s6976_s22 = smov 128   ;;  %s6977_s6 = smov 8  }
 0xc8d   : > { %6482 = dma.vmem_to_hbm [thread:$0]  (%p7182_p5), %s7976_s28, 384, %s7983_s20, %s5432_s15, %s6976_s22, %s6976_s22, %s6977_s6  }
 0xc8e PF: > { %s8079_s19 = sld [smem:[#allocation17_spill]]  ;;  %s8080_s7 = sld [smem:[#allocation18_spill]] }
 0xc8f   : > { %p8082_p6 = scmp.ge.s32.totalorder %s6960_s12, 2 }
 0xc94   : > { %s5460_s17 = sand.u32 1, %s8079_s19   ;;  %p8081_p8 = scmp.ne.s32.totalorder %s8080_s7, 0 }
 0xc95   : > { %s5461_s13 = scalar_lea.sflag [#allocation4], %s5460_s17 }
 0xc96   : > { %p6502_p10 = pnand %p8082_p6, %p8081_p8 }
 0xc98   : > { %6943 = dma.done.wait (!%p6502_p10), %s5461_s13, 384  }
 0xc99   : > { %6945 = vsyncadd (!%p6502_p10), %s5461_s13, 4294966912  ;;  %p26_p3 = scmp.ge.s32.totalorder %s7168_s14, 4   ;;  %s8083_s30 = smov %s6952_s10 }
 0xc9a   : > { %s8084_s10 = smov %s6956_s11  ;;  %s8085_s11 = smov %s7178_s16 }
 0xc9b   : > { %s8086_s12 = smov %s7168_s14  ;;  %28 = sbr.rel (!%p26_p3) target bundleno = 14 (0xe), region = 127 }
 0xca2   :  { %5466 = vsyncpa [#allocation3], 1 }
 0xca3   :  { %5468 = vsyncpa [#allocation3 + $0x1], 1 }
 0xca4   :  { %5469 = vsyncpa [#allocation6], 1 }
 0xca5   :  { %5471 = vsyncpa [#allocation6 + $0x1], 1 }
 0xca6   :  { %5472 = vsyncpa [#allocation9], 1 }
 0xca7   :  { %5473 = vsyncpa [#allocation4], 1 }
 0xca8   :  { %5475 = vsyncpa [#allocation4 + $0x1], 1 }

// kernel: tpu_custom_call.1
= control target key start
LH: loop header
LB: loop body
LE: loop exit
PB: predicated region body
PF: predicated region fallthrough
CT: control target
= control target key end

     0   :  { %s8028_s0 = inlined_call_operand.hbm [shape: f32[6,16,32], index: 0, kind: input, shape index: {}]   ;;  %s8029_s1 = inlined_call_operand.hbm [shape: f32[6,8,32], index: 1, kind: input, shape index: {}]   ;;  %s8030_s2 = inlined_call_operand.vmem [shape: f32[1,32], index: 2, kind: input, shape index: {}]   ;;  %s8031_s3 = inlined_call_operand.vmem [shape: f32[1,32], index: 3, kind: input, shape index: {}]   ;;  %s8032_s4 = inlined_call_operand.vmem [shape: f32[1,32], index: 4, kind: input, shape index: {}]   ;;  %s8033_s5 = inlined_call_operand.vmem [shape: f32[1,32], index: 5, kind: input, shape index: {}]   ;;  %s8034_s6 = inlined_call_operand.hbm [shape: f32[32,32], index: 6, kind: input, shape index: {}]   ;;  %s8035_s7 = inlined_call_operand.hbm [shape: f32[2,32,32], index: 7, kind: input, shape index: {}]   ;;  %s8036_s8 = inlined_call_operand.hbm [shape: f32[32,32], index: 8, kind: input, shape index: {}]   ;;  %s8037_s9 = inlined_call_operand.hbm [shape: f32[6,8,32], index: 9, kind: output, shape index: {}]  }
   0x1   :  { %8048 = sst [smem:[#allocation19_spill]] %s8028_s0 }
   0x2   :  { %8049 = sst [smem:[#allocation20_spill]] %s8034_s6 }
   0x3   :  { %8050 = sst [smem:[#allocation21_spill]] %s8035_s7 }
   0x4   :  { %8051 = sst [smem:[#allocation22_spill]] %s8036_s8 }
   0x5   :  { %8052 = sst [smem:[#allocation23_spill]] %s8037_s9 }
   0x6   :  { %14 = vsyncpa [#allocation3], 0 }
   0x7   :  { %16 = vsyncpa [#allocation3 + $0x1], 0 }
   0x8   :  { %17 = vsyncpa [#allocation6], 0 }
   0x9   :  { %19 = vsyncpa [#allocation6 + $0x1], 0 }
   0xa   :  { %20 = vsyncpa [#allocation9], 0 }
   0xb   :  { %21 = vsyncpa [#allocation4], 0 }
   0xc   :  { %23 = vsyncpa [#allocation4 + $0x1], 0  ;;  %s7028_s30 = smov 0   ;;  %s7030_s10 = smov 0  }
   0xd   :  { %s7032_s11 = smov 0   ;;  %s7034_s12 = smov 0  }
   0xe LB: > { %8053 = sst [smem:[#allocation17_spill]] %s6948_s30  ;;  %s7049_s13 = sadd.s32 4294967295, %s6960_s12   ;;  %s6960_s12 = sphi %s7034_s12, %s8086_s12   ;;  %s6956_s11 = sphi %s7032_s11, %s8085_s11   ;;  %s6952_s10 = sphi %s7030_s10, %s8084_s10   ;;  %s6948_s30 = sphi %s7028_s30, %s8083_s30  }
   0xf   : > { %s5569_s14 = sadd.s32 4294967294, %s6960_s12   ;;  %p49_p0 = scmp.ne.s32.totalorder %s6952_s10, %s6948_s30 }
  0x10   : > { %p8038_p1 = scmp.eq.s32.totalorder %s7049_s13, 0  ;;  %p252_p3 = scmp.eq.s32.totalorder %s5569_s14, 1 }
  0x11   : > { %p5570_p5 = scmp.ge.s32.totalorder %s6960_s12, 1  ;;  %p259_p7 = scmp.lt.s32.totalorder %s6960_s12, 3 }
  0x12   : > { %p7058_p4 = por %p8038_p1, %p49_p0  ;;  %p7063_p6 = por %p252_p3, %p49_p0 }
  0x13   : > { %p7068_p8 = pnand %p5570_p5, %p259_p7  ;;  %s6962_s18 = smov [#allocation7]  }
  0x14   : > { %s8054_s15 = scalar_select %p7058_p4, 1, 0 }
  0x15   : > { %s8055_s16 = scalar_select %p7063_p6, 1, 0 }
  0x16   : > { %s8057_s17 = scalar_select %p7068_p8, 1, 0 }
  0x17   : > { %8056 = sst [smem:[#allocation18_spill]] %s8055_s16  ;;  %s283_s19 = sshll.u32 %s6962_s18, 4  ;;  %s7072_s19 = int_to_ptr.vmem [resolvable:$true] %s283_s19 }
  0x18   : > { %p6484_p9 = pneg %p7068_p8  ;;  %s6963_s21 = smov [#allocation8]  }
  0x19   : > { %s296_s22 = sshll.u32 %s6963_s21, 4  ;;  %s6964_s23 = smov [#allocation10]   ;;  %s7083_s22 = int_to_ptr.vmem [resolvable:$true] %s296_s22 }
  0x1a   : > { %p7079_p11 = pnand %p6484_p9, %p8038_p1  ;;  %s7085_s24 = sshll.u32 %s6964_s23, 4  ;;  %s310_s24 = int_to_ptr.vmem [resolvable:$true] %s7085_s24 }
  0x1b   : > { %s8059_s6 = sld [smem:[#allocation20_spill]] }
  0x1c   : > { %p7095_p13 = pneg %p7079_p11 }
  0x21   : > { %s6738_s27 = scalar_lea.hbm %s8059_s6, 512 }
  0x22   : > { %p6739_p12 = scmp.ne.s32.totalorder %s8059_s6, %s6738_s27  ;;  %p6745_p5 = scmp.lt.u32.totalorder %s6738_s27, %s8059_s6 }
  0x24   : > { %p6741_p0 = pnand %p7095_p13, %p6739_p12 }
  0x26   : > { %p6742_p3 = pneg %p6741_p0 }
  0x28   : > { %p6747_p7 = pnand %p6745_p5, %p6742_p3 }
  0x2a   : > { %6750 = shalt.err (!%p6747_p7)
}
  0x2b   : > { %s6751_s23 = scalar_lea.vmem %s7072_s19, 512  ;;  %p6759_p2 = scmp.lt.s32.totalorder %s7072_s19, %s7072_s19 }
  0x2c   : > { %p6752_p9 = scmp.ne.s32.totalorder %s7072_s19, %s6751_s23  ;;  %p6760_p6 = scmp.lt.s32.totalorder %s6751_s23, %s6751_s23 }
  0x2e   : > { %p6754_p10 = pnand %p6752_p9, %p7095_p13  ;;  %p6761_p12 = por %p6760_p6, %p6759_p2 }
  0x30   : > { %p6755_p1 = pneg %p6754_p10 }
  0x32   : > { %p6762_p0 = pnand %p6761_p12, %p6755_p1 }
  0x34   : > { %6765 = shalt.err (!%p6762_p0)
}
  0x35   : > { %s8044_s25 = smov 128   ;;  %s8046_s26 = smov 8  }
  0x36   : > { %6487 = dma.hbm_to_vmem [thread:$0]  (!%p7079_p11), %s8059_s6, 512, %s7072_s19, [#allocation6], %s8044_s25, %s8044_s25, %s8046_s26  }
  0x37   : > { %s8061_s7 = sld [smem:[#allocation21_spill]] }
  0x3d   : > { %s6766_s21 = scalar_lea.hbm %s8061_s7, 1024 }
  0x3e   : > { %p6767_p1 = scmp.ne.s32.totalorder %s8061_s7, %s6766_s21  ;;  %p6773_p10 = scmp.lt.u32.totalorder %s6766_s21, %s8061_s7 }
  0x40   : > { %p6769_p2 = pnand %p6767_p1, %p7095_p13 }
  0x42   : > { %p6770_p6 = pneg %p6769_p2 }
  0x44   : > { %p6775_p3 = pnand %p6773_p10, %p6770_p6 }
  0x46   : > { %6778 = shalt.err (!%p6775_p3)
}
  0x47   : > { %s6779_s19 = scalar_lea.vmem %s7083_s22, 1024  ;;  %p6787_p12 = scmp.lt.s32.totalorder %s7083_s22, %s7083_s22 }
  0x48   : > { %p6780_p5 = scmp.ne.s32.totalorder %s7083_s22, %s6779_s19  ;;  %p6788_p0 = scmp.lt.s32.totalorder %s6779_s19, %s6779_s19 }
  0x4a   : > { %p6782_p7 = pnand %p6780_p5, %p7095_p13  ;;  %p6789_p1 = por %p6788_p0, %p6787_p12 }
  0x4c   : > { %p6783_p9 = pneg %p6782_p7 }
  0x4e   : > { %p6790_p2 = pnand %p6789_p1, %p6783_p9 }
  0x50   : > { %6793 = shalt.err (!%p6790_p2)
}
  0x51   : > { %6490 = dma.hbm_to_vmem [thread:$0]  (!%p7079_p11), %s8061_s7, 1024, %s7083_s22, [#allocation9], %s8044_s25, %s8044_s25, %s8046_s26  }
  0x52   : > { %s8062_s8 = sld [smem:[#allocation22_spill]] }
  0x58   : > { %s6794_s28 = scalar_lea.hbm %s8062_s8, 512 }
  0x59   : > { %p6795_p6 = scmp.ne.s32.totalorder %s8062_s8, %s6794_s28  ;;  %p6801_p5 = scmp.lt.u32.totalorder %s6794_s28, %s8062_s8 }
  0x5b   : > { %p6797_p10 = pnand %p6795_p6, %p7095_p13 }
  0x5d   : > { %p6798_p3 = pneg %p6797_p10 }
  0x5f   : > { %p6803_p7 = pnand %p6801_p5, %p6798_p3 }
  0x61   : > { %6806 = shalt.err (!%p6803_p7)
}
  0x62   : > { %s6807_s19 = scalar_lea.vmem %s310_s24, 512  ;;  %p6815_p1 = scmp.lt.s32.totalorder %s310_s24, %s310_s24 }
  0x63   : > { %p6808_p9 = scmp.ne.s32.totalorder %s310_s24, %s6807_s19  ;;  %p6816_p2 = scmp.lt.s32.totalorder %s6807_s19, %s6807_s19 }
  0x65   : > { %p6810_p12 = pnand %p6808_p9, %p7095_p13  ;;  %p6817_p4 = por %p6816_p2, %p6815_p1 }
  0x67   : > { %p6811_p0 = pneg %p6810_p12 }
  0x69   : > { %p6818_p8 = pnand %p6817_p4, %p6811_p0 }
  0x6b   : > { %6821 = shalt.err (!%p6818_p8)
}
  0x6c   : > { %6493 = dma.hbm_to_vmem [thread:$0]  (!%p7079_p11), %s8062_s8, 512, %s310_s24, [#allocation9], %s8044_s25, %s8044_s25, %s8046_s26  }
  0x6d   : > { %s7168_s14 = sadd.s32 1, %s6960_s12   ;;  %s36_s30 = sadd.s32 1, %s6956_s11 }
  0x6e   : > { %s33_s20 = ssub.s32 %s6960_s12, %s7168_s14  ;;  %p43_p8 = scmp.ne.s32.totalorder %s6956_s11, %s6952_s10 }
  0x6f   : > { %p34_p4 = scmp.eq.s32.totalorder %s33_s20, 0  ;;  %p44_p13 = scmp.eq.s32.totalorder %s6960_s12, 0 }
  0x70   : > { %p6508_p6 = scmp.lt.s32.totalorder %s6960_s12, 2  ;;  %p8063_p3 = scmp.eq.s32.totalorder %s7049_s13, 1 }
  0x71   : > { %s7178_s16 = scalar_select %p34_p4, %s6956_s11, %s36_s30  }
  0x72   : > { %p45_p10 = por %p44_p13, %p43_p8  ;;  %p7182_p5 = por %p8063_p3, %p43_p8 }
  0x73   : > { %s7187_s28 = sand.u32 1, %s6956_s11   ;;  %s5710_s24 = smul.u32 768, %s6960_s12 }
  0x74   : > { %s6462_s29 = smul.u32 48, %s7187_s28  ;;  %p7191_p11 = pnand %p6508_p6, %p45_p10 }
  0x75   : > { %s8066_s0 = sld [smem:[#allocation19_spill]]  ;;  %s324_s30 = scalar_lea.sflag [#allocation3], %s7187_s28 }
  0x76   : > { %s327_s22 = scalar_lea.vmem [#allocation2], %s6462_s29  ;;  %p6824_p9 = pneg %p7191_p11 }
  0x77   : > { %s335_s9 = sshll.u32 %s327_s22, 4  ;;  %s7200_s9 = int_to_ptr.vmem [resolvable:$true] %s335_s9 }
  0x7b   : > { %s7198_s19 = scalar_lea.hbm %s8066_s0, %s5710_s24  ;;  %s6827_s23 = scalar_lea.hbm %s8066_s0, 1536 }
  0x7c   : > { %s6822_s25 = scalar_lea.hbm %s7198_s19, 768  ;;  %p6828_p1 = scmp.lt.u32.totalorder %s7198_s19, %s8066_s0 }
  0x7d   : > { %p6823_p7 = scmp.ne.s32.totalorder %s7198_s19, %s6822_s25  ;;  %p6829_p2 = scmp.lt.u32.totalorder %s6827_s23, %s6822_s25 }
  0x7e   : > { %p6831_p8 = scmp.lt.u32.totalorder %s6822_s25, %s7198_s19 }
  0x7f   : > { %p6825_p12 = pnand %p6824_p9, %p6823_p7  ;;  %p6830_p4 = por %p6829_p2, %p6828_p1 }
  0x81   : > { %p6826_p0 = pneg %p6825_p12  ;;  %p6832_p13 = por %p6831_p8, %p6830_p4 }
  0x83   : > { %p6833_p6 = pnand %p6832_p13, %p6826_p0 }
  0x85   : > { %6836 = shalt.err (!%p6833_p6)
}
  0x86   : > { %s6837_s29 = scalar_lea.vmem %s7200_s9, 768  ;;  %s6967_s22 = smov [#allocation2]  }
  0x87   : > { %p6838_p10 = scmp.ne.s32.totalorder %s7200_s9, %s6837_s29  ;;  %s6842_s24 = sshll.u32 %s6967_s22, 4  ;;  %s6843_s24 = int_to_ptr.vmem [resolvable:$false] %s6842_s24 }
  0x88   : > { %s6844_s6 = scalar_lea.vmem %s6843_s24, 1536  ;;  %p6845_p12 = scmp.lt.s32.totalorder %s7200_s9, %s6843_s24 }
  0x89   : > { %p6840_p3 = pnand %p6838_p10, %p6824_p9  ;;  %p6846_p1 = scmp.lt.s32.totalorder %s6844_s6, %s6837_s29 }
  0x8b   : > { %p6841_p7 = pneg %p6840_p3  ;;  %p6847_p2 = por %p6846_p1, %p6845_p12 }
  0x8d   : > { %p6848_p4 = pnand %p6847_p2, %p6841_p7 }
  0x8f   : > { %6851 = shalt.err (!%p6848_p4)
}
  0x90   : > { %s8067_s25 = smov 8   ;;  %s8068_s26 = smov 128  }
  0x91   : > { %6497 = dma.hbm_to_vmem [thread:$0]  (!%p7191_p11), %s7198_s19, 768, %s7200_s9, %s324_s30, %s8068_s26, %s8068_s26, %s8067_s25  }
  0x92   : > { %s6463_s21 = smul.u32 24, %s7187_s28  ;;  %s8069_s0 = sand.u32 1, %s6960_s12  }
  0x93   : > { %s5708_s23 = smul.u32 384, %s6960_s12  ;;  %s7245_s7 = scalar_lea.sflag [#allocation6], %s8069_s0 }
  0x94   : > { %s349_s6 = scalar_lea.vmem [#allocation5], %s6463_s21  ;;  %s6857_s9 = scalar_lea.hbm %s8029_s1, 768 }
  0x95   : > { %s7239_s24 = scalar_lea.hbm %s8029_s1, %s5708_s23  ;;  %s356_s20 = sshll.u32 %s349_s6, 4  ;;  %s7241_s20 = int_to_ptr.vmem [resolvable:$true] %s356_s20 }
  0x96   : > { %s6852_s8 = scalar_lea.hbm %s7239_s24, 384  ;;  %p6858_p6 = scmp.lt.u32.totalorder %s7239_s24, %s8029_s1 }
  0x97   : > { %p6853_p0 = scmp.ne.s32.totalorder %s7239_s24, %s6852_s8  ;;  %p6859_p10 = scmp.lt.u32.totalorder %s6857_s9, %s6852_s8 }
  0x98   : > { %p6861_p7 = scmp.lt.u32.totalorder %s6852_s8, %s7239_s24 }
  0x99   : > { %p6855_p8 = pnand %p6853_p0, %p6824_p9  ;;  %p6860_p3 = por %p6859_p10, %p6858_p6 }
  0x9b   : > { %p6856_p13 = pneg %p6855_p8  ;;  %p6862_p12 = por %p6861_p7, %p6860_p3 }
  0x9d   : > { %p6863_p1 = pnand %p6862_p12, %p6856_p13 }
  0x9f   : > { %6866 = shalt.err (!%p6863_p1)
}
  0xa0   : > { %s6867_s0 = scalar_lea.vmem %s7241_s20, 384  ;;  %s6968_s21 = smov [#allocation5]  }
  0xa1   : > { %p6868_p2 = scmp.ne.s32.totalorder %s7241_s20, %s6867_s0  ;;  %s6872_s29 = sshll.u32 %s6968_s21, 4  ;;  %s6873_s29 = int_to_ptr.vmem [resolvable:$false] %s6872_s29 }
  0xa2   : > { %s6874_s22 = scalar_lea.vmem %s6873_s29, 768  ;;  %p6875_p8 = scmp.lt.s32.totalorder %s7241_s20, %s6873_s29 }
  0xa3   : > { %p6870_p4 = pnand %p6868_p2, %p6824_p9  ;;  %p6876_p6 = scmp.lt.s32.totalorder %s6874_s22, %s6867_s0 }
  0xa5   : > { %p6871_p0 = pneg %p6870_p4  ;;  %p6877_p10 = por %p6876_p6, %p6875_p8 }
  0xa7   : > { %p6878_p3 = pnand %p6877_p10, %p6871_p0 }
  0xa9   : > { %6881 = shalt.err (!%p6878_p3)
}
  0xaa   : > { %6500 = dma.hbm_to_vmem [thread:$0]  (!%p7191_p11), %s7239_s24, 384, %s7241_s20, %s7245_s7, %s8068_s26, %s8068_s26, %s8067_s25  }
  0xab   : > { %p8070_p9 = scmp.ne.s32.totalorder %s8057_s17, 0 }
  0xac   : > { %s7277_s8 = sand.u32 (!%p8070_p9), 1, %s6952_s10   ;;  %p8071_p13 = scmp.ne.s32.totalorder (!%p8070_p9), %s8054_s15, 0 }
  0xad   : > { %368 = sbr.rel (%p8070_p9) target bundleno = 3214 (0xc8e), region = 56  ;;  %s371_s28 = scalar_lea.sflag (!%p8070_p9), [#allocation3], %s7277_s8 }
  0xae   : > { %s6464_s6 = smul.u32 (!%p8070_p9), 48, %s7277_s8 }
  0xb0   : > { %s374_s19 = scalar_lea.vmem (!%p8070_p9), [#allocation2], %s6464_s6 }
  0xb4   : > { %6927 = dma.done.wait (%p8071_p13), %s371_s28, 768  }
  0xb5   : > { %6929 = vsyncadd (%p8071_p13), %s371_s28, 4294966528  ;;  %s379_s7 = sand.u32 1, %s7049_s13   ;;  %s6465_s17 = smul.u32 24, %s7277_s8 }
  0xb6   : > { %s380_s18 = scalar_lea.sflag [#allocation6], %s379_s7 }
  0xb7   : > { %s383_s20 = scalar_lea.vmem [#allocation5], %s6465_s17 }
  0xb8   : > { %6931 = dma.done.wait (%p8071_p13), %s380_s18, 384  }
  0xb9   : > { %6933 = vsyncadd (%p8071_p13), %s380_s18, 4294966912  ;;  %p8072_p11 = scmp.eq.s32.totalorder %s7049_s13, 0 }
  0xbb   : > { %6935 = dma.done.wait (%p8072_p11), [#allocation6], 512   ;;  %p8073_p7 = pmov %p8072_p11 }
  0xbd   : > { %6937 = vsyncadd (%p8073_p7), [#allocation6], 4294966784  ;;  %p8074_p12 = pmov %p8073_p7 }
  0xbe   : > { %p8075_p1 = pmov %p8073_p7 }
  0xbf   : > { %6939 = dma.done.wait (%p8074_p12), [#allocation9], 1536  }
  0xc0   : > { %6941 = vsyncadd (%p8075_p1), [#allocation9], 4294965760  ;;  %vm444_vm0 = vcmask 261120   ;;  %v438_v0 = vld [vmem:[%s374_s19] sm:$0xff]  ;;  %v440_v1 = vld [vmem:[%s374_s19 + $0x10] sm:$0xff]  ;;  %vm6970_vm1 = vmmov 0  }
  0xc1   : > { %v439_v2 = vld [vmem:[%s374_s19 + $0x8] sm:$0xff]  ;;  %v445_v3 = vsel %vm444_vm0, %v438_v0, 0.0  ;;  %v451_v4 = vsel %vm444_vm0, %v440_v1, 0.0  ;;  %v441_v5 = vld [vmem:[%s374_s19 + $0x18] sm:$0xff]  ;;  %v442_v8 = vld [vmem:[%s374_s19 + $0x20] sm:$0xff]  ;;  %vm1082_vm2 = vcmask 64512  }
  0xc2   : > { %446 = vadd.xlane.f32.xlu0 %v445_v3  ;;  %452 = vadd.xlane.f32.xlu1 %v451_v4  ;;  %v448_v6 = vsel %vm444_vm0, %v439_v2, 0.0  ;;  %v454_v7 = vsel %vm444_vm0, %v441_v5, 0.0  ;;  %v443_v9 = vld [vmem:[%s374_s19 + $0x28] sm:$0xff]  ;;  %v457_v10 = vsel %vm444_vm0, %v442_v8, 0.0  ;;  %v552_v16 = vld [vmem:[%s383_s20 + $0x10] sm:$0xff]  ;;  %vm7444_vm3 = vmpackc.low %vm1082_vm2, %vm1082_vm2  ;;  %vm1539_vm4 = vcmask 130048  }
  0xc3   : > { %v460_v11 = vsel %vm444_vm0, %v443_v9, 0.0  ;;  %v550_v12 = vld [vmem:[%s383_s20] sm:$0xff]  ;;  %v551_v13 = vld [vmem:[%s383_s20 + $0x8] sm:$0xff]  ;;  %v559_v17 = vsel %vm444_vm0, %v552_v16, 0.0  ;;  %v705_v63 = vld [vmem:[#allocation8] sm:$0xff]  ;;  %s6972_s21 = smov 120  }
  0xc4   : > { %v553_v14 = vsel %vm444_vm0, %v550_v12, 0.0  ;;  %v556_v15 = vsel %vm444_vm0, %v551_v13, 0.0  ;;  %v708_v3 = vld [vmem:[#allocation8 + $0x18] sm:$0xff]  ;;  %s6973_s29 = smov 112   ;;  %s6974_s22 = smov 104  }
  0xc5   : > { %s434_s6 = scalar_lea.vmem [#allocation11], %s6465_s17  ;;  %s5709_s19 = smul.u32 384, %s7049_s13 }
  0xc6   : > { %449 = vadd.xlane.f32.xlu0 %v448_v6  ;;  %455 = vadd.xlane.f32.xlu1 %v454_v7  ;;  %v612_v6 = vld [vmem:[#allocation7] sm:$0xff]  ;;  %v613_v7 = vld [vmem:[#allocation7 + $0x8] sm:$0xff]  ;;  %s5445_s28 = sshll.u32 %s434_s6, 4  ;;  %s8078_s18 = sld [smem:[#allocation23_spill]]  ;;  %s7976_s28 = int_to_ptr.vmem [resolvable:$true] %s5445_s28 }
  0xc7   : > { %s5432_s15 = scalar_lea.sflag [#allocation4], %s7277_s8  ;;  %s6882_s13 = scalar_lea.vmem %s7976_s28, 384 }
  0xc8   : > { %p6883_p2 = scmp.ne.s32.totalorder %s7976_s28, %s6882_s13  ;;  %s6975_s25 = smov [#allocation11]  }
  0xc9   : > { %s6886_s26 = sshll.u32 %s6975_s25, 4  ;;  %s6887_s26 = int_to_ptr.vmem [resolvable:$false] %s6886_s26 }
  0xca   : > { %458 = vadd.xlane.f32.xlu0 %v457_v10  ;;  %461 = vadd.xlane.f32.xlu1 %v460_v11  ;;  %v615_v10 = vld [vmem:[#allocation7 + $0x18] sm:$0xff]  ;;  %p6884_p4 = pnand %p6883_p2, %p7182_p5  ;;  %s6888_s24 = scalar_lea.vmem %s6887_s26, 768 }
  0xcb   : > { %p6889_p8 = scmp.lt.s32.totalorder %s7976_s28, %s6887_s26  ;;  %p6890_p6 = scmp.lt.s32.totalorder %s6888_s24, %s6882_s13 }
  0xcc   : > { %s7983_s20 = scalar_lea.hbm %s8078_s18, %s5709_s19  ;;  %p6885_p0 = pneg %p6884_p4 }
  0xcd   : > { %p6891_p10 = por %p6890_p6, %p6889_p8 }
  0xce   : > { %554 = vadd.xlane.f32.xlu0 %v553_v14  ;;  %557 = vadd.xlane.f32.xlu1 %v556_v15  ;;  %v711_v14 = vld [vmem:[#allocation8 + $0x28] sm:$0xff] }
  0xcf   : > { %p6892_p3 = pnand %p6891_p10, %p6885_p0 }
  0xd2   : > { %560 = vadd.xlane.f32.xlu0 %v559_v17 }
 0x14f   : > { %v447_v18 = vpop.xlane.xlu0 %446  ;;  %v453_v19 = vpop.xlane.xlu1 %452 }
 0x150   : > { %v464_v20 = vmul.f32 0.03125, %v447_v18  ;;  %v466_v21 = vmul.f32 0.03125, %v453_v19 }
 0x152   : > { %v7310_v22 = vsub.f32 %v438_v0, %v464_v20  ;;  %v7312_v23 = vsub.f32 %v440_v1, %v466_v21  ;;  %v706_v0 = vld [vmem:[#allocation8 + $0x8] sm:$0xff] }
 0x153   : > { %v450_v24 = vpop.xlane.xlu0 %449  ;;  %v456_v25 = vpop.xlane.xlu1 %455  ;;  %v7355_v1 = vpack.c.bf16 %v706_v0, %v705_v63 }
 0x154   : > { %v465_v26 = vmul.f32 0.03125, %v450_v24  ;;  %v467_v27 = vmul.f32 0.03125, %v456_v25  ;;  %v476_v28 = vmul.f32 %v7310_v22, %v7310_v22  ;;  %v478_v29 = vmul.f32 %v7312_v23, %v7312_v23 }
 0x155   : > { %6312 = vmatprep.subr.bf16.mxu1 %v7355_v1 }
 0x156   : > { %v7318_v30 = vsub.f32 %v439_v2, %v465_v26  ;;  %v7320_v31 = vsub.f32 %v441_v5, %v467_v27  ;;  %v482_v32 = vsel %vm444_vm0, %v476_v28, 0.0  ;;  %v488_v35 = vsel %vm444_vm0, %v478_v29, 0.0  ;;  %6314 = vmatpush3.bf16.msra.mxu1 %v7355_v1  ;;  %v707_v2 = vld [vmem:[#allocation8 + $0x10] sm:$0xff] }
 0x157   : > { %483 = vadd.xlane.f32.xlu1 %v482_v32  ;;  %v459_v33 = vpop.xlane.xlu0 %458  ;;  %v462_v34 = vpop.xlane.xlu1 %461  ;;  %v7359_v4 = vpack.c.bf16 %v708_v3, %v707_v2  ;;  %v6969_v5 = vmov 0.0|0.0  }
 0x158   : > { %v468_v36 = vmul.f32 0.03125, %v459_v33  ;;  %v469_v37 = vmul.f32 0.03125, %v462_v34  ;;  %v477_v38 = vmul.f32 %v7318_v30, %v7318_v30  ;;  %v479_v39 = vmul.f32 %v7320_v31, %v7320_v31  ;;  %6305 = vmatprep.subr.bf16.mxu0 %v6969_v5 }
 0x159   : > { %6316 = vmatprep.subr.bf16.mxu1 %v7359_v4 }
 0x15a   : > { %v7328_v40 = vsub.f32 %v442_v8, %v468_v36  ;;  %v7330_v41 = vsub.f32 %v443_v9, %v469_v37  ;;  %v485_v42 = vsel %vm444_vm0, %v477_v38, 0.0  ;;  %v491_v45 = vsel %vm444_vm0, %v479_v39, 0.0  ;;  %6318 = vmatpush3.bf16.msra.mxu1 %v7359_v4  ;;  %v614_v9 = vld [vmem:[#allocation7 + $0x10] sm:$0xff] }
 0x15b   : > { %489 = vadd.xlane.f32.xlu1 %v488_v35  ;;  %486 = vadd.xlane.f32.xlu0 %v485_v42  ;;  %v555_v43 = vpop.xlane.xlu0 %554  ;;  %v558_v44 = vpop.xlane.xlu1 %557  ;;  %v6306_v8 = vpack.c.bf16 %v613_v7, %v612_v6  ;;  %v6309_v11 = vpack.c.bf16 %v615_v10, %v614_v9 }
 0x15c   : > { %v562_v46 = vmul.f32 0.03125, %v555_v43  ;;  %v563_v47 = vmul.f32 0.03125, %v558_v44  ;;  %v480_v48 = vmul.f32 %v7328_v40, %v7328_v40  ;;  %v481_v49 = vmul.f32 %v7330_v41, %v7330_v41  ;;  %6327 = vmatprep.subr.bf16.mxu1 %v6969_v5  ;;  %v5582_v44 = vld [vmem:[%s8030_s2] ss:$0 sm:$0xff] }
 0x15d   : > { %6307 = vmatpush3.bf16.msra.mxu0 %v6306_v8 }
 0x15e   : > { %v7338_v50 = vsub.f32 %v550_v12, %v562_v46  ;;  %v7340_v51 = vsub.f32 %v551_v13, %v563_v47  ;;  %v494_v52 = vsel %vm444_vm0, %v480_v48, 0.0  ;;  %v497_v55 = vsel %vm444_vm0, %v481_v49, 0.0  ;;  %6308 = vmatprep.subr.bf16.mxu0 %v6969_v5  ;;  %v710_v13 = vld [vmem:[#allocation8 + $0x20] sm:$0xff] }
 0x15f   : > { %492 = vadd.xlane.f32.xlu0 %v491_v45  ;;  %495 = vadd.xlane.f32.xlu1 %v494_v52  ;;  %v561_v53 = vpop.xlane.xlu0 %560  ;;  %v6971_v12 = vmov 0.0   ;;  %v7368_v15 = vpack.c.bf16 %v711_v14, %v710_v13  ;;  %v5583_v52 = vld [vmem:[%s8031_s3] ss:$0 sm:$0xff] }
 0x160   : > { %v564_v54 = vmul.f32 0.03125, %v561_v53  ;;  %v568_v56 = vmul.f32 %v7338_v50, %v7338_v50  ;;  %v569_v57 = vmul.f32 %v7340_v51, %v7340_v51  ;;  %5896 = vmatprep.mubr.msk.f32.mxu0 %vm6970_vm1, %v6971_v12 }
 0x161   : > { %6310 = vmatpush3.bf16.msra.mxu0 %v6309_v11 }
 0x162   : > { %v7348_v58 = vsub.f32 %v552_v16, %v564_v54  ;;  %v571_v59 = vsel %vm444_vm0, %v568_v56, 0.0  ;;  %v574_v60 = vsel %vm444_vm0, %v569_v57, 0.0  ;;  %6320 = vmatprep.subr.bf16.mxu0 %v7368_v15 }
 0x163   : > { %498 = vadd.xlane.f32.xlu0 %v497_v55  ;;  %572 = vadd.xlane.f32.xlu1 %v571_v59 }
 0x164   : > { %v570_v61 = vmul.f32 %v7348_v58, %v7348_v58 }
 0x166   : > { %v577_v62 = vsel %vm444_vm0, %v570_v61, 0.0 }
 0x167   : > { %575 = vadd.xlane.f32.xlu0 %v574_v60  ;;  %578 = vadd.xlane.f32.xlu1 %v577_v62 }
 0x1e4   : > { %v484_v16 = vpop.xlane.xlu1 %483 }
 0x1e5   : > { %v500_v17 = vmul.f32 0.03125, %v484_v16 }
 0x1e7   : > { %v506_v18 = vadd.f32 1e-05, %v500_v17  ;;  %v712_v17 = vld [vmem:[#allocation8 + $0x30] sm:$0xff] }
 0x1e8   : > { %v490_v19 = vpop.xlane.xlu1 %489  ;;  %v487_v20 = vpop.xlane.xlu0 %486 }
 0x1e9   : > { %6648 = vrsqrt.f32 %v506_v18  ;;  %v502_v21 = vmul.f32 0.03125, %v490_v19  ;;  %v501_v24 = vmul.f32 0.03125, %v487_v20  ;;  %v713_v18 = vld [vmem:[#allocation8 + $0x38] sm:$0xff] }
 0x1eb   : > { %v508_v25 = vadd.f32 1e-05, %v502_v21  ;;  %v507_v26 = vadd.f32 1e-05, %v501_v24 }
 0x1ec   : > { %v496_v27 = vpop.xlane.xlu1 %495  ;;  %v493_v28 = vpop.xlane.xlu0 %492 }
 0x1ed   : > { %6650 = vrsqrt.f32 %v508_v25  ;;  %v504_v29 = vmul.f32 0.03125, %v496_v27  ;;  %v503_v32 = vmul.f32 0.03125, %v493_v28  ;;  %v6323_v25 = vpack.c.bf16 %v713_v18, %v712_v17 }
 0x1ee   : > { %6652 = vrsqrt.f32 %v507_v26 }
 0x1ef   : > { %v510_v33 = vadd.f32 1e-05, %v504_v29  ;;  %v509_v34 = vadd.f32 1e-05, %v503_v32 }
 0x1f0   : > { %v573_v35 = vpop.xlane.xlu1 %572  ;;  %v499_v36 = vpop.xlane.xlu0 %498 }
 0x1f1   : > { %6654 = vrsqrt.f32 %v510_v33  ;;  %v580_v37 = vmul.f32 0.03125, %v573_v35  ;;  %v505_v38 = vmul.f32 0.03125, %v499_v36 }
 0x1f2   : > { %6656 = vrsqrt.f32 %v509_v34 }
 0x1f3   : > { %v6649_v39 = vpop.eup %6648  ;;  %v583_v42 = vadd.f32 1e-05, %v580_v37  ;;  %v511_v43 = vadd.f32 1e-05, %v505_v38 }
 0x1f4   : > { %v579_v45 = vpop.xlane.xlu1 %578  ;;  %v576_v46 = vpop.xlane.xlu0 %575  ;;  %v518_v47 = vmul.f32 %v6649_v39, %v7310_v22 }
 0x1f5   : > { %6658 = vrsqrt.f32 %v583_v42  ;;  %v582_v48 = vmul.f32 0.03125, %v579_v45  ;;  %v581_v49 = vmul.f32 0.03125, %v576_v46 }
 0x1f6   : > { %6660 = vrsqrt.f32 %v511_v43  ;;  %v531_v53 = vmul.f32 %v5582_v44, %v518_v47 }
 0x1f7   : > { %v6651_v54 = vpop.eup %6650  ;;  %v585_v55 = vadd.f32 1e-05, %v582_v48  ;;  %v584_v56 = vadd.f32 1e-05, %v581_v49 }
 0x1f8   : > { %v6653_v57 = vpop.eup %6652  ;;  %v544_v59 = vadd.f32 %v5583_v52, %v531_v53  ;;  %v520_v60 = vmul.f32 %v6651_v54, %v7312_v23 }
 0x1f9   : > { %6662 = vrsqrt.f32 %v585_v55  ;;  %v519_v61 = vmul.f32 %v6653_v57, %v7318_v30  ;;  %v5584_v30 = vld [vmem:[%s8032_s4] ss:$0 sm:$0xff] }
 0x1fa   : > { %6664 = vrsqrt.f32 %v584_v56  ;;  %5913 = vmatprep.mubr.msk.f32.mxu1 %vm444_vm0, %v544_v59  ;;  %v533_v22 = vmul.f32 %v5582_v44, %v520_v60 }
 0x1fb   : > { %v6655_v62 = vpop.eup %6654  ;;  %v532_v63 = vmul.f32 %v5582_v44, %v519_v61 }
 0x1fc   : > { %v6657_v0 = vpop.eup %6656  ;;  %v546_v2 = vadd.f32 %v5583_v52, %v533_v22  ;;  %v522_v3 = vmul.f32 %v6655_v62, %v7328_v40 }
 0x1fd   : > { %v545_v6 = vadd.f32 %v5583_v52, %v532_v63  ;;  %v521_v7 = vmul.f32 %v6657_v0, %v7320_v31  ;;  %v5585_v31 = vld [vmem:[%s8033_s5] ss:$0 sm:$0xff] }
 0x1fe   : > { %v535_v8 = vmul.f32 %v5582_v44, %v522_v3 }
 0x1ff   : > { %v6659_v9 = vpop.eup %6658  ;;  %5914 = vmatmul.mubr.msk.f32.vlgmr.msra.gmra.mrb[0].mxu1 %vm444_vm0, %v545_v6  ;;  %v534_v23 = vmul.f32 %v5582_v44, %v521_v7 }
 0x200   : > { %v6661_v10 = vpop.eup %6660  ;;  %5916 = vmatprep.mubr.msk.f32.mxu1 %vm444_vm0, %v546_v2  ;;  %v548_v11 = vadd.f32 %v5583_v52, %v535_v8  ;;  %6329 = vmatpush3.bf16.msra.mxu1 %v7355_v1  ;;  %v589_v40 = vmul.f32 %v6659_v9, %v7338_v50 }
 0x201   : > { %v547_v13 = vadd.f32 %v5583_v52, %v534_v23  ;;  %v523_v14 = vmul.f32 %v6661_v10, %v7330_v41  ;;  %6330 = vmatprep.subr.bf16.mxu1 %v6969_v5 }
 0x202   : > { %v599_v16 = vmul.f32 %v5584_v30, %v589_v40 }
 0x203   : > { %v6663_v19 = vpop.eup %6662  ;;  %5917 = vmatmul.mubr.msk.f32.gmra.mrb[2].mxu1 %vm444_vm0, %v547_v13  ;;  %v536_v20 = vmul.f32 %v5582_v44, %v523_v14 }
 0x204   : > { %v6665_v21 = vpop.eup %6664  ;;  %5919 = vmatprep.mubr.msk.f32.mxu1 %vm444_vm0, %v548_v11  ;;  %v609_v50 = vadd.f32 %v5585_v31, %v599_v16  ;;  %6332 = vmatpush3.bf16.msra.mxu1 %v7359_v4  ;;  %v591_v41 = vmul.f32 %v6663_v19, %v7348_v58 }
 0x205   : > { %v549_v1 = vadd.f32 %v5583_v52, %v536_v20  ;;  %v590_v24 = vmul.f32 %v6665_v21, %v7340_v51  ;;  %6339 = vmatprep.subr.bf16.mxu1 %v6969_v5 }
 0x206   : > { %5897 = vmatmul.mubr.msk.f32.vlgmr.msra.gmra.mrb[0].mxu0 %vm444_vm0, %v609_v50  ;;  %v601_v51 = vmul.f32 %v5584_v30, %v591_v41 }
 0x207   : > { %5920 = vmatmul.mubr.msk.f32.gmra.mrb[4].mxu1 %vm444_vm0, %v549_v1  ;;  %5899 = vmatprep.mubr.msk.f32.mxu0 %vm6970_vm1, %v6971_v12  ;;  %v600_v26 = vmul.f32 %v5584_v30, %v590_v24 }
 0x208   : > { %5947 = vmatprep.mubr.msk.f32.mxu1 %vm6970_vm1, %v6971_v12  ;;  %6322 = vmatpush3.bf16.msra.mxu0 %v7368_v15  ;;  %v611_v58 = vadd.f32 %v5585_v31, %v601_v51 }
 0x209   : > { %v610_v4 = vadd.f32 %v5585_v31, %v600_v26  ;;  %6324 = vmatprep.subr.bf16.mxu0 %v6323_v25 }
 0x20b   : > { %5900 = vmatmul.mubr.msk.f32.gmra.mrb[2].mxu0 %vm444_vm0, %v610_v4  ;;  %5948 = vmatmul.mubr.msk.f32.vlgmr.msra.gmra.mrb[6].mxu1 %vm444_vm0, %v609_v50 }
 0x20c   : > { %5902 = vmatprep.mubr.msk.f32.mxu0 %vm6970_vm1, %v6971_v12  ;;  %5950 = vmatprep.mubr.msk.f32.mxu1 %vm6970_vm1, %v6971_v12 }
 0x20d   : > { %6326 = vmatpush3.bf16.msra.mxu0 %v6323_v25 }
 0x20e   : > { %6333 = vmatprep.subr.bf16.mxu0 %v6969_v5 }
 0x20f   : > { %5903 = vmatmul.mubr.msk.f32.gmra.mrb[4].mxu0 %vm444_vm0, %v611_v58  ;;  %5951 = vmatmul.mubr.msk.f32.gmra.mrb[8].mxu1 %vm444_vm0, %v610_v4 }
 0x210   : > { %5930 = vmatprep.mubr.msk.f32.mxu0 %vm444_vm0, %v544_v59  ;;  %5953 = vmatprep.mubr.msk.f32.mxu1 %vm6970_vm1, %v6971_v12 }
 0x213   : > { %5931 = vmatmul.mubr.msk.f32.vlgmr.msra.gmra.mrb[6].mxu0 %vm444_vm0, %v545_v6  ;;  %5954 = vmatmul.mubr.msk.f32.gmra.mrb[10].mxu1 %vm444_vm0, %v611_v58 }
 0x214   : > { %5933 = vmatprep.mubr.msk.f32.mxu0 %vm444_vm0, %v546_v2  ;;  %6335 = vmatpush3.bf16.msra.mxu0 %v7368_v15 }
 0x215   : > { %6336 = vmatprep.subr.bf16.mxu0 %v6969_v5  ;;  %5977 = vmatprep.mubr.msk.f32.mxu1 %vm6970_vm1, %v6971_v12 }
 0x217   : > { %5934 = vmatmul.mubr.msk.f32.gmra.mrb[8].mxu0 %vm444_vm0, %v547_v13 }
 0x218   : > { %5936 = vmatprep.mubr.msk.f32.mxu0 %vm444_vm0, %v548_v11  ;;  %6338 = vmatpush3.bf16.msra.mxu0 %v6323_v25 }
 0x219   : > { %6347 = vmatprep.subr.bf16.mxu0 %v6969_v5 }
 0x21b   : > { %5937 = vmatmul.mubr.msk.f32.gmra.mrb[10].mxu0 %vm444_vm0, %v549_v1 }
 0x21c   : > { %5964 = vmatprep.mubr.msk.f32.mxu0 %vm6970_vm1, %v6971_v12 }
 0x21f   : > { %5965 = vmatmul.mubr.msk.f32.vlgmr.msra.gmra.mrb[12].mxu0 %vm444_vm0, %v609_v50 }
 0x220   : > { %5967 = vmatprep.mubr.msk.f32.mxu0 %vm6970_vm1, %v6971_v12 }
 0x223   : > { %5968 = vmatmul.mubr.msk.f32.gmra.mrb[14].mxu0 %vm444_vm0, %v610_v4 }
 0x224   : > { %5970 = vmatprep.mubr.msk.f32.mxu0 %vm6970_vm1, %v6971_v12 }
 0x227   : > { %5971 = vmatmul.mubr.msk.f32.gmra.mrb[16].mxu0 %vm444_vm0, %v611_v58 }
 0x228   : > { %5991 = vmatprep.mubr.msk.f32.mxu0 %vm6970_vm1, %v6971_v12 }
 0x2d2   : > { %v5915_v15 = vpop.f32.mrb[0].mxu1 }
 0x2d3   : > { %v798_v27 = vpop.f32.mrb[1].mxu1 }
 0x2d4   : > { %v6340_v29 = vpack.c.bf16 %v5915_v15, %v798_v27  ;;  %v7448_v32 = vpack.i.bf16 %v5915_v15, %v798_v27 }
 0x2d6   : > { %v5918_v33 = vpop.f32.mrb[2].mxu1  ;;  %6342 = vmatpush3.bf16.xpose.msk.msra.mxu1 %vm7444_vm3, %v6340_v29 }
 0x2d7   : > { %v808_v34 = vpop.f32.mrb[3].mxu1  ;;  %6343 = vmatprep.subr.bf16.mxu1 %v6969_v5 }
 0x2d8   : > { %v6344_v35 = vpack.c.bf16 %v5918_v33, %v808_v34  ;;  %v7453_v36 = vpack.i.bf16 %v5918_v33, %v808_v34 }
 0x2d9   : > { %v7455_v37 = vpop.f32.mrb[0].mxu0 }
 0x2da   : > { %v5921_v38 = vpop.f32.mrb[4].mxu1  ;;  %v5898_v39 = vpop.f32.mrb[1].mxu0 }
 0x2db   : > { %v818_v42 = vpop.f32.mrb[5].mxu1 }
 0x2dc   : > { %v6348_v43 = vpack.c.bf16 %v5921_v38, %v818_v42  ;;  %v7457_v44 = vpack.i.bf16 %v5921_v38, %v818_v42 }
 0x2dd   : > { %5978 = vmatmul.mubr.msk.f32.vlgmr.msra.gmra.mrb[12].mxu1 %vm1082_vm2, %v7455_v37 }
 0x2de   : > { %v7461_v45 = vpop.f32.mrb[2].mxu0  ;;  %v7463_v46 = vpop.f32.mrb[6].mxu1  ;;  %6346 = vmatpush3.bf16.xpose.msk.msra.mxu1 %vm7444_vm3, %v6344_v35  ;;  %6350 = vmatpush3.bf16.xpose.msk.msra.mxu0 %vm7444_vm3, %v6348_v43 }
 0x2df   : > { %v5901_v47 = vpop.f32.mrb[3].mxu0  ;;  %v5949_v48 = vpop.f32.mrb[7].mxu1  ;;  %5984 = vmatprep.mubr.msk.f32.mxu1 %vm6970_vm1, %v6971_v12  ;;  %5994 = vmatprep.subr.mxu1 %v6971_v12 }
 0x2e0   : > { %5999 = vmatprep.subr.mxu0 %v6971_v12 }
 0x2e2   : > { %v7473_v49 = vpop.f32.mrb[4].mxu0  ;;  %v7475_v52 = vpop.f32.mrb[8].mxu1 }
 0x2e3   : > { %v5904_v53 = vpop.f32.mrb[5].mxu0  ;;  %v5952_v54 = vpop.f32.mrb[9].mxu1 }
 0x2e5   : > { %5985 = vmatmul.mubr.msk.f32.vlgmr.msra.gmra.mrb[14].mxu1 %vm1082_vm2, %v7461_v45  ;;  %5992 = vmatmul.mubr.msk.f32.vlgmr.msra.gmra.mrb[18].mxu0 %vm1082_vm2, %v7473_v49 }
 0x2e6   : > { %v7481_v55 = vpop.f32.mrb[6].mxu0  ;;  %v7483_v56 = vpop.f32.mrb[10].mxu1  ;;  %5995 = vmatpush3.xpose.msk.msra.mxu1 %vm1082_vm2, %v7463_v46  ;;  %6000 = vmatpush3.xpose.msk.msra.mxu0 %vm1082_vm2, %v7475_v52 }
 0x2e7   : > { %v7489_v57 = vpop.f32.mrb[7].mxu0  ;;  %v5955_v59 = vpop.f32.mrb[11].mxu1  ;;  %5996 = vmatprep.mubr.msk.f32.mxu1 %vm6970_vm1, %v6971_v12  ;;  %6001 = vmatprep.mubr.msk.f32.mxu0 %vm6970_vm1, %v6971_v12 }
 0x2e8   : > { %v7497_v60 = vpack.i.bf16 %v7481_v55, %v7489_v57  ;;  %v6352_v61 = vpack.c.bf16 %v7481_v55, %v7489_v57  ;;  %6004 = vmatprep.subr.mxu1 %v6971_v12  ;;  %6009 = vmatprep.subr.mxu0 %v6971_v12 }
 0x2e9   : > { %5997 = vmatmul.mubr.msk.f32.vlgmr.msra.gmra.mrb[16].mxu1 %vm1082_vm2, %v7455_v37  ;;  %6002 = vmatmul.mubr.msk.f32.vlgmr.msra.gmra.mrb[20].mxu0 %vm1082_vm2, %v7461_v45 }
 0x2ea   : > { %v7507_v22 = vpop.f32.mrb[8].mxu0  ;;  %6005 = vmatpush3.xpose.msk.msra.mxu1 %vm1082_vm2, %v7483_v56  ;;  %6006 = vmatprep.mubr.msk.f32.mxu1 %vm6970_vm1, %v6971_v12 }
 0x2eb   : > { %v7513_v62 = vpop.f32.mrb[9].mxu0  ;;  %6014 = vmatprep.subr.mxu1 %v6971_v12  ;;  %6011 = vmatprep.mubr.msk.f32.mxu0 %vm6970_vm1, %v6971_v12 }
 0x2ec   : > { %v7520_v63 = vpack.i.bf16 %v7507_v22, %v7513_v62  ;;  %v6355_v0 = vpack.c.bf16 %v7507_v22, %v7513_v62 }
 0x2ed   : > { %6007 = vmatmul.mubr.msk.f32.vlgmr.msra.gmra.mrb[18].mxu1 %vm1082_vm2, %v7473_v49 }
 0x2ee   : > { %v7526_v2 = vpop.f32.mrb[10].mxu0  ;;  %6016 = vmatprep.mubr.msk.f32.mxu1 %vm6970_vm1, %v6971_v12 }
 0x2ef   : > { %v7530_v3 = vpop.f32.mrb[11].mxu0 }
 0x2f0   : > { %v7534_v6 = vpack.i.bf16 %v7526_v2, %v7530_v3  ;;  %v6358_v7 = vpack.c.bf16 %v7526_v2, %v7530_v3 }
 0x2f2   : > { %v7538_v8 = vpop.f32.mrb[12].mxu0 }
 0x2f3   : > { %v5966_v9 = vpop.f32.mrb[13].mxu0  ;;  %6010 = vmatpush3.msra.mxu0 %v7538_v8 }
 0x2f4   : > { %6019 = vmatprep.subr.mxu0 %v6971_v12 }
 0x2f6   : > { %v7542_v23 = vpop.f32.mrb[14].mxu0 }
 0x2f7   : > { %v5969_v30 = vpop.f32.mrb[15].mxu0  ;;  %6015 = vmatpush3.msra.mxu1 %v7542_v23 }
 0x2f8   : > { %6354 = vmatprep.subr.bf16.mxu1 %v6969_v5 }
 0x2fa   : > { %v7546_v10 = vpop.f32.mrb[16].mxu0 }
 0x2fb   : > { %v5972_v11 = vpop.f32.mrb[17].mxu0 }
 0x3b0   : > { %v1158_v40 = vpop.f32.mrb[12].mxu1 }
 0x3b1   : > { %v5979_v13 = vpop.f32.mrb[13].mxu1  ;;  %v1540_v31 = vsel %vm1539_vm4, %v1158_v40, -inf }
 0x3b2   : > { %1541 = vmax.xlane.f32.xlu0 %v1540_v31 }
 0x3b8   : > { %v1237_v14 = vpop.f32.mrb[14].mxu1  ;;  %v1316_v16 = vpop.f32.mrb[18].mxu0 }
 0x3b9   : > { %v5986_v17 = vpop.f32.mrb[15].mxu1  ;;  %v5993_v18 = vpop.f32.mrb[19].mxu0  ;;  %v1543_v19 = vsel %vm1539_vm4, %v1237_v14, -inf  ;;  %v1546_v20 = vsel %vm1539_vm4, %v1316_v16, -inf }
 0x3ba   : > { %1544 = vmax.xlane.f32.xlu0 %v1543_v19  ;;  %1547 = vmax.xlane.f32.xlu1 %v1546_v20 }
 0x3bc   : > { %v1389_v21 = vpop.f32.mrb[16].mxu1  ;;  %v1462_v50 = vpop.f32.mrb[20].mxu0 }
 0x3bd   : > { %v5998_v1 = vpop.f32.mrb[17].mxu1  ;;  %v6003_v24 = vpop.f32.mrb[21].mxu0  ;;  %v1549_v41 = vsel %vm1082_vm2, %v1389_v21, -inf  ;;  %v1552_v25 = vsel %vm1082_vm2, %v1462_v50, -inf }
 0x3be   : > { %1550 = vmax.xlane.f32.xlu1 %v1549_v41  ;;  %1553 = vmax.xlane.f32.xlu0 %v1552_v25 }
 0x3c0   : > { %v1535_v26 = vpop.f32.mrb[18].mxu1 }
 0x3c1   : > { %v6008_v4 = vpop.f32.mrb[19].mxu1  ;;  %v1555_v51 = vsel %vm1082_vm2, %v1535_v26, -inf }
 0x3c2   : > { %1556 = vmax.xlane.f32.xlu1 %v1555_v51 }
 0x3d3   : > { %6564 = vrot.lane.b32.xlu1 %v7453_v36, %s6972_s21 }
 0x3d4   : > { %6559 = vrot.lane.b32.xlu0 %v7448_v32, %s6972_s21 }
 0x3d7   : > { %6569 = vrot.lane.b32.xlu1 %v7457_v44, %s6972_s21 }
 0x3d8   : > { %2130 = vrot.lane.b32.xlu0 %v7461_v45, %s6972_s21 }
 0x3db   : > { %2048 = vrot.lane.b32.xlu1 %v7455_v37, %s6972_s21 }
 0x3dc   : > { %2212 = vrot.lane.b32.xlu0 %v7473_v49, %s6972_s21 }
 0x3df   : > { %2294 = vrot.lane.b32.xlu1 %v7463_v46, %s6972_s21 }
 0x3e0   : > { %2442 = vrot.lane.b32.xlu0 %v7483_v56, %s6972_s21 }
 0x3e3   : > { %2368 = vrot.lane.b32.xlu1 %v7475_v52, %s6972_s21 }
 0x3e7   : > { %2577 = vrot.lane.b32.xlu1 %v7538_v8, %s6972_s21 }
 0x43f   : > { %v1542_v58 = vpop.xlane.xlu0 %1541 }
 0x447   : > { %v1545_v15 = vpop.xlane.xlu0 %1544  ;;  %v1548_v27 = vpop.xlane.xlu1 %1547 }
 0x44b   : > { %v1551_v29 = vpop.xlane.xlu1 %1550  ;;  %v1554_v33 = vpop.xlane.xlu0 %1553 }
 0x44c   : > { %v1558_v34 = vmax.f32 %v1542_v58, %v1551_v29  ;;  %v1559_v35 = vmax.f32 %v1545_v15, %v1554_v33 }
 0x44e   : > { %v1570_v38 = vsub.f32 %v1389_v21, %v1558_v34  ;;  %v1571_v39 = vsub.f32 %v1462_v50, %v1559_v35  ;;  %v1561_v54 = vsub.f32 %v1158_v40, %v1558_v34  ;;  %v1562_v9 = vsub.f32 %v1237_v14, %v1559_v35 }
 0x44f   : > { %v1557_v42 = vpop.xlane.xlu1 %1556 }
 0x450   : > { %v1573_v43 = vmul.f32 1.442695, %v1570_v38  ;;  %v1560_v47 = vmax.f32 %v1548_v27, %v1557_v42  ;;  %v1575_v48 = vmul.f32 1.442695, %v1571_v39  ;;  %v1564_v30 = vmul.f32 1.442695, %v1561_v54 }
 0x451   : > { %v1566_v13 = vmul.f32 1.442695, %v1562_v9 }
 0x452   : > { %v1572_v53 = vsub.f32 %v1535_v26, %v1560_v47  ;;  %6666 = vpow2.f32 %v1573_v43  ;;  %v1563_v11 = vsub.f32 %v1316_v16, %v1560_v47  ;;  %v6560_v16 = vpop.permute.xlu0 %6559 }
 0x453   : > { %6668 = vpow2.f32 %v1575_v48  ;;  %v6565_v40 = vpop.permute.xlu1 %6564  ;;  %v6562_v19 = vunpack.i.h.bf16 %v6560_v16  ;;  %v6561_v20 = vunpack.i.l.bf16 %v6560_v16 }
 0x454   : > { %v1577_v59 = vmul.f32 1.442695, %v1572_v53  ;;  %v1568_v31 = vmul.f32 1.442695, %v1563_v11  ;;  %v6566_v21 = vunpack.i.l.bf16 %v6565_v40 }
 0x455   : > { %v6361_v55 = vpack.c.bf16 %v6562_v19, %v6561_v20 }
 0x456   : > { %6670 = vpow2.f32 %v1577_v59  ;;  %v2131_v1 = vpop.permute.xlu0 %2130 }
 0x457   : > { %6672 = vpow2.f32 %v1564_v30  ;;  %v6570_v62 = vpop.permute.xlu1 %6569 }
 0x458   : > { %6674 = vpow2.f32 %v1566_v13  ;;  %v6572_v3 = vunpack.i.h.bf16 %v6570_v62 }
 0x459   : > { %6676 = vpow2.f32 %v1568_v31 }
 0x45a   : > { %v2213_v25 = vpop.permute.xlu0 %2212 }
 0x45b   : > { %v2049_v2 = vpop.permute.xlu1 %2048 }
 0x45c   : > { %v7574_v17 = vpop.eup %6666 }
 0x45d   : > { %6012 = vmatmul.mubr.msk.f32.vlgmr.msra.gmra.mrb[22].mxu0 %vm1082_vm2, %v7574_v17  ;;  %v7578_v18 = vpop.eup %6668 }
 0x45e   : > { %6020 = vmatpush3.msra.mxu0 %v7546_v10  ;;  %6021 = vmatprep.mubr.msk.f32.mxu0 %vm6970_vm1, %v6971_v12  ;;  %v2443_v4 = vpop.permute.xlu0 %2442 }
 0x45f   : > { %6017 = vmatmul.mubr.msk.f32.vlgmr.msra.gmra.mrb[20].mxu1 %vm1082_vm2, %v7578_v18  ;;  %6351 = vmatprep.subr.bf16.mxu0 %v6969_v5  ;;  %v2295_v41 = vpop.permute.xlu1 %2294 }
 0x460   : > { %v7586_v14 = vpop.eup %6670  ;;  %6356 = vmatpush3.bf16.msra.mxu1 %v6355_v0  ;;  %6035 = vmatprep.mubr.msk.f32.mxu1 %vm6970_vm1, %v6971_v12 }
 0x461   : > { %6022 = vmatmul.mubr.msk.f32.vlgmr.msra.gmra.mrb[24].mxu0 %vm1082_vm2, %v7586_v14  ;;  %6360 = vmatprep.subr.bf16.mxu1 %v6969_v5  ;;  %v7602_v22 = vpop.eup %6672 }
 0x462   : > { %6353 = vmatpush3.bf16.msra.mxu0 %v6352_v61  ;;  %6028 = vmatprep.mubr.msk.f32.mxu0 %vm6970_vm1, %v6971_v12  ;;  %v7606_v0 = vpop.eup %6674  ;;  %v6567_v61 = vunpack.i.h.bf16 %v6565_v40  ;;  %v1579_v20 = vsel %vm1539_vm4, %v7602_v22, 0.0 }
 0x463   : > { %6357 = vmatprep.subr.bf16.mxu0 %v6969_v5  ;;  %v7616_v57 = vpop.eup %6676  ;;  %v2369_v26 = vpop.permute.xlu1 %2368 }
 0x464   : > { %v6365_v50 = vpack.c.bf16 %v6567_v61, %v6566_v21  ;;  %v1591_v61 = vsel %vm1082_vm2, %v7578_v18, 0.0  ;;  %v1585_v21 = vsel %vm1539_vm4, %v7616_v57, 0.0 }
 0x465   : > { %6029 = vmatmul.mubr.msk.f32.vlgmr.msra.gmra.mrb[22].mxu0 %vm1539_vm4, %v7602_v22  ;;  %v1594_v22 = vsel %vm1082_vm2, %v7586_v14, 0.0 }
 0x466   : > { %6359 = vmatpush3.bf16.msra.mxu0 %v6358_v7  ;;  %6042 = vmatprep.mubr.msk.f32.mxu0 %vm6970_vm1, %v6971_v12  ;;  %v6571_v7 = vunpack.i.l.bf16 %v6570_v62  ;;  %v1588_v62 = vsel %vm1082_vm2, %v7574_v17, 0.0 }
 0x467   : > { %6036 = vmatmul.mubr.msk.f32.vlgmr.msra.gmra.mrb[20].mxu1 %vm1539_vm4, %v7606_v0  ;;  %6364 = vmatprep.subr.bf16.mxu0 %v6969_v5  ;;  %v2578_v51 = vpop.permute.xlu1 %2577 }
 0x468   : > { %6049 = vmatprep.mubr.msk.f32.mxu1 %vm6970_vm1, %v6971_v12  ;;  %v6369_v24 = vpack.c.bf16 %v6572_v3, %v6571_v7 }
 0x469   : > { %6363 = vmatpush3.bf16.xpose.msk.msra.mxu1 %vm7444_vm3, %v6361_v55  ;;  %6043 = vmatmul.mubr.msk.f32.vlgmr.msra.gmra.mrb[24].mxu0 %vm1539_vm4, %v7616_v57  ;;  %v1582_v55 = vsel %vm1539_vm4, %v7606_v0, 0.0 }
 0x46a   : > { %6368 = vmatprep.subr.bf16.mxu1 %v6969_v5  ;;  %6056 = vmatprep.mubr.msk.f32.mxu0 %vm6970_vm1, %v6971_v12 }
 0x46f   : > { %6367 = vmatpush3.bf16.xpose.msk.msra.mxu0 %vm7444_vm3, %v6365_v50 }
 0x470   : > { %6050 = vmatmul.mubr.msk.f32.vlgmr.msra.gmra.mrb[22].mxu1 %vm1082_vm2, %v2049_v2  ;;  %6066 = vmatprep.subr.mxu0 %v6971_v12 }
 0x471   : > { %6371 = vmatpush3.bf16.xpose.msk.msra.mxu1 %vm7444_vm3, %v6369_v24  ;;  %6063 = vmatprep.mubr.msk.f32.mxu1 %vm6970_vm1, %v6971_v12 }
 0x472   : > { %6071 = vmatprep.subr.mxu1 %v6971_v12 }
 0x476   : > { %6057 = vmatmul.mubr.msk.f32.vlgmr.msra.gmra.mrb[26].mxu0 %vm1082_vm2, %v2131_v1 }
 0x477   : > { %6067 = vmatpush3.xpose.msk.msra.mxu0 %vm1082_vm2, %v2295_v41  ;;  %6068 = vmatprep.mubr.msk.f32.mxu0 %vm6970_vm1, %v6971_v12 }
 0x478   : > { %6064 = vmatmul.mubr.msk.f32.vlgmr.msra.gmra.mrb[24].mxu1 %vm1082_vm2, %v2213_v25  ;;  %6076 = vmatprep.subr.mxu0 %v6971_v12 }
 0x479   : > { %6072 = vmatpush3.xpose.msk.msra.mxu1 %vm1082_vm2, %v2369_v26  ;;  %6073 = vmatprep.mubr.msk.f32.mxu1 %vm6970_vm1, %v6971_v12 }
 0x47a   : > { %6069 = vmatmul.mubr.msk.f32.vlgmr.msra.gmra.mrb[28].mxu0 %vm1082_vm2, %v2049_v2  ;;  %6081 = vmatprep.subr.mxu1 %v6971_v12 }
 0x47b   : > { %6077 = vmatpush3.xpose.msk.msra.mxu0 %vm1082_vm2, %v2443_v4  ;;  %6078 = vmatprep.mubr.msk.f32.mxu0 %vm6970_vm1, %v6971_v12 }
 0x47c   : > { %6074 = vmatmul.mubr.msk.f32.vlgmr.msra.gmra.mrb[26].mxu1 %vm1082_vm2, %v2131_v1  ;;  %6086 = vmatprep.subr.mxu0 %v6971_v12 }
 0x47d   : > { %6082 = vmatpush3.msra.mxu1 %v2578_v51  ;;  %6083 = vmatprep.mubr.msk.f32.mxu1 %vm6970_vm1, %v6971_v12 }
 0x47e   : > { %6079 = vmatmul.mubr.msk.f32.vlgmr.msra.gmra.mrb[30].mxu0 %vm1082_vm2, %v2213_v25  ;;  %6091 = vmatprep.subr.mxu1 %v6971_v12 }
 0x47f   : > { %6088 = vmatprep.mubr.msk.f32.mxu0 %vm6970_vm1, %v6971_v12 }
 0x538   : > { %v7658_v58 = vpop.f32.mrb[22].mxu0 }
 0x539   : > { %v6030_v15 = vpop.f32.mrb[23].mxu0 }
 0x53a   : > { %v7660_v27 = vpop.f32.mrb[20].mxu1 }
 0x53b   : > { %v6037_v29 = vpop.f32.mrb[21].mxu1 }
 0x53c   : > { %v7662_v33 = vpop.f32.mrb[24].mxu0 }
 0x53d   : > { %v6044_v34 = vpop.f32.mrb[25].mxu0 }
 0x543   : > { %v2126_v35 = vpop.f32.mrb[22].mxu1 }
 0x544   : > { %v6051_v38 = vpop.f32.mrb[23].mxu1  ;;  %v2516_v39 = vsel %vm1539_vm4, %v2126_v35, -inf }
 0x545   : > { %2517 = vmax.xlane.f32.xlu1 %v2516_v39 }
 0x549   : > { %v2208_v42 = vpop.f32.mrb[26].mxu0 }
 0x54a   : > { %v6058_v43 = vpop.f32.mrb[27].mxu0  ;;  %v2519_v47 = vsel %vm1539_vm4, %v2208_v42, -inf }
 0x54b   : > { %v2290_v48 = vpop.f32.mrb[24].mxu1  ;;  %2520 = vmax.xlane.f32.xlu0 %v2519_v47 }
 0x54c   : > { %v6065_v53 = vpop.f32.mrb[25].mxu1  ;;  %v2522_v9 = vsel %vm1539_vm4, %v2290_v48, -inf }
 0x54d   : > { %v2364_v54 = vpop.f32.mrb[28].mxu0 }
 0x54e   : > { %v6070_v59 = vpop.f32.mrb[29].mxu0  ;;  %v2525_v16 = vsel %vm1082_vm2, %v2364_v54, -inf }
 0x54f   : > { %v2438_v30 = vpop.f32.mrb[26].mxu1  ;;  %2523 = vmax.xlane.f32.xlu0 %v2522_v9 }
 0x550   : > { %v6075_v11 = vpop.f32.mrb[27].mxu1  ;;  %v2528_v13 = vsel %vm1082_vm2, %v2438_v30, -inf }
 0x551   : > { %2529 = vmax.xlane.f32.xlu1 %v2528_v13  ;;  %v2512_v31 = vpop.f32.mrb[30].mxu0 }
 0x552   : > { %v6080_v40 = vpop.f32.mrb[31].mxu0  ;;  %v2531_v19 = vsel %vm1082_vm2, %v2512_v31, -inf }
 0x553   : > { %2526 = vmax.xlane.f32.xlu0 %v2525_v16 }
 0x557   : > { %2532 = vmax.xlane.f32.xlu0 %v2531_v19 }
 0x562   : > { %2731 = vrot.lane.b32.xlu1 %v7546_v10, %s6972_s21 }
 0x566   : > { %6574 = vrot.lane.b32.xlu1 %v7497_v60, %s6972_s21 }
 0x56a   : > { %6579 = vrot.lane.b32.xlu1 %v7520_v63, %s6972_s21 }
 0x56d   : > { %2654 = vrot.lane.b32.xlu0 %v7542_v23, %s6972_s21 }
 0x571   : > { %6584 = vrot.lane.b32.xlu0 %v7534_v6, %s6972_s21 }
 0x58e   : > { %1580 = vadd.xlane.f32.xlu1 %v1579_v20 }
 0x590   : > { %1589 = vadd.xlane.f32.xlu0 %v1588_v62 }
 0x592   : > { %1583 = vadd.xlane.f32.xlu1 %v1582_v55 }
 0x594   : > { %1592 = vadd.xlane.f32.xlu0 %v1591_v61 }
 0x596   : > { %1586 = vadd.xlane.f32.xlu1 %v1585_v21 }
 0x598   : > { %1595 = vadd.xlane.f32.xlu0 %v1594_v22 }
 0x5a7   : > { %6589 = vrot.lane.b32.xlu1 %v7448_v32, %s6973_s29 }
 0x5d2   : > { %v2518_v2 = vpop.xlane.xlu1 %2517 }
 0x5d8   : > { %v2521_v17 = vpop.xlane.xlu0 %2520 }
 0x5dc   : > { %v2524_v0 = vpop.xlane.xlu0 %2523 }
 0x5de   : > { %v2530_v3 = vpop.xlane.xlu1 %2529 }
 0x5df   : > { %v2535_v7 = vmax.f32 %v2521_v17, %v2530_v3 }
 0x5e0   : > { %v2527_v50 = vpop.xlane.xlu0 %2526 }
 0x5e1   : > { %v2547_v18 = vsub.f32 %v2438_v30, %v2535_v7  ;;  %v2534_v1 = vmax.f32 %v2518_v2, %v2527_v50  ;;  %v2538_v24 = vsub.f32 %v2208_v42, %v2535_v7  ;;  %v2047_v2 = vld [vmem:[#allocation10] sm:$0xff] }
 0x5e2   : > { %v2732_v41 = vpop.permute.xlu1 %2731 }
 0x5e3   : > { %v2551_v57 = vmul.f32 1.442695, %v2547_v18  ;;  %v2537_v25 = vsub.f32 %v2126_v35, %v2534_v1  ;;  %v2546_v26 = vsub.f32 %v2364_v54, %v2534_v1  ;;  %v2542_v29 = vmul.f32 1.442695, %v2538_v24 }
 0x5e4   : > { %v2533_v4 = vpop.xlane.xlu0 %2532 }
 0x5e5   : > { %v2540_v14 = vmul.f32 1.442695, %v2537_v25  ;;  %v2549_v51 = vmul.f32 1.442695, %v2546_v26  ;;  %v2536_v15 = vmax.f32 %v2524_v0, %v2533_v4  ;;  %6678 = vpow2.f32 %v2551_v57 }
 0x5e6   : > { %v6575_v34 = vpop.permute.xlu1 %6574 }
 0x5e7   : > { %6680 = vpow2.f32 %v2540_v14  ;;  %v2539_v38 = vsub.f32 %v2290_v48, %v2536_v15  ;;  %v2548_v39 = vsub.f32 %v2512_v31, %v2536_v15  ;;  %v6577_v11 = vunpack.i.h.bf16 %v6575_v34 }
 0x5e8   : > { %6682 = vpow2.f32 %v2549_v51  ;;  %v2655_v43 = vpop.permute.xlu0 %2654  ;;  %v6576_v13 = vunpack.i.l.bf16 %v6575_v34 }
 0x5e9   : > { %v2544_v47 = vmul.f32 1.442695, %v2539_v38  ;;  %6087 = vmatpush3.msra.mxu0 %v2655_v43  ;;  %6684 = vpow2.f32 %v2542_v29  ;;  %v2553_v42 = vmul.f32 1.442695, %v2548_v39 }
 0x5ea   : > { %v6580_v53 = vpop.permute.xlu1 %6579  ;;  %6375 = vmatprep.subr.bf16.mxu0 %v6969_v5  ;;  %v6373_v55 = vpack.c.bf16 %v6577_v11, %v6576_v13 }
 0x5eb   : > { %6686 = vpow2.f32 %v2544_v47  ;;  %v6582_v35 = vunpack.i.h.bf16 %v6580_v53  ;;  %v6581_v54 = vunpack.i.l.bf16 %v6580_v53 }
 0x5ec   : > { %6688 = vpow2.f32 %v2553_v42  ;;  %v6585_v40 = vpop.permute.xlu0 %6584 }
 0x5ed   : > { %v6376_v59 = vpack.c.bf16 %v6582_v35, %v6581_v54  ;;  %v6587_v61 = vunpack.i.h.bf16 %v6585_v40  ;;  %v6586_v21 = vunpack.i.l.bf16 %v6585_v40 }
 0x5ef   : > { %v6679_v9 = vpop.eup %6678  ;;  %v6379_v0 = vpack.c.bf16 %v6587_v61, %v6586_v21 }
 0x5f0   : > { %6089 = vmatmul.mubr.msk.f32.vlgmr.msra.gmra.mrb[32].mxu0 %vm1082_vm2, %v6679_v9  ;;  %v2567_v3 = vsel %vm1082_vm2, %v6679_v9, 0.0 }
 0x5f1   : > { %v6681_v30 = vpop.eup %6680  ;;  %6377 = vmatpush3.bf16.msra.mxu0 %v6376_v59  ;;  %6107 = vmatprep.mubr.msk.f32.mxu0 %vm6970_vm1, %v6971_v12 }
 0x5f2   : > { %v6683_v48 = vpop.eup %6682  ;;  %v2555_v31 = vsel %vm1539_vm4, %v6681_v30, 0.0  ;;  %6128 = vmatprep.subr.mxu0 %v6971_v12 }
 0x5f3   : > { %6084 = vmatmul.mubr.msk.f32.vlgmr.msra.gmra.mrb[28].mxu1 %vm1082_vm2, %v6683_v48  ;;  %2556 = vadd.xlane.f32.xlu1 %v2555_v31  ;;  %v2564_v16 = vsel %vm1082_vm2, %v6683_v48, 0.0  ;;  %v6685_v19 = vpop.eup %6684 }
 0x5f4   : > { %6092 = vmatpush3.msra.mxu1 %v2732_v41  ;;  %2565 = vadd.xlane.f32.xlu0 %v2564_v16  ;;  %v2558_v17 = vsel %vm1539_vm4, %v6685_v19, 0.0 }
 0x5f5   : > { %v6687_v20 = vpop.eup %6686  ;;  %6093 = vmatprep.mubr.msk.f32.mxu1 %vm6970_vm1, %v6971_v12  ;;  %6372 = vmatprep.subr.bf16.mxu1 %v6969_v5 }
 0x5f6   : > { %v6689_v62 = vpop.eup %6688  ;;  %v2561_v22 = vsel %vm1539_vm4, %v6687_v20, 0.0 }
 0x5f7   : > { %6094 = vmatmul.mubr.msk.f32.vlgmr.msra.gmra.mrb[30].mxu1 %vm1082_vm2, %v6689_v62  ;;  %2562 = vadd.xlane.f32.xlu1 %v2561_v22  ;;  %v2570_v7 = vsel %vm1082_vm2, %v6689_v62, 0.0 }
 0x5f8   : > { %6374 = vmatpush3.bf16.msra.mxu1 %v6373_v55  ;;  %2559 = vadd.xlane.f32.xlu0 %v2558_v17 }
 0x5f9   : > { %6108 = vmatmul.mubr.msk.f32.vlgmr.msra.gmra.mrb[32].mxu0 %vm1539_vm4, %v6685_v19  ;;  %6100 = vmatprep.mubr.msk.f32.mxu1 %vm6970_vm1, %v6971_v12 }
 0x5fa   : > { %6378 = vmatprep.subr.bf16.mxu1 %v6969_v5  ;;  %6129 = vmatpush3.msra.mxu0 %v2047_v2 }
 0x5fb   : > { %6101 = vmatmul.mubr.msk.f32.vlgmr.msra.gmra.mrb[28].mxu1 %vm1539_vm4, %v6681_v30  ;;  %6130 = vmatprep.mubr.msk.f32.mxu0 %vm6970_vm1, %v6971_v12 }
 0x5fc   : > { %6380 = vmatpush3.bf16.msra.mxu1 %v6379_v0  ;;  %2568 = vadd.xlane.f32.xlu0 %v2567_v3 }
 0x5fd   : > { %6114 = vmatprep.mubr.msk.f32.mxu1 %vm6970_vm1, %v6971_v12  ;;  %6389 = vmatprep.subr.bf16.mxu0 %v6969_v5 }
 0x5fe   : > { %6117 = vmatprep.subr.mxu1 %v6971_v12 }
 0x5ff   : > { %6115 = vmatmul.mubr.msk.f32.vlgmr.msra.gmra.mrb[30].mxu1 %vm1539_vm4, %v6687_v20 }
 0x600   : > { %2571 = vadd.xlane.f32.xlu0 %v2570_v7  ;;  %6119 = vmatprep.mubr.msk.f32.mxu1 %vm6970_vm1, %v6971_v12 }
 0x608   : > { %3238 = vrot.lane.b32.xlu1 %v7455_v37, %s6973_s29 }
 0x60c   : > { %6599 = vrot.lane.b32.xlu1 %v7457_v44, %s6973_s29 }
 0x610   : > { %3320 = vrot.lane.b32.xlu1 %v7461_v45, %s6973_s29 }
 0x614   : > { %3402 = vrot.lane.b32.xlu1 %v7473_v49, %s6973_s29 }
 0x616   : > { %6594 = vrot.lane.b32.xlu0 %v7453_v36, %s6973_s29 }
 0x618   : > { %3632 = vrot.lane.b32.xlu1 %v7483_v56, %s6973_s29 }
 0x61a   : > { %3484 = vrot.lane.b32.xlu0 %v7463_v46, %s6973_s29 }
 0x61b   : > { %v1581_v50 = vpop.xlane.xlu1 %1580 }
 0x61d   : > { %v1590_v18 = vpop.xlane.xlu0 %1589 }
 0x61e   : > { %3558 = vrot.lane.b32.xlu0 %v7475_v52, %s6973_s29  ;;  %v1597_v1 = vadd.f32 %v1590_v18, %v1581_v50 }
 0x61f   : > { %v1584_v24 = vpop.xlane.xlu1 %1583 }
 0x620   : > { %6690 = vrcp.f32 %v1597_v1 }
 0x621   : > { %v1593_v41 = vpop.xlane.xlu0 %1592 }
 0x622   : > { %v1598_v57 = vadd.f32 %v1593_v41, %v1584_v24 }
 0x623   : > { %v1587_v25 = vpop.xlane.xlu1 %1586 }
 0x624   : > { %6692 = vrcp.f32 %v1598_v57 }
 0x625   : > { %v1596_v26 = vpop.xlane.xlu0 %1595 }
 0x626   : > { %v1599_v4 = vadd.f32 %v1596_v26, %v1587_v25 }
 0x627   : > { %v6590_v39 = vpop.permute.xlu1 %6589 }
 0x628   : > { %6694 = vrcp.f32 %v1599_v4  ;;  %v6592_v19 = vunpack.i.h.bf16 %v6590_v39  ;;  %v6591_v20 = vunpack.i.l.bf16 %v6590_v39 }
 0x62a   : > { %v6691_v14 = vpop.eup %6690  ;;  %v6382_v2 = vpack.c.bf16 %v6592_v19, %v6591_v20 }
 0x62b   : > { %v2044_v51 = vmul.f32 %v6691_v14, %v7658_v58  ;;  %v3059_v58 = vld [vmem:[#allocation10 + $0x8] sm:$0xff] }
 0x62c   : > { %6118 = vmatpush3.msra.mxu1 %v3059_v58 }
 0x62d   : > { %6131 = vmatmul.mubr.msk.f32.vlgmr.msra.gmra.mrb[34].mxu0 %vm1082_vm2, %v2044_v51  ;;  %6381 = vmatprep.subr.bf16.mxu1 %v6969_v5 }
 0x62e   : > { %v6693_v15 = vpop.eup %6692  ;;  %6133 = vmatprep.mubr.msk.f32.mxu0 %vm6970_vm1, %v6971_v12 }
 0x62f   : > { %v2045_v29 = vmul.f32 %v6693_v15, %v7660_v27 }
 0x631   : > { %6134 = vmatmul.mubr.msk.f32.gmra.mrb[36].mxu0 %vm1082_vm2, %v2045_v29 }
 0x632   : > { %v6695_v34 = vpop.eup %6694  ;;  %6136 = vmatprep.mubr.msk.f32.mxu0 %vm6970_vm1, %v6971_v12 }
 0x633   : > { %v2046_v38 = vmul.f32 %v6695_v34, %v7662_v33 }
 0x635   : > { %6137 = vmatmul.mubr.msk.f32.gmra.mrb[38].mxu0 %vm1082_vm2, %v2046_v38 }
 0x636   : > { %6157 = vmatprep.mubr.msk.f32.mxu0 %vm6970_vm1, %v6971_v12 }
 0x680   : > { %v2557_v43 = vpop.xlane.xlu1 %2556 }
 0x681   : > { %v2566_v30 = vpop.xlane.xlu0 %2565 }
 0x682   : > { %v2573_v13 = vadd.f32 %v2566_v30, %v2557_v43 }
 0x684   : > { %v2563_v27 = vpop.xlane.xlu1 %2562  ;;  %6696 = vrcp.f32 %v2573_v13 }
 0x685   : > { %v2560_v48 = vpop.xlane.xlu0 %2559 }
 0x688   : > { %v7753_v47 = vpop.permute.xlu1 %3238 }
 0x689   : > { %v2569_v11 = vpop.xlane.xlu0 %2568 }
 0x68a   : > { %v2574_v40 = vadd.f32 %v2569_v11, %v2560_v48 }
 0x68c   : > { %v6600_v42 = vpop.permute.xlu1 %6599  ;;  %6698 = vrcp.f32 %v2574_v40 }
 0x68d   : > { %v6602_v53 = vunpack.i.h.bf16 %v6600_v42  ;;  %v6601_v35 = vunpack.i.l.bf16 %v6600_v42  ;;  %v2572_v31 = vpop.xlane.xlu0 %2571 }
 0x68e   : > { %v2575_v16 = vadd.f32 %v2572_v31, %v2563_v27  ;;  %v6697_v61 = vpop.eup %6696 }
 0x68f   : > { %v6390_v54 = vpack.c.bf16 %v6602_v53, %v6601_v35 }
 0x690   : > { %v3321_v59 = vpop.permute.xlu1 %3320  ;;  %6700 = vrcp.f32 %v2575_v16 }
 0x691   : > { %6392 = vmatpush3.bf16.xpose.msk.msra.mxu0 %vm7444_vm3, %v6390_v54  ;;  %v6595_v24 = vpop.permute.xlu0 %6594 }
 0x692   : > { %6170 = vmatprep.subr.mxu0 %v6971_v12  ;;  %v6597_v41 = vunpack.i.h.bf16 %v6595_v24  ;;  %v6596_v57 = vunpack.i.l.bf16 %v6595_v24 }
 0x694   : > { %v3403_v33 = vpop.permute.xlu1 %3402  ;;  %v6386_v25 = vpack.c.bf16 %v6597_v41, %v6596_v57 }
 0x695   : > { %v3485_v26 = vpop.permute.xlu0 %3484 }
 0x696   : > { %v6699_v0 = vpop.eup %6698 }
 0x698   : > { %v3633_v9 = vpop.permute.xlu1 %3632  ;;  %6158 = vmatmul.mubr.msk.f32.vlgmr.msra.gmra.mrb[40].mxu0 %vm1082_vm2, %v3403_v33 }
 0x699   : > { %6171 = vmatpush3.xpose.msk.msra.mxu0 %vm1082_vm2, %v3633_v9  ;;  %6172 = vmatprep.mubr.msk.f32.mxu0 %vm6970_vm1, %v6971_v12  ;;  %v3559_v4 = vpop.permute.xlu0 %3558 }
 0x69a   : > { %6180 = vmatprep.subr.mxu0 %v6971_v12  ;;  %v6701_v3 = vpop.eup %6700 }
 0x69c   : > { %6173 = vmatmul.mubr.msk.f32.vlgmr.msra.gmra.mrb[42].mxu0 %vm1082_vm2, %v3403_v33 }
 0x69d   : > { %6182 = vmatprep.mubr.msk.f32.mxu0 %vm6970_vm1, %v6971_v12 }
 0x6cc   : > { %v2965_v62 = vpop.f32.mrb[32].mxu0 }
 0x6cd   : > { %v6109_v55 = vpop.f32.mrb[33].mxu0  ;;  %v3057_v50 = vmul.f32 %v6699_v0, %v2965_v62 }
 0x6ce   : > { %v2884_v21 = vpop.f32.mrb[28].mxu1 }
 0x6cf   : > { %v3056_v22 = vmul.f32 %v6697_v61, %v2884_v21  ;;  %v6102_v17 = vpop.f32.mrb[29].mxu1 }
 0x6d1   : > { %6120 = vmatmul.mubr.msk.f32.vlgmr.msra.gmra.mrb[32].mxu1 %vm1082_vm2, %v3056_v22 }
 0x6d2   : > { %6384 = vmatpush3.bf16.xpose.msk.msra.mxu1 %vm7444_vm3, %v6382_v2  ;;  %v3046_v7 = vpop.f32.mrb[30].mxu1  ;;  %6122 = vmatprep.mubr.msk.f32.mxu1 %vm6970_vm1, %v6971_v12 }
 0x6d3   : > { %v3058_v18 = vmul.f32 %v6701_v3, %v3046_v7  ;;  %v6116_v1 = vpop.f32.mrb[31].mxu1  ;;  %6385 = vmatprep.subr.bf16.mxu1 %v6969_v5 }
 0x6d5   : > { %6123 = vmatmul.mubr.msk.f32.gmra.mrb[34].mxu1 %vm1082_vm2, %v3057_v50 }
 0x6d6   : > { %6125 = vmatprep.mubr.msk.f32.mxu1 %vm6970_vm1, %v6971_v12 }
 0x6d9   : > { %6126 = vmatmul.mubr.msk.f32.gmra.mrb[36].mxu1 %vm1082_vm2, %v3058_v18 }
 0x6da   : > { %6143 = vmatprep.mubr.msk.f32.mxu1 %vm6970_vm1, %v6971_v12 }
 0x6dd   : > { %6144 = vmatmul.mubr.msk.f32.vlgmr.msra.gmra.mrb[38].mxu1 %vm1082_vm2, %v7753_v47 }
 0x6de   : > { %6388 = vmatpush3.bf16.xpose.msk.msra.mxu1 %vm7444_vm3, %v6386_v25  ;;  %6150 = vmatprep.mubr.msk.f32.mxu1 %vm6970_vm1, %v6971_v12 }
 0x6df   : > { %6160 = vmatprep.subr.mxu1 %v6971_v12 }
 0x6e5   : > { %6151 = vmatmul.mubr.msk.f32.vlgmr.msra.gmra.mrb[40].mxu1 %vm1082_vm2, %v3321_v59 }
 0x6e6   : > { %6161 = vmatpush3.xpose.msk.msra.mxu1 %vm1082_vm2, %v3485_v26  ;;  %6162 = vmatprep.mubr.msk.f32.mxu1 %vm6970_vm1, %v6971_v12 }
 0x6e7   : > { %6165 = vmatprep.subr.mxu1 %v6971_v12 }
 0x6e9   : > { %6163 = vmatmul.mubr.msk.f32.vlgmr.msra.gmra.mrb[42].mxu1 %vm1082_vm2, %v7753_v47 }
 0x6ea   : > { %6166 = vmatpush3.xpose.msk.msra.mxu1 %vm1082_vm2, %v3559_v4  ;;  %6167 = vmatprep.mubr.msk.f32.mxu1 %vm6970_vm1, %v6971_v12 }
 0x6eb   : > { %6175 = vmatprep.subr.mxu1 %v6971_v12 }
 0x6ed   : > { %6168 = vmatmul.mubr.msk.f32.vlgmr.msra.gmra.mrb[44].mxu1 %vm1082_vm2, %v3321_v59 }
 0x6ee   : > { %6177 = vmatprep.mubr.msk.f32.mxu1 %vm6970_vm1, %v6971_v12 }
 0x76b   : > { %v3480_v14 = vpop.f32.mrb[40].mxu0 }
 0x76c   : > { %v6159_v51 = vpop.f32.mrb[41].mxu0  ;;  %v3712_v15 = vsel %vm1539_vm4, %v3480_v14, -inf }
 0x76d   : > { %3713 = vmax.xlane.f32.xlu0 %v3712_v15 }
 0x76f   : > { %v3702_v29 = vpop.f32.mrb[42].mxu0 }
 0x770   : > { %v6174_v34 = vpop.f32.mrb[43].mxu0  ;;  %v3721_v38 = vsel %vm1082_vm2, %v3702_v29, -inf }
 0x771   : > { %3722 = vmax.xlane.f32.xlu1 %v3721_v38 }
 0x7a4   : > { %v7801_v58 = vpop.f32.mrb[32].mxu1 }
 0x7a5   : > { %v6121_v39 = vpop.f32.mrb[33].mxu1 }
 0x7a8   : > { %v7803_v43 = vpop.f32.mrb[34].mxu1 }
 0x7a9   : > { %v6124_v27 = vpop.f32.mrb[35].mxu1 }
 0x7ac   : > { %v7805_v47 = vpop.f32.mrb[36].mxu1 }
 0x7ad   : > { %v6127_v42 = vpop.f32.mrb[37].mxu1 }
 0x7b0   : > { %v3316_v53 = vpop.f32.mrb[38].mxu1 }
 0x7b1   : > { %v6145_v35 = vpop.f32.mrb[39].mxu1  ;;  %v3706_v54 = vsel %vm1539_vm4, %v3316_v53, -inf }
 0x7b2   : > { %3707 = vmax.xlane.f32.xlu0 %v3706_v54 }
 0x7b8   : > { %v3398_v59 = vpop.f32.mrb[40].mxu1 }
 0x7b9   : > { %v6152_v33 = vpop.f32.mrb[41].mxu1  ;;  %v3709_v9 = vsel %vm1539_vm4, %v3398_v59, -inf }
 0x7ba   : > { %3710 = vmax.xlane.f32.xlu0 %v3709_v9 }
 0x7bc   : > { %v3554_v30 = vpop.f32.mrb[42].mxu1 }
 0x7bd   : > { %v6164_v48 = vpop.f32.mrb[43].mxu1  ;;  %v3715_v11 = vsel %vm1082_vm2, %v3554_v30, -inf }
 0x7be   : > { %3716 = vmax.xlane.f32.xlu1 %v3715_v11 }
 0x7c0   : > { %v3628_v13 = vpop.f32.mrb[44].mxu1 }
 0x7c1   : > { %v6169_v31 = vpop.f32.mrb[45].mxu1  ;;  %v3718_v40 = vsel %vm1082_vm2, %v3628_v13, -inf }
 0x7c2   : > { %3719 = vmax.xlane.f32.xlu0 %v3718_v40 }
 0x7cf   : > { %3842 = vrot.lane.b32.xlu1 %v7542_v23, %s6973_s29 }
 0x7d3   : > { %3918 = vrot.lane.b32.xlu1 %v7546_v10, %s6973_s29 }
 0x7d7   : > { %6604 = vrot.lane.b32.xlu1 %v7497_v60, %s6973_s29 }
 0x7d8   : > { %3766 = vrot.lane.b32.xlu0 %v7538_v8, %s6973_s29 }
 0x7db   : > { %6614 = vrot.lane.b32.xlu1 %v7534_v6, %s6973_s29 }
 0x7dc   : > { %6609 = vrot.lane.b32.xlu0 %v7520_v63, %s6973_s29 }
 0x7fa   : > { %v3714_v16 = vpop.xlane.xlu0 %3713 }
 0x7fe   : > { %v3723_v19 = vpop.xlane.xlu1 %3722 }
 0x7ff   : > { %v3726_v20 = vmax.f32 %v3714_v16, %v3723_v19 }
 0x801   : > { %v3729_v62 = vsub.f32 %v3480_v14, %v3726_v20  ;;  %v3738_v55 = vsub.f32 %v3702_v29, %v3726_v20 }
 0x803   : > { %v3734_v61 = vmul.f32 1.442695, %v3729_v62  ;;  %v3743_v21 = vmul.f32 1.442695, %v3738_v55 }
 0x805   : > { %6702 = vpow2.f32 %v3734_v61 }
 0x806   : > { %6704 = vpow2.f32 %v3743_v21 }
 0x80f   : > { %v7823_v22 = vpop.eup %6702 }
 0x810   : > { %v6705_v17 = vpop.eup %6704  ;;  %v3751_v2 = vsel %vm1539_vm4, %v7823_v22, 0.0 }
 0x811   : > { %v3760_v0 = vsel %vm1082_vm2, %v6705_v17, 0.0  ;;  %3752 = vadd.xlane.f32.xlu0 %v3751_v2 }
 0x812   : > { %3761 = vadd.xlane.f32.xlu1 %v3760_v0 }
 0x83f   : > { %v3708_v3 = vpop.xlane.xlu0 %3707 }
 0x847   : > { %v3711_v7 = vpop.xlane.xlu0 %3710 }
 0x84b   : > { %v3717_v50 = vpop.xlane.xlu1 %3716 }
 0x84c   : > { %v3724_v18 = vmax.f32 %v3708_v3, %v3717_v50 }
 0x84e   : > { %v3727_v1 = vsub.f32 %v3316_v53, %v3724_v18  ;;  %v3736_v24 = vsub.f32 %v3554_v30, %v3724_v18 }
 0x84f   : > { %v3720_v41 = vpop.xlane.xlu0 %3719  ;;  %v3843_v57 = vpop.permute.xlu1 %3842 }
 0x850   : > { %v3730_v25 = vmul.f32 1.442695, %v3727_v1  ;;  %v3739_v26 = vmul.f32 1.442695, %v3736_v24  ;;  %v3725_v4 = vmax.f32 %v3711_v7, %v3720_v41  ;;  %6181 = vmatpush3.msra.mxu0 %v3843_v57 }
 0x851   : > { %6396 = vmatprep.subr.bf16.mxu0 %v6969_v5 }
 0x852   : > { %6706 = vpow2.f32 %v3730_v25  ;;  %v3728_v14 = vsub.f32 %v3398_v59, %v3725_v4  ;;  %v3737_v51 = vsub.f32 %v3628_v13, %v3725_v4 }
 0x853   : > { %6708 = vpow2.f32 %v3739_v26  ;;  %v3767_v15 = vpop.permute.xlu0 %3766  ;;  %v3919_v29 = vpop.permute.xlu1 %3918 }
 0x854   : > { %v3732_v34 = vmul.f32 1.442695, %v3728_v14  ;;  %v3741_v38 = vmul.f32 1.442695, %v3737_v51  ;;  %6176 = vmatpush3.msra.mxu1 %v3767_v15 }
 0x855   : > { %6185 = vmatprep.subr.mxu1 %v6971_v12 }
 0x856   : > { %6710 = vpow2.f32 %v3732_v34 }
 0x857   : > { %6712 = vpow2.f32 %v3741_v38  ;;  %v6605_v39 = vpop.permute.xlu1 %6604  ;;  %v6610_v27 = vpop.permute.xlu0 %6609 }
 0x858   : > { %v6612_v53 = vunpack.i.h.bf16 %v6610_v27  ;;  %v6611_v35 = vunpack.i.l.bf16 %v6610_v27  ;;  %v6607_v33 = vunpack.i.h.bf16 %v6605_v39  ;;  %v6606_v9 = vunpack.i.l.bf16 %v6605_v39 }
 0x85a   : > { %v6397_v13 = vpack.c.bf16 %v6612_v53, %v6611_v35  ;;  %v6394_v40 = vpack.c.bf16 %v6607_v33, %v6606_v9 }
 0x85b   : > { %v6615_v30 = vpop.permute.xlu1 %6614 }
 0x85c   : > { %v6707_v42 = vpop.eup %6706  ;;  %v6617_v16 = vunpack.i.h.bf16 %v6615_v30  ;;  %v6616_v19 = vunpack.i.l.bf16 %v6615_v30 }
 0x85d   : > { %v6709_v54 = vpop.eup %6708  ;;  %v3745_v59 = vsel %vm1539_vm4, %v6707_v42, 0.0 }
 0x85e   : > { %6178 = vmatmul.mubr.msk.f32.vlgmr.msra.gmra.mrb[46].mxu1 %vm1082_vm2, %v6709_v54  ;;  %v3754_v48 = vsel %vm1082_vm2, %v6709_v54, 0.0  ;;  %3746 = vadd.xlane.f32.xlu0 %v3745_v59  ;;  %v6400_v62 = vpack.c.bf16 %v6617_v16, %v6616_v19 }
 0x85f   : > { %6186 = vmatpush3.msra.mxu1 %v3919_v29  ;;  %3755 = vadd.xlane.f32.xlu1 %v3754_v48 }
 0x860   : > { %v6711_v11 = vpop.eup %6710  ;;  %6187 = vmatprep.mubr.msk.f32.mxu1 %vm6970_vm1, %v6971_v12  ;;  %6393 = vmatprep.subr.bf16.mxu1 %v6969_v5 }
 0x861   : > { %v6713_v31 = vpop.eup %6712  ;;  %v3748_v20 = vsel %vm1539_vm4, %v6711_v11, 0.0 }
 0x862   : > { %6183 = vmatmul.mubr.msk.f32.vlgmr.msra.gmra.mrb[44].mxu0 %vm1082_vm2, %v6713_v31  ;;  %6188 = vmatmul.mubr.msk.f32.vlgmr.msra.gmra.mrb[48].mxu1 %vm1082_vm2, %v6705_v17  ;;  %v3757_v55 = vsel %vm1082_vm2, %v6713_v31, 0.0 }
 0x863   : > { %6395 = vmatpush3.bf16.msra.mxu1 %v6394_v40  ;;  %6398 = vmatpush3.bf16.msra.mxu0 %v6397_v13 }
 0x864   : > { %3749 = vadd.xlane.f32.xlu0 %v3748_v20  ;;  %6194 = vmatprep.mubr.msk.f32.mxu1 %vm6970_vm1, %v6971_v12 }
 0x865   : > { %6399 = vmatprep.subr.bf16.mxu1 %v6969_v5  ;;  %6201 = vmatprep.mubr.msk.f32.mxu0 %vm6970_vm1, %v6971_v12 }
 0x866   : > { %6195 = vmatmul.mubr.msk.f32.vlgmr.msra.gmra.mrb[46].mxu1 %vm1539_vm4, %v6707_v42  ;;  %6211 = vmatprep.subr.mxu0 %v6971_v12 }
 0x867   : > { %6401 = vmatpush3.bf16.msra.mxu1 %v6400_v62  ;;  %6208 = vmatprep.mubr.msk.f32.mxu1 %vm6970_vm1, %v6971_v12 }
 0x868   : > { %3758 = vadd.xlane.f32.xlu0 %v3757_v55  ;;  %6402 = vmatprep.subr.bf16.mxu1 %v6969_v5 }
 0x86a   : > { %6202 = vmatmul.mubr.msk.f32.vlgmr.msra.gmra.mrb[44].mxu0 %vm1539_vm4, %v6711_v11  ;;  %6209 = vmatmul.mubr.msk.f32.vlgmr.msra.gmra.mrb[48].mxu1 %vm1539_vm4, %v7823_v22 }
 0x86b   : > { %6226 = vmatprep.mubr.msk.f32.mxu1 %vm6970_vm1, %v6971_v12  ;;  %6213 = vmatprep.mubr.msk.f32.mxu0 %vm6970_vm1, %v6971_v12 }
 0x870   : > { %6624 = vrot.lane.b32.xlu1 %v7453_v36, %s6974_s22  ;;  %v4240_v36 = vld [vmem:[#allocation10 + $0x10] sm:$0xff] }
 0x871   : > { %6212 = vmatpush3.msra.mxu0 %v4240_v36 }
 0x872   : > { %6406 = vmatprep.subr.bf16.mxu0 %v6969_v5 }
 0x874   : > { %6629 = vrot.lane.b32.xlu1 %v7457_v44, %s6974_s22 }
 0x878   : > { %4333 = vrot.lane.b32.xlu1 %v7455_v37, %s6974_s22 }
 0x87c   : > { %4579 = vrot.lane.b32.xlu1 %v7463_v46, %s6974_s22 }
 0x87e   : > { %6619 = vrot.lane.b32.xlu0 %v7448_v32, %s6974_s22 }
 0x880   : > { %4653 = vrot.lane.b32.xlu1 %v7475_v52, %s6974_s22 }
 0x882   : > { %4415 = vrot.lane.b32.xlu0 %v7461_v45, %s6974_s22 }
 0x886   : > { %4497 = vrot.lane.b32.xlu0 %v7473_v49, %s6974_s22 }
 0x88a   : > { %4727 = vrot.lane.b32.xlu0 %v7483_v56, %s6974_s22 }
 0x89e   : > { %v3753_v37 = vpop.xlane.xlu0 %3752 }
 0x89f   : > { %v3762_v46 = vpop.xlane.xlu1 %3761 }
 0x8a0   : > { %v3765_v41 = vadd.f32 %v3762_v46, %v3753_v37 }
 0x8eb   : > { %v3747_v44 = vpop.xlane.xlu0 %3746 }
 0x8ec   : > { %v3756_v32 = vpop.xlane.xlu1 %3755 }
 0x8ed   : > { %v3763_v24 = vadd.f32 %v3756_v32, %v3747_v44 }
 0x8ef   : > { %6714 = vrcp.f32 %v3763_v24 }
 0x8f0   : > { %v6625_v52 = vpop.permute.xlu1 %6624  ;;  %6716 = vrcp.f32 %v3765_v41 }
 0x8f1   : > { %v3750_v61 = vpop.xlane.xlu0 %3749  ;;  %v6627_v25 = vunpack.i.h.bf16 %v6625_v52  ;;  %v6626_v26 = vunpack.i.l.bf16 %v6625_v52 }
 0x8f3   : > { %v6407_v29 = vpack.c.bf16 %v6627_v25, %v6626_v26 }
 0x8f4   : > { %v6630_v0 = vpop.permute.xlu1 %6629 }
 0x8f5   : > { %v3759_v21 = vpop.xlane.xlu0 %3758  ;;  %v6632_v49 = vunpack.i.h.bf16 %v6630_v0  ;;  %v6631_v56 = vunpack.i.l.bf16 %v6630_v0 }
 0x8f6   : > { %v3764_v57 = vadd.f32 %v3759_v21, %v3750_v61 }
 0x8f7   : > { %v6411_v7 = vpack.c.bf16 %v6632_v49, %v6631_v56 }
 0x8f8   : > { %v4334_v50 = vpop.permute.xlu1 %4333  ;;  %6718 = vrcp.f32 %v3764_v57 }
 0x8f9   : > { %v6620_v22 = vpop.permute.xlu0 %6619  ;;  %v6715_v4 = vpop.eup %6714 }
 0x8fa   : > { %v6622_v17 = vunpack.i.h.bf16 %v6620_v22  ;;  %v6621_v45 = vunpack.i.l.bf16 %v6620_v22  ;;  %v6717_v34 = vpop.eup %6716 }
 0x8fc   : > { %v6403_v2 = vpack.c.bf16 %v6622_v17, %v6621_v45  ;;  %v4580_v28 = vpop.permute.xlu1 %4579 }
 0x8fd   : > { %v4416_v3 = vpop.permute.xlu0 %4415 }
 0x8fe   : > { %6405 = vmatpush3.bf16.xpose.msk.msra.mxu1 %vm7444_vm3, %v6403_v2 }
 0x8ff   : > { %6410 = vmatprep.subr.bf16.mxu1 %v6969_v5 }
 0x900   : > { %v4654_v33 = vpop.permute.xlu1 %4653 }
 0x901   : > { %v4498_v18 = vpop.permute.xlu0 %4497 }
 0x902   : > { %v6719_v38 = vpop.eup %6718 }
 0x905   : > { %6227 = vmatmul.mubr.msk.f32.vlgmr.msra.gmra.mrb[50].mxu1 %vm1082_vm2, %v4334_v50  ;;  %v4728_v1 = vpop.permute.xlu0 %4727 }
 0x906   : > { %6413 = vmatpush3.bf16.xpose.msk.msra.mxu1 %vm7444_vm3, %v6411_v7  ;;  %6240 = vmatprep.mubr.msk.f32.mxu1 %vm6970_vm1, %v6971_v12 }
 0x907   : > { %6253 = vmatprep.subr.mxu1 %v6971_v12 }
 0x90d   : > { %6241 = vmatmul.mubr.msk.f32.vlgmr.msra.gmra.mrb[52].mxu1 %vm1082_vm2, %v4498_v18 }
 0x90e   : > { %6254 = vmatpush3.xpose.msk.msra.mxu1 %vm1082_vm2, %v4728_v1  ;;  %6255 = vmatprep.mubr.msk.f32.mxu1 %vm6970_vm1, %v6971_v12 }
 0x90f   : > { %6263 = vmatprep.subr.mxu1 %v6971_v12 }
 0x911   : > { %6256 = vmatmul.mubr.msk.f32.vlgmr.msra.gmra.mrb[54].mxu1 %vm1082_vm2, %v4498_v18 }
 0x912   : > { %6265 = vmatprep.mubr.msk.f32.mxu1 %vm6970_vm1, %v6971_v12 }
 0x939   : > { %v4069_v14 = vpop.f32.mrb[46].mxu1 }
 0x93a   : > { %v4237_v51 = vmul.f32 %v6715_v4, %v4069_v14  ;;  %v6196_v15 = vpop.f32.mrb[47].mxu1 }
 0x93c   : > { %6214 = vmatmul.mubr.msk.f32.vlgmr.msra.gmra.mrb[34].mxu0 %vm1082_vm2, %v4237_v51 }
 0x93d   : > { %6409 = vmatpush3.bf16.xpose.msk.msra.mxu0 %vm7444_vm3, %v6407_v29  ;;  %v4148_v39 = vpop.f32.mrb[44].mxu0  ;;  %v4227_v27 = vpop.f32.mrb[48].mxu1  ;;  %6216 = vmatprep.mubr.msk.f32.mxu0 %vm6970_vm1, %v6971_v12 }
 0x93e   : > { %v4238_v42 = vmul.f32 %v6719_v38, %v4148_v39  ;;  %v4239_v53 = vmul.f32 %v6717_v34, %v4227_v27  ;;  %v6203_v35 = vpop.f32.mrb[45].mxu0  ;;  %v6210_v54 = vpop.f32.mrb[49].mxu1  ;;  %6243 = vmatprep.subr.mxu0 %v6971_v12 }
 0x940   : > { %6217 = vmatmul.mubr.msk.f32.gmra.mrb[36].mxu0 %vm1082_vm2, %v4238_v42 }
 0x941   : > { %6219 = vmatprep.mubr.msk.f32.mxu0 %vm6970_vm1, %v6971_v12 }
 0x944   : > { %6220 = vmatmul.mubr.msk.f32.gmra.mrb[38].mxu0 %vm1082_vm2, %v4239_v53 }
 0x945   : > { %6233 = vmatprep.mubr.msk.f32.mxu0 %vm6970_vm1, %v6971_v12 }
 0x948   : > { %6234 = vmatmul.mubr.msk.f32.vlgmr.msra.gmra.mrb[46].mxu0 %vm1082_vm2, %v4416_v3 }
 0x949   : > { %6244 = vmatpush3.xpose.msk.msra.mxu0 %vm1082_vm2, %v4580_v28  ;;  %6245 = vmatprep.mubr.msk.f32.mxu0 %vm6970_vm1, %v6971_v12 }
 0x94a   : > { %6248 = vmatprep.subr.mxu0 %v6971_v12 }
 0x94c   : > { %6246 = vmatmul.mubr.msk.f32.vlgmr.msra.gmra.mrb[48].mxu0 %vm1082_vm2, %v4334_v50 }
 0x94d   : > { %6249 = vmatpush3.xpose.msk.msra.mxu0 %vm1082_vm2, %v4654_v33  ;;  %6250 = vmatprep.mubr.msk.f32.mxu0 %vm6970_vm1, %v6971_v12 }
 0x94e   : > { %6258 = vmatprep.subr.mxu0 %v6971_v12 }
 0x950   : > { %6251 = vmatmul.mubr.msk.f32.vlgmr.msra.gmra.mrb[50].mxu0 %vm1082_vm2, %v4416_v3 }
 0x951   : > { %6260 = vmatprep.mubr.msk.f32.mxu0 %vm6970_vm1, %v6971_v12 }
 0x9d8   : > { %v4411_v9 = vpop.f32.mrb[50].mxu1 }
 0x9d9   : > { %v6228_v59 = vpop.f32.mrb[51].mxu1  ;;  %v4801_v30 = vsel %vm1539_vm4, %v4411_v9, -inf }
 0x9da   : > { %4802 = vmax.xlane.f32.xlu1 %v4801_v30 }
 0x9e0   : > { %v4575_v48 = vpop.f32.mrb[52].mxu1 }
 0x9e1   : > { %v6242_v11 = vpop.f32.mrb[53].mxu1  ;;  %v4807_v13 = vsel %vm1539_vm4, %v4575_v48, -inf }
 0x9e2   : > { %4808 = vmax.xlane.f32.xlu0 %v4807_v13 }
 0x9e4   : > { %v4797_v31 = vpop.f32.mrb[54].mxu1 }
 0x9e5   : > { %v6257_v40 = vpop.f32.mrb[55].mxu1 }
 0x9eb   : > { %4861 = vrot.lane.b32.xlu1 %v7538_v8, %s6974_s22  ;;  %v4816_v8 = vsel %vm1082_vm2, %v4797_v31, -inf }
 0x9ef   : > { %5013 = vrot.lane.b32.xlu1 %v7546_v10, %s6974_s22 }
 0x9f3   : > { %6634 = vrot.lane.b32.xlu1 %v7497_v60, %s6974_s22 }
 0xa1b   : > { %v4493_v16 = vpop.f32.mrb[46].mxu0 }
 0xa1c   : > { %v6235_v19 = vpop.f32.mrb[47].mxu0  ;;  %v4804_v20 = vsel %vm1539_vm4, %v4493_v16, -inf }
 0xa1d   : > { %4805 = vmax.xlane.f32.xlu0 %v4804_v20 }
 0xa1f   : > { %v4649_v62 = vpop.f32.mrb[48].mxu0 }
 0xa20   : > { %v6247_v55 = vpop.f32.mrb[49].mxu0  ;;  %v4810_v36 = vsel %vm1082_vm2, %v4649_v62, -inf }
 0xa21   : > { %4811 = vmax.xlane.f32.xlu0 %v4810_v36 }
 0xa23   : > { %v4723_v37 = vpop.f32.mrb[50].mxu0 }
 0xa24   : > { %v6252_v44 = vpop.f32.mrb[51].mxu0  ;;  %v4813_v46 = vsel %vm1082_vm2, %v4723_v37, -inf }
 0xa25   : > { %4817 = vmax.xlane.f32.xlu0 %v4816_v8  ;;  %4814 = vmax.xlane.f32.xlu1 %v4813_v46 }
 0xa36   : > { %6639 = vrot.lane.b32.xlu1 %v7520_v63, %s6974_s22 }
 0xa3b   : > { %4937 = vrot.lane.b32.xlu0 %v7542_v23, %s6974_s22 }
 0xa3f   : > { %6644 = vrot.lane.b32.xlu0 %v7534_v6, %s6974_s22 }
 0xa67   : > { %v4803_v60 = vpop.xlane.xlu1 %4802 }
 0xa6b   : > { %v4862_v10 = vpop.permute.xlu1 %4861 }
 0xa6c   : > { %6259 = vmatpush3.msra.mxu0 %v4862_v10 }
 0xa6d   : > { %6268 = vmatprep.subr.mxu0 %v6971_v12 }
 0xa6f   : > { %v4809_v32 = vpop.xlane.xlu0 %4808  ;;  %v5014_v61 = vpop.permute.xlu1 %5013 }
 0xa73   : > { %v6635_v52 = vpop.permute.xlu1 %6634 }
 0xa74   : > { %v6637_v51 = vunpack.i.h.bf16 %v6635_v52  ;;  %v6636_v15 = vunpack.i.l.bf16 %v6635_v52 }
 0xa76   : > { %v6415_v35 = vpack.c.bf16 %v6637_v51, %v6636_v15 }
 0xaaa   : > { %v4806_v21 = vpop.xlane.xlu0 %4805 }
 0xaae   : > { %v4812_v22 = vpop.xlane.xlu0 %4811 }
 0xaaf   : > { %v4819_v17 = vmax.f32 %v4803_v60, %v4812_v22 }
 0xab1   : > { %v4822_v45 = vsub.f32 %v4411_v9, %v4819_v17  ;;  %v4831_v2 = vsub.f32 %v4649_v62, %v4819_v17 }
 0xab2   : > { %v4818_v63 = vpop.xlane.xlu0 %4817  ;;  %v4815_v0 = vpop.xlane.xlu1 %4814 }
 0xab3   : > { %v4825_v49 = vmul.f32 1.442695, %v4822_v45  ;;  %v4834_v23 = vmul.f32 1.442695, %v4831_v2  ;;  %v4821_v56 = vmax.f32 %v4809_v32, %v4818_v63  ;;  %v4820_v3 = vmax.f32 %v4806_v21, %v4815_v0 }
 0xab5   : > { %6720 = vpow2.f32 %v4825_v49  ;;  %v4824_v6 = vsub.f32 %v4575_v48, %v4821_v56  ;;  %v4833_v7 = vsub.f32 %v4797_v31, %v4821_v56  ;;  %v4823_v50 = vsub.f32 %v4493_v16, %v4820_v3 }
 0xab6   : > { %6722 = vpow2.f32 %v4834_v23  ;;  %v4832_v18 = vsub.f32 %v4723_v37, %v4820_v3  ;;  %v4938_v1 = vpop.permute.xlu0 %4937  ;;  %v6640_v4 = vpop.permute.xlu1 %6639 }
 0xab7   : > { %v4829_v24 = vmul.f32 1.442695, %v4824_v6  ;;  %v4838_v41 = vmul.f32 1.442695, %v4833_v7  ;;  %v4827_v57 = vmul.f32 1.442695, %v4823_v50  ;;  %6264 = vmatpush3.msra.mxu1 %v4938_v1  ;;  %v6642_v39 = vunpack.i.h.bf16 %v6640_v4 }
 0xab8   : > { %v4836_v25 = vmul.f32 1.442695, %v4832_v18  ;;  %6417 = vmatprep.subr.bf16.mxu1 %v6969_v5  ;;  %v6641_v27 = vunpack.i.l.bf16 %v6640_v4 }
 0xab9   : > { %6724 = vpow2.f32 %v4829_v24 }
 0xaba   : > { %6726 = vpow2.f32 %v4838_v41  ;;  %v6645_v34 = vpop.permute.xlu0 %6644  ;;  %v6418_v30 = vpack.c.bf16 %v6642_v39, %v6641_v27 }
 0xabb   : > { %6728 = vpow2.f32 %v4827_v57  ;;  %v6647_v54 = vunpack.i.h.bf16 %v6645_v34  ;;  %v6646_v28 = vunpack.i.l.bf16 %v6645_v34 }
 0xabc   : > { %6730 = vpow2.f32 %v4836_v25 }
 0xabd   : > { %v6421_v11 = vpack.c.bf16 %v6647_v54, %v6646_v28 }
 0xabf   : > { %v6721_v26 = vpop.eup %6720 }
 0xac0   : > { %v6723_v14 = vpop.eup %6722  ;;  %v4840_v29 = vsel %vm1539_vm4, %v6721_v26, 0.0 }
 0xac1   : > { %6261 = vmatmul.mubr.msk.f32.vlgmr.msra.gmra.mrb[52].mxu0 %vm1082_vm2, %v6723_v14  ;;  %v4849_v38 = vsel %vm1082_vm2, %v6723_v14, 0.0  ;;  %4841 = vadd.xlane.f32.xlu1 %v4840_v29 }
 0xac2   : > { %6269 = vmatpush3.msra.mxu0 %v5014_v61  ;;  %4850 = vadd.xlane.f32.xlu0 %v4849_v38 }
 0xac3   : > { %v6725_v42 = vpop.eup %6724  ;;  %6270 = vmatprep.mubr.msk.f32.mxu0 %vm6970_vm1, %v6971_v12  ;;  %6414 = vmatprep.subr.bf16.mxu0 %v6969_v5 }
 0xac4   : > { %v6727_v53 = vpop.eup %6726  ;;  %v4846_v33 = vsel %vm1539_vm4, %v6725_v42, 0.0 }
 0xac5   : > { %v6729_v9 = vpop.eup %6728  ;;  %6271 = vmatmul.mubr.msk.f32.vlgmr.msra.gmra.mrb[54].mxu0 %vm1082_vm2, %v6727_v53  ;;  %4847 = vadd.xlane.f32.xlu1 %v4846_v33  ;;  %v4855_v31 = vsel %vm1082_vm2, %v6727_v53, 0.0 }
 0xac6   : > { %v6731_v59 = vpop.eup %6730  ;;  %6416 = vmatpush3.bf16.msra.mxu0 %v6415_v35  ;;  %v4843_v48 = vsel %vm1539_vm4, %v6729_v9, 0.0  ;;  %6277 = vmatprep.mubr.msk.f32.mxu0 %vm6970_vm1, %v6971_v12 }
 0xac7   : > { %6266 = vmatmul.mubr.msk.f32.vlgmr.msra.gmra.mrb[56].mxu1 %vm1082_vm2, %v6731_v59  ;;  %4844 = vadd.xlane.f32.xlu0 %v4843_v48  ;;  %v4852_v13 = vsel %vm1082_vm2, %v6731_v59, 0.0 }
 0xac8   : > { %6419 = vmatpush3.bf16.msra.mxu1 %v6418_v30  ;;  %6420 = vmatprep.subr.bf16.mxu0 %v6969_v5  ;;  %v5335_v5 = vld [vmem:[#allocation10 + $0x18] sm:$0xff] }
 0xac9   : > { %6278 = vmatmul.mubr.msk.f32.vlgmr.msra.gmra.mrb[52].mxu0 %vm1539_vm4, %v6721_v26  ;;  %6284 = vmatprep.mubr.msk.f32.mxu1 %vm6970_vm1, %v6971_v12 }
 0xaca   : > { %6422 = vmatpush3.bf16.msra.mxu0 %v6421_v11  ;;  %6291 = vmatprep.mubr.msk.f32.mxu0 %vm6970_vm1, %v6971_v12 }
 0xacb   : > { %4853 = vadd.xlane.f32.xlu0 %v4852_v13  ;;  %6294 = vmatprep.subr.mxu0 %v6971_v12 }
 0xacd   : > { %6292 = vmatmul.mubr.msk.f32.vlgmr.msra.gmra.mrb[54].mxu0 %vm1539_vm4, %v6725_v42 }
 0xace   : > { %6296 = vmatprep.mubr.msk.f32.mxu0 %vm6970_vm1, %v6971_v12  ;;  %6295 = vmatpush3.msra.mxu0 %v5335_v5 }
 0xacf   : > { %6285 = vmatmul.mubr.msk.f32.vlgmr.msra.gmra.mrb[56].mxu1 %vm1539_vm4, %v6729_v9  ;;  %4856 = vadd.xlane.f32.xlu0 %v4855_v31 }
 0xb4e   : > { %v4842_v19 = vpop.xlane.xlu1 %4841 }
 0xb4f   : > { %v4851_v40 = vpop.xlane.xlu0 %4850 }
 0xb50   : > { %v4858_v20 = vadd.f32 %v4851_v40, %v4842_v19 }
 0xb52   : > { %6732 = vrcp.f32 %v4858_v20  ;;  %v4848_v37 = vpop.xlane.xlu1 %4847 }
 0xb54   : > { %v4845_v16 = vpop.xlane.xlu0 %4844 }
 0xb58   : > { %v4854_v62 = vpop.xlane.xlu0 %4853 }
 0xb59   : > { %v4859_v55 = vadd.f32 %v4854_v62, %v4845_v16 }
 0xb5b   : > { %6734 = vrcp.f32 %v4859_v55 }
 0xb5c   : > { %v4857_v36 = vpop.xlane.xlu0 %4856  ;;  %v6733_v8 = vpop.eup %6732 }
 0xb5d   : > { %v4860_v44 = vadd.f32 %v4857_v36, %v4848_v37 }
 0xb5f   : > { %6736 = vrcp.f32 %v4860_v44 }
 0xb65   : > { %v6735_v21 = vpop.eup %6734 }
 0xb69   : > { %v6737_v45 = vpop.eup %6736 }
 0xb9c   : > { %v5164_v46 = vpop.f32.mrb[52].mxu0 }
 0xb9d   : > { %v5332_v60 = vmul.f32 %v6733_v8, %v5164_v46  ;;  %v6279_v10 = vpop.f32.mrb[53].mxu0 }
 0xb9f   : > { %6297 = vmatmul.mubr.msk.f32.vlgmr.msra.gmra.mrb[34].mxu0 %vm1082_vm2, %v5332_v60 }
 0xba0   : > { %v5322_v32 = vpop.f32.mrb[54].mxu0  ;;  %6299 = vmatprep.mubr.msk.f32.mxu0 %vm6970_vm1, %v6971_v12 }
 0xba1   : > { %v6293_v61 = vpop.f32.mrb[55].mxu0  ;;  %v5334_v2 = vmul.f32 %v6737_v45, %v5322_v32 }
 0xba2   : > { %v5243_v52 = vpop.f32.mrb[56].mxu1 }
 0xba3   : > { %v5333_v22 = vmul.f32 %v6735_v21, %v5243_v52  ;;  %v6286_v17 = vpop.f32.mrb[57].mxu1 }
 0xba5   : > { %6300 = vmatmul.mubr.msk.f32.gmra.mrb[36].mxu0 %vm1082_vm2, %v5333_v22 }
 0xba6   : > { %6302 = vmatprep.mubr.msk.f32.mxu0 %vm6970_vm1, %v6971_v12 }
 0xba9   : > { %6303 = vmatmul.mubr.msk.f32.gmra.mrb[38].mxu0 %vm1082_vm2, %v5334_v2 }
 0xc72   : > { %v5411_v63 = vpop.f32.mrb[34].mxu0 }
 0xc73   : > { %v6423_v0 = vadd.f32 %v5411_v63, %v7801_v58  ;;  %v6298_v49 = vpop.f32.mrb[35].mxu0 }
 0xc75   : > { %5428 = vst.msk [vmem:[%s434_s6] sm:$0xff] %vm444_vm0, %v6423_v0 }
 0xc78   : > { %v5416_v23 = vpop.f32.mrb[36].mxu0 }
 0xc79   : > { %v6424_v56 = vadd.f32 %v5416_v23, %v7803_v43  ;;  %v6301_v3 = vpop.f32.mrb[37].mxu0 }
 0xc7b   : > { %5429 = vst.msk [vmem:[%s434_s6 + $0x8] sm:$0xff] %vm444_vm0, %v6424_v56 }
 0xc7c   : > { %v5421_v12 = vpop.f32.mrb[38].mxu0 }
 0xc7d   : > { %v6425_v58 = vadd.f32 %v5421_v12, %v7805_v47  ;;  %v6304_v6 = vpop.f32.mrb[39].mxu0 }
 0xc7f   : > { %5430 = vst.msk [vmem:[%s434_s6 + $0x10] sm:$0xff] %vm444_vm0, %v6425_v58 }
 0xc80   : > { %6895 = shalt.err (!%p6892_p3)
}
 0xc81   : > { %s6896_s9 = scalar_lea.hbm %s7983_s20, 384  ;;  %s6900_s0 = scalar_lea.hbm %s8078_s18, 768 }
 0xc82   : > { %p6897_p9 = scmp.ne.s32.totalorder %s7983_s20, %s6896_s9  ;;  %p6901_p7 = scmp.lt.u32.totalorder %s7983_s20, %s8078_s18 }
 0xc83   : > { %p6902_p12 = scmp.lt.u32.totalorder %s6900_s0, %s6896_s9  ;;  %p6904_p2 = scmp.lt.u32.totalorder %s6896_s9, %s7983_s20 }
 0xc84   : > { %p6898_p13 = pnand %p6897_p9, %p7182_p5 }
 0xc85   : > { %p6903_p1 = por %p6902_p12, %p6901_p7 }
 0xc86   : > { %p6899_p11 = pneg %p6898_p13 }
 0xc87   : > { %p6905_p4 = por %p6904_p2, %p6903_p1 }
 0xc89   : > { %p6906_p0 = pnand %p6905_p4, %p6899_p11 }
 0xc8b   : > { %6909 = shalt.err (!%p6906_p0)
}
 0xc8c   : > { %s6976_s22 = smov 128   ;;  %s6977_s6 = smov 8  }
 0xc8d   : > { %6482 = dma.vmem_to_hbm [thread:$0]  (%p7182_p5), %s7976_s28, 384, %s7983_s20, %s5432_s15, %s6976_s22, %s6976_s22, %s6977_s6  }
 0xc8e PF: > { %s8079_s19 = sld [smem:[#allocation17_spill]]  ;;  %s8080_s7 = sld [smem:[#allocation18_spill]] }
 0xc8f   : > { %p8082_p6 = scmp.ge.s32.totalorder %s6960_s12, 2 }
 0xc94   : > { %s5460_s17 = sand.u32 1, %s8079_s19   ;;  %p8081_p8 = scmp.ne.s32.totalorder %s8080_s7, 0 }
 0xc95   : > { %s5461_s13 = scalar_lea.sflag [#allocation4], %s5460_s17 }
 0xc96   : > { %p6502_p10 = pnand %p8082_p6, %p8081_p8 }
 0xc98   : > { %6943 = dma.done.wait (!%p6502_p10), %s5461_s13, 384  }
 0xc99   : > { %6945 = vsyncadd (!%p6502_p10), %s5461_s13, 4294966912  ;;  %p26_p3 = scmp.ge.s32.totalorder %s7168_s14, 4   ;;  %s8083_s30 = smov %s6952_s10 }
 0xc9a   : > { %s8084_s10 = smov %s6956_s11  ;;  %s8085_s11 = smov %s7178_s16 }
 0xc9b   : > { %s8086_s12 = smov %s7168_s14  ;;  %28 = sbr.rel (!%p26_p3) target bundleno = 14 (0xe), region = 127 }
 0xca2   :  { %5466 = vsyncpa [#allocation3], 1 }
 0xca3   :  { %5468 = vsyncpa [#allocation3 + $0x1], 1 }
 0xca4   :  { %5469 = vsyncpa [#allocation6], 1 }
 0xca5   :  { %5471 = vsyncpa [#allocation6 + $0x1], 1 }
 0xca6   :  { %5472 = vsyncpa [#allocation9], 1 }
 0xca7   :  { %5473 = vsyncpa [#allocation4], 1 }
 0xca8   :  { %5475 = vsyncpa [#allocation4 + $0x1], 1 }

</bundles_post_ra>
